<compile_context>
chip_gen: v7x
topology: tpu7x:2x2x1
jax: 0.10.0
libtpu: 0.0.40
codegen_flags: <defaults>
</compile_context>

<pallas_src>
import functools

import jax
import jax.numpy as jnp
from jax.experimental import pallas as pl
from jax.experimental.pallas import tpu as pltpu

OUT_ROW = 3  # the reference hard-codes outputs_acc[3]


# ------------------------------ fused kernel ------------------------------

def _lstm_network_kernel(
        pos_ref, dist_ref, vel_ref, hprev_ref,
        win_ref, inb_ref, wedge_ref, ihb_ref, who_ref, outb_ref,
        cwih0_ref, cwhh0_ref, cbx0_ref, cbhn0_ref, cfused_ref, cb4_ref,
        vwih0_ref, vwhh0_ref, vbx0_ref, vbhn0_ref, vfused_ref, vb4_ref,
        out_ref, h_ref,
        pos_fb,
        *, L, N, R):
    """One prediction step of lstm_network / HumanNode per grid iteration."""
    T1 = L + 1
    step = pl.program_id(0)

    # Step 0: seed the position feedback with the original node positions.
    @pl.when(step == 0)
    def _():
        pos_fb[...] = pos_ref[...]

    pos = pos_fb[...]                                    # (L*N, 2) current positions
    node_pos = pos_ref[...]                              # (L*N, 2) original, VMEM-resident

    # ---- encoders (K = 2 / K = 1 -> rank-1 VPU path, no MXU) ----
    win = win_ref[...]                                   # (2, E)
    enc = jnp.maximum(
        pos[:, 0:1] * win[0:1, :] + pos[:, 1:2] * win[1:2, :] + inb_ref[...], 0.0)   # (L*N, E)
    edge = jnp.maximum(
        dist_ref[...][:, 0:1] * wedge_ref[...] + ihb_ref[...], 0.0)                  # (N, E)

    def gru_cell_l0(gx_t, h, whh, bhn_b):
        """Layer-0 GRU cell: hoisted input projection gx_t, recurrent matmul here."""
        gh = jnp.dot(h, whh, preferred_element_type=jnp.float32)                     # (N, 3R)
        r = jax.nn.sigmoid(gx_t[:, 0:R] + gh[:, 0:R])
        z = jax.nn.sigmoid(gx_t[:, R:2 * R] + gh[:, R:2 * R])
        n = jnp.tanh(gx_t[:, 2 * R:3 * R] + r * (gh[:, 2 * R:3 * R] + bhn_b))
        return (1.0 - z) * n + z * h

    def gru_cell_fused(x_t, h, w4, b4):
        """Layer >= 1 GRU cell: one fused [x_t, h] @ (2R, 4R) matmul per cell."""
        xh = jnp.concatenate([x_t, h], axis=1)                                       # (N, 2R)
        g = jnp.dot(xh, w4, preferred_element_type=jnp.float32) + b4                 # (N, 4R)
        r = jax.nn.sigmoid(g[:, 0:R])
        z = jax.nn.sigmoid(g[:, R:2 * R])
        n = jnp.tanh(g[:, 2 * R:3 * R] + r * g[:, 3 * R:4 * R])
        return (1.0 - z) * n + z * h

    # ---- node GRU (self.cell), seeded with the ORIGINAL prev_hidden ----
    # Layer 0: input projection hoisted over the full sequence (input known up front).
    cwih0 = cwih0_ref[...]
    cbx0 = cbx0_ref[...]
    gx_enc = jnp.dot(enc, cwih0, preferred_element_type=jnp.float32) + cbx0          # (L*N, 3R)
    gx_edge = jnp.dot(edge, cwih0, preferred_element_type=jnp.float32) + cbx0        # (N, 3R)
    cwhh0 = cwhh0_ref[...]
    cbhn0 = jnp.broadcast_to(cbhn0_ref[...], (N, R))     # hoisted broadcast

    h0 = hprev_ref[0]
    layer_out = []
    for t in range(T1):
        gx_t = gx_enc[t * N:(t + 1) * N, :] if t < L else gx_edge
        h0 = gru_cell_l0(gx_t, h0, cwhh0, cbhn0)
        layer_out.append(h0)
    h_cell = [h0]

    # Layers 1..L-1: per-step fused cell -> wavefront-shallow dependence DAG.
    for l in range(1, L):
        w4 = cfused_ref[l - 1]                           # (2R, 4R)
        b4 = cb4_ref[l - 1]                              # (1, 4R)
        hl = hprev_ref[l]
        cur = []
        for t in range(T1):
            hl = gru_cell_fused(layer_out[t], hl, w4, b4)
            cur.append(hl)
        h_cell.append(hl)
        layer_out = cur
    cell_out = layer_out                                 # T1 x (N, R) last-layer sequence

    # ---- velocity GRU (seq len 1), seeded with the node-GRU final hiddens ----
    vbhn0 = jnp.broadcast_to(vbhn0_ref[...], (N, R))
    gxv = vel_ref[...][:, 0:1] * vwih0_ref[...] + vbx0_ref[...]                      # (N, 3R)
    hv = gru_cell_l0(gxv, h_cell[0], vwhh0_ref[...], vbhn0)
    h_vel = [hv]
    for l in range(1, L):
        hv = gru_cell_fused(h_vel[-1], h_cell[l], vfused_ref[l - 1], vb4_ref[l - 1])
        h_vel.append(hv)
    vel_out = h_vel[-1]                                  # (N, R)

    # ---- output head: all position rows + velocity row share one matmul ----
    head_in = jnp.concatenate(cell_out + [vel_out], axis=0)                          # ((T1+1)*N, R)
    head = jnp.dot(head_in, who_ref[...],
                   preferred_element_type=jnp.float32) + outb_ref[...]               # ((T1+1)*N, 2)
    v_out = head[T1 * N:(T1 + 1) * N, :]                                             # (N, 2)

    # ---- single-store epilogue ----
    # External per-step output: final_output[0] + node_pos[OUT_ROW]  (one store).
    out_ref[0, :, :] = head[0:N, :] + v_out + node_pos[OUT_ROW * N:(OUT_ROW + 1) * N, :]
    # Feedback for the next step: final_output[0:L] + node_pos       (one store).
    pos_fb[...] = head[0:L * N, :] + jnp.concatenate([v_out] * L, axis=0) + node_pos
    # Hidden state: constant out index map -> only the last step's value reaches HBM.
    h_ref[...] = jnp.stack(h_vel, axis=0)


# ------------------------ lstm_network forward pass ------------------------

def _resident_spec(a):
    """Full-array block with a constant index_map: DMA'd once, VMEM-resident."""
    nd = a.ndim
    return pl.BlockSpec(a.shape, lambda step, _nd=nd: (0,) * _nd)


@functools.partial(jax.jit, static_argnames=("pred_len", "max_len"))
def lstm_network_forward(packed, node_pos, node_edges, velocity,
                         prev_hidden, prev_cell, pred_len, max_len):
    # TODO(synk): graph bookkeeping (graph_step / sg / cr adjacency, distance
    # matrices, per-node state writes and the updateAdj=True edge path) has no
    # tensor semantics available; only the HumanNode recurrent compute path is
    # reproduced.
    del prev_cell
    L, N, _ = node_pos.shape
    R = prev_hidden.shape[-1]
    assert L > OUT_ROW, "reference indexes outputs_acc[3]; need num_layers >= 4"

    # Loop-invariant preprocessing (done once, outside the prediction loop).
    dist_T = node_edges[:, :max_len].T                   # (N, 1)
    if velocity.shape[0] < max_len:
        vel_pad = jnp.concatenate(
            [velocity,
             jnp.zeros((max_len - velocity.shape[0], velocity.shape[1]), jnp.float32)],
            axis=0)
    else:
        vel_pad = velocity[:max_len]

    args = (node_pos.reshape(L * N, 2).astype(jnp.float32), dist_T, vel_pad, prev_hidden,
            packed['win_T'], packed['in_bias'], packed['w_edge_tmp_T'], packed['ih_bias'],
            packed['who_T'], packed['out_bias'],
            packed['cell_wih0'], packed['cell_whh0'], packed['cell_bx0'],
            packed['cell_bhn0'], packed['cell_fused'], packed['cell_b4'],
            packed['vel_wih0'], packed['vel_whh0'], packed['vel_bx0'],
            packed['vel_bhn0'], packed['vel_fused'], packed['vel_b4'])

    kernel = functools.partial(_lstm_network_kernel, L=L, N=N, R=R)
    outputs_acc, hidden_state = pl.pallas_call(
        kernel,
        out_shape=(jax.ShapeDtypeStruct((pred_len, N, 2), jnp.float32),
                   jax.ShapeDtypeStruct((L, N, R), jnp.float32)),
        grid_spec=pltpu.PrefetchScalarGridSpec(
            num_scalar_prefetch=0,
            grid=(pred_len,),
            in_specs=[_resident_spec(a) for a in args],
            out_specs=(
                # reference PREPENDS each new step: step s -> row pred_len-1-s
                pl.BlockSpec((1, N, 2), lambda step: (pred_len - 1 - step, 0, 0)),
                pl.BlockSpec((L, N, R), lambda step: (0, 0, 0)),
            ),
            scratch_shapes=[pltpu.VMEM((L * N, 2), jnp.float32)],
        ),
        compiler_params=pltpu.CompilerParams(
            dimension_semantics=("arbitrary",)),
    )(*args)

    cell_state = jnp.zeros((1, 256), jnp.float32)        # reference hard-codes this
    return outputs_acc, hidden_state, cell_state, max_len


# ------------------------- deterministic parameters -------------------------

def init_params(key, num_layers, emb, rnn):
    keys = iter(jax.random.split(key, 8 + 8 * num_layers))
    normal = lambda kk, shape: 0.5 * jax.random.normal(kk, shape, jnp.float32)
    unif = lambda kk, shape, b: jax.random.uniform(kk, shape, jnp.float32, -b, b)
    bnd = 1.0 / emb
    params = {
        'win_T': normal(next(keys), (2, emb)),           # win: (emb, 2), stored transposed
        'in_bias': unif(next(keys), (1, emb), bnd),
        'w_edge_tmp_T': normal(next(keys), (1, emb)),    # w_edge_tmp: (emb, 1), transposed
        'ih_bias': unif(next(keys), (1, emb), bnd),
        'who_T': normal(next(keys), (rnn, 2)),           # who: (2, rnn), transposed
        'out_bias': unif(next(keys), (1, 2), bnd),
    }

    def gru_params(input_size):
        s = rnn ** -0.5
        layers = []
        for l in range(num_layers):
            in_l = input_size if l == 0 else rnn
            layers.append({
                'wih_T': unif(next(keys), (in_l, 3 * rnn), s),
                'whh_T': unif(next(keys), (rnn, 3 * rnn), s),
                'bih': unif(next(keys), (1, 3 * rnn), s),
                'bhh': unif(next(keys), (1, 3 * rnn), s),
            })
        return layers

    params['cell'] = gru_params(emb)    # self.cell   : input_size = emb
    params['vel'] = gru_params(1)       # self.vel_gru: input_size = 1
    return params


def pack_params(params, num_layers, rnn):
    """Pre-pack GRU weights for the fused kernel.

    Layer 0 keeps separate input/recurrent weights (its input projection is
    hoisted over the whole sequence, with b_hr/b_hz folded into the input bias).
    Layers >= 1 are packed into one (2R, 4R) matrix so each cell is a single
    [x, h] matmul:
        cols [0:R]   r gate          cols [2R:3R] x-part of n (+ b_in)
        cols [R:2R]  z gate          cols [3R:4R] h-part of n (+ b_hn)
    """
    assert num_layers >= 2
    R = rnn

    def pack_gru(layers):
        p0 = layers[0]
        bx0 = p0['bih'] + jnp.concatenate(
            [p0['bhh'][:, 0:2 * R], jnp.zeros((1, R), jnp.float32)], axis=1)
        bhn0 = p0['bhh'][:, 2 * R:3 * R]
        fused, b4 = [], []
        for p in layers[1:]:
            w = jnp.zeros((2 * R, 4 * R), jnp.float32)
            w = w.at[0:R, 0:3 * R].set(p['wih_T'])
            w = w.at[R:2 * R, 0:2 * R].set(p['whh_T'][:, 0:2 * R])
            w = w.at[R:2 * R, 3 * R:4 * R].set(p['whh_T'][:, 2 * R:3 * R])
            b = jnp.concatenate(
                [p['bih'][:, 0:2 * R] + p['bhh'][:, 0:2 * R],
                 p['bih'][:, 2 * R:3 * R],
                 p['bhh'][:, 2 * R:3 * R]], axis=1)
            fused.append(w)
            b4.append(b)
        return (p0['wih_T'], p0['whh_T'], bx0, bhn0, jnp.stack(fused), jnp.stack(b4))

    cw0, cwh0, cbx0, cbhn0, cf, cb4 = pack_gru(params['cell'])
    vw0, vwh0, vbx0, vbhn0, vf, vb4 = pack_gru(params['vel'])
    return {
        'win_T': params['win_T'], 'in_bias': params['in_bias'],
        'w_edge_tmp_T': params['w_edge_tmp_T'], 'ih_bias': params['ih_bias'],
        'who_T': params['who_T'], 'out_bias': params['out_bias'],
        'cell_wih0': cw0, 'cell_whh0': cwh0, 'cell_bx0': cbx0, 'cell_bhn0': cbhn0,
        'cell_fused': cf, 'cell_b4': cb4,
        'vel_wih0': vw0, 'vel_whh0': vwh0, 'vel_bx0': vbx0, 'vel_bhn0': vbhn0,
        'vel_fused': vf, 'vel_b4': vb4,
    }


# --------------------------- pure-JAX reference ---------------------------

def _gru_ref(layers, x_seq, h0):
    """Plain multi-layer GRU (PyTorch semantics, batch_first=False)."""
    R = h0.shape[-1]
    T = x_seq.shape[0]
    h_finals = []
    cur = x_seq
    for l, p in enumerate(layers):
        hl = h0[l]
        outs = []
        for t in range(T):
            gx = cur[t] @ p['wih_T'] + p['bih']
            gh = hl @ p['whh_T'] + p['bhh']
            r = jax.nn.sigmoid(gx[:, 0:R] + gh[:, 0:R])
            z = jax.nn.sigmoid(gx[:, R:2 * R] + gh[:, R:2 * R])
            n = jnp.tanh(gx[:, 2 * R:3 * R] + r * gh[:, 2 * R:3 * R])
            hl = (1.0 - z) * n + z * hl
            outs.append(hl)
        h_finals.append(hl)
        cur = jnp.stack(outs, axis=0)
    return cur, jnp.stack(h_finals, axis=0)


def lstm_network_reference(params, node_pos, node_edges, velocity,
                           prev_hidden, pred_len, max_len):
    L, N, _ = node_pos.shape
    dist = node_edges[:, :max_len]                       # (1, N)
    vel = velocity[:max_len]
    if vel.shape[0] < max_len:
        vel = jnp.concatenate(
            [vel, jnp.zeros((max_len - vel.shape[0], vel.shape[1]), jnp.float32)], axis=0)

    def human_node(position):
        enc = jax.nn.relu(position @ params['win_T'] + params['in_bias'])            # (L, N, E)
        edge = jax.nn.relu(dist.T @ params['w_edge_tmp_T'] + params['ih_bias'])      # (N, E)
        x = jnp.concatenate([enc, edge[None]], axis=0)                               # (T1, N, E)
        seq, h_curr = _gru_ref(params['cell'], x, prev_hidden)
        pos_out = seq @ params['who_T'] + params['out_bias']                         # (T1, N, 2)
        vseq, h_vel = _gru_ref(params['vel'], vel[None], h_curr)
        vel_out = vseq @ params['who_T'] + params['out_bias']                        # (1, N, 2)
        return pos_out + vel_out, h_vel

    outputs, hidden = human_node(node_pos)
    acc = outputs[0:1] + node_pos                        # (L, N, 2) via broadcast
    for _ in range(pred_len - 1):
        outputs, hidden = human_node(outputs[0:L] + node_pos)
        acc = jnp.concatenate([outputs[0:1] + node_pos, acc], axis=1)
    acc = acc[OUT_ROW].reshape(pred_len, acc.shape[1] // pred_len, 2)
    return acc, hidden


# ----------------------------------- main -----------------------------------

if __name__ == "__main__":
    num_layers = 4            # >= 4 (reference indexes outputs_acc[3])
    max_len = 8
    rnn_size = 32             # human_node_rnn_size
    emb_size = 16             # human_node_embedding_size
    pred_len = 3

    key = jax.random.PRNGKey(0)
    kp, k1, k2, k3 = jax.random.split(key, 4)
    params = init_params(kp, num_layers, emb_size, rnn_size)
    packed = pack_params(params, num_layers, rnn_size)

    node_pos = jax.random.normal(k1, (num_layers, max_len, 2), jnp.float32)
    node_edges = jax.random.normal(k2, (1, max_len), jnp.float32)
    velocity = jax.random.normal(k3, (max_len, 1), jnp.float32)
    prev_hidden = jnp.zeros((num_layers, max_len, rnn_size), jnp.float32)
    prev_cell = jnp.zeros((num_layers, max_len, rnn_size), jnp.float32)

    outputs_acc, hidden, cell, ml = lstm_network_forward(
        packed, node_pos, node_edges, velocity, prev_hidden, prev_cell,
        pred_len=pred_len, max_len=max_len)
    jax.block_until_ready((outputs_acc, hidden, cell))

    assert outputs_acc.shape == (pred_len, max_len, 2), outputs_acc.shape
    assert hidden.shape == (num_layers, max_len, rnn_size), hidden.shape
    assert cell.shape == (1, 256), cell.shape

    # Numerical check against a plain-JAX reference of the same forward math.
    ref_out, ref_hidden = lstm_network_reference(
        params, node_pos, node_edges, velocity, prev_hidden, pred_len, max_len)
    assert jnp.allclose(outputs_acc, ref_out, atol=2e-3, rtol=2e-3), \
        float(jnp.max(jnp.abs(outputs_acc - ref_out)))
    assert jnp.allclose(hidden, ref_hidden, atol=2e-3, rtol=2e-3), \
        float(jnp.max(jnp.abs(hidden - ref_hidden)))

    print("KERNEL_OK")
</pallas_src>

<mosaic_0001>
module attributes {stable_mosaic.version = 11 : i64} {
  func.func @_lstm_network_kernel(%arg0: i32, %arg1: memref<32x2xf32, #tpu.memory_space<vmem>>, %arg2: memref<8x1xf32, #tpu.memory_space<vmem>>, %arg3: memref<8x1xf32, #tpu.memory_space<vmem>>, %arg4: memref<4x8x32xf32, #tpu.memory_space<vmem>>, %arg5: memref<2x16xf32, #tpu.memory_space<vmem>>, %arg6: memref<1x16xf32, #tpu.memory_space<vmem>>, %arg7: memref<1x16xf32, #tpu.memory_space<vmem>>, %arg8: memref<1x16xf32, #tpu.memory_space<vmem>>, %arg9: memref<32x2xf32, #tpu.memory_space<vmem>>, %arg10: memref<1x2xf32, #tpu.memory_space<vmem>>, %arg11: memref<16x96xf32, #tpu.memory_space<vmem>>, %arg12: memref<32x96xf32, #tpu.memory_space<vmem>>, %arg13: memref<1x96xf32, #tpu.memory_space<vmem>>, %arg14: memref<1x32xf32, #tpu.memory_space<vmem>>, %arg15: memref<3x64x128xf32, #tpu.memory_space<vmem>>, %arg16: memref<3x1x128xf32, #tpu.memory_space<vmem>>, %arg17: memref<1x96xf32, #tpu.memory_space<vmem>>, %arg18: memref<32x96xf32, #tpu.memory_space<vmem>>, %arg19: memref<1x96xf32, #tpu.memory_space<vmem>>, %arg20: memref<1x32xf32, #tpu.memory_space<vmem>>, %arg21: memref<3x64x128xf32, #tpu.memory_space<vmem>>, %arg22: memref<3x1x128xf32, #tpu.memory_space<vmem>>, %arg23: memref<1x8x2xf32, #tpu.memory_space<vmem>>, %arg24: memref<4x8x32xf32, #tpu.memory_space<vmem>>, %arg25: memref<32x2xf32, #tpu.memory_space<vmem>>) attributes {dimension_semantics = [#tpu.dimension_semantics<arbitrary>], iteration_bounds = array<i64: 3>, scalar_prefetch = 0 : i64, scratch_operands = 1 : i64, tpu.core_type = #tpu.core_type<tc>, window_params = [{pipeline_mode = #tpu.pipeline_mode<synchronous>, transform_indices = @transform_0, window_bounds = array<i64: 32, 2>}, {pipeline_mode = #tpu.pipeline_mode<synchronous>, transform_indices = @transform_1, window_bounds = array<i64: 8, 1>}, {pipeline_mode = #tpu.pipeline_mode<synchronous>, transform_indices = @transform_2, window_bounds = array<i64: 8, 1>}, {pipeline_mode = #tpu.pipeline_mode<synchronous>, transform_indices = @transform_3, window_bounds = array<i64: 4, 8, 32>}, {pipeline_mode = #tpu.pipeline_mode<synchronous>, transform_indices = @transform_4, window_bounds = array<i64: 2, 16>}, {pipeline_mode = #tpu.pipeline_mode<synchronous>, transform_indices = @transform_5, window_bounds = array<i64: 1, 16>}, {pipeline_mode = #tpu.pipeline_mode<synchronous>, transform_indices = @transform_6, window_bounds = array<i64: 1, 16>}, {pipeline_mode = #tpu.pipeline_mode<synchronous>, transform_indices = @transform_7, window_bounds = array<i64: 1, 16>}, {pipeline_mode = #tpu.pipeline_mode<synchronous>, transform_indices = @transform_8, window_bounds = array<i64: 32, 2>}, {pipeline_mode = #tpu.pipeline_mode<synchronous>, transform_indices = @transform_9, window_bounds = array<i64: 1, 2>}, {pipeline_mode = #tpu.pipeline_mode<synchronous>, transform_indices = @transform_10, window_bounds = array<i64: 16, 96>}, {pipeline_mode = #tpu.pipeline_mode<synchronous>, transform_indices = @transform_11, window_bounds = array<i64: 32, 96>}, {pipeline_mode = #tpu.pipeline_mode<synchronous>, transform_indices = @transform_12, window_bounds = array<i64: 1, 96>}, {pipeline_mode = #tpu.pipeline_mode<synchronous>, transform_indices = @transform_13, window_bounds = array<i64: 1, 32>}, {pipeline_mode = #tpu.pipeline_mode<synchronous>, transform_indices = @transform_14, window_bounds = array<i64: 3, 64, 128>}, {pipeline_mode = #tpu.pipeline_mode<synchronous>, transform_indices = @transform_15, window_bounds = array<i64: 3, 1, 128>}, {pipeline_mode = #tpu.pipeline_mode<synchronous>, transform_indices = @transform_16, window_bounds = array<i64: 1, 96>}, {pipeline_mode = #tpu.pipeline_mode<synchronous>, transform_indices = @transform_17, window_bounds = array<i64: 32, 96>}, {pipeline_mode = #tpu.pipeline_mode<synchronous>, transform_indices = @transform_18, window_bounds = array<i64: 1, 96>}, {pipeline_mode = #tpu.pipeline_mode<synchronous>, transform_indices = @transform_19, window_bounds = array<i64: 1, 32>}, {pipeline_mode = #tpu.pipeline_mode<synchronous>, transform_indices = @transform_20, window_bounds = array<i64: 3, 64, 128>}, {pipeline_mode = #tpu.pipeline_mode<synchronous>, transform_indices = @transform_21, window_bounds = array<i64: 3, 1, 128>}, {transform_indices = @transform_22, window_bounds = array<i64: 1, 8, 2>}, {pipeline_mode = #tpu.pipeline_mode<synchronous>, transform_indices = @transform_23, window_bounds = array<i64: 4, 8, 32>}]} {
    %c0_i32 = arith.constant 0 : i32
    %0 = arith.cmpi eq, %arg0, %c0_i32 : i32
    %1 = arith.extui %0 : i1 to i32
    %c0_i32_0 = arith.constant 0 : i32
    %2 = arith.cmpi ne, %1, %c0_i32_0 : i32
    scf.if %2 {
      %c0_189 = arith.constant 0 : index
      %c0_190 = arith.constant 0 : index
      %753 = vector.load %arg1[%c0_189, %c0_190] : memref<32x2xf32, #tpu.memory_space<vmem>>, vector<32x2xf32>
      %c0_191 = arith.constant 0 : index
      %c0_192 = arith.constant 0 : index
      %754 = vector.load %arg25[%c0_191, %c0_192] : memref<32x2xf32, #tpu.memory_space<vmem>>, vector<32x2xf32>
      tpu.vector_store %arg25[%c0_191, %c0_192], %753 {strides = array<i32>} : memref<32x2xf32, #tpu.memory_space<vmem>>, vector<32x2xf32>,
    } else {
    }
    %c0 = arith.constant 0 : index
    %c0_1 = arith.constant 0 : index
    %3 = vector.load %arg25[%c0, %c0_1] : memref<32x2xf32, #tpu.memory_space<vmem>>, vector<32x2xf32>
    %c0_2 = arith.constant 0 : index
    %c0_3 = arith.constant 0 : index
    %4 = vector.load %arg1[%c0_2, %c0_3] : memref<32x2xf32, #tpu.memory_space<vmem>>, vector<32x2xf32>
    %c0_4 = arith.constant 0 : index
    %c0_5 = arith.constant 0 : index
    %5 = vector.load %arg5[%c0_4, %c0_5] : memref<2x16xf32, #tpu.memory_space<vmem>>, vector<2x16xf32>
    %6 = vector.extract_strided_slice %3 {offsets = [0, 0], sizes = [32, 1], strides = [1, 1]} : vector<32x2xf32> to vector<32x1xf32>
    %7 = vector.extract_strided_slice %5 {offsets = [0, 0], sizes = [1, 16], strides = [1, 1]} : vector<2x16xf32> to vector<1x16xf32>
    %8 = vector.broadcast %6 : vector<32x1xf32> to vector<32x16xf32>
    %9 = vector.broadcast %7 : vector<1x16xf32> to vector<32x16xf32>
    %10 = arith.mulf %8, %9 : vector<32x16xf32>
    %11 = vector.extract_strided_slice %3 {offsets = [0, 1], sizes = [32, 1], strides = [1, 1]} : vector<32x2xf32> to vector<32x1xf32>
    %12 = vector.extract_strided_slice %5 {offsets = [1, 0], sizes = [1, 16], strides = [1, 1]} : vector<2x16xf32> to vector<1x16xf32>
    %13 = vector.broadcast %11 : vector<32x1xf32> to vector<32x16xf32>
    %14 = vector.broadcast %12 : vector<1x16xf32> to vector<32x16xf32>
    %15 = arith.mulf %13, %14 : vector<32x16xf32>
    %16 = arith.addf %10, %15 : vector<32x16xf32>
    %c0_6 = arith.constant 0 : index
    %c0_7 = arith.constant 0 : index
    %17 = vector.load %arg6[%c0_6, %c0_7] : memref<1x16xf32, #tpu.memory_space<vmem>>, vector<1x16xf32>
    %18 = vector.broadcast %17 : vector<1x16xf32> to vector<32x16xf32>
    %19 = arith.addf %16, %18 : vector<32x16xf32>
    %cst = arith.constant 0.000000e+00 : f32
    %20 = vector.broadcast %cst : f32 to vector<32x16xf32>
    %21 = arith.maximumf %19, %20 : vector<32x16xf32>
    %c0_8 = arith.constant 0 : index
    %c0_9 = arith.constant 0 : index
    %22 = vector.load %arg2[%c0_8, %c0_9] : memref<8x1xf32, #tpu.memory_space<vmem>>, vector<8x1xf32>
    %c0_10 = arith.constant 0 : index
    %c0_11 = arith.constant 0 : index
    %23 = vector.load %arg7[%c0_10, %c0_11] : memref<1x16xf32, #tpu.memory_space<vmem>>, vector<1x16xf32>
    %24 = vector.broadcast %22 : vector<8x1xf32> to vector<8x16xf32>
    %25 = vector.broadcast %23 : vector<1x16xf32> to vector<8x16xf32>
    %26 = arith.mulf %24, %25 : vector<8x16xf32>
    %c0_12 = arith.constant 0 : index
    %c0_13 = arith.constant 0 : index
    %27 = vector.load %arg8[%c0_12, %c0_13] : memref<1x16xf32, #tpu.memory_space<vmem>>, vector<1x16xf32>
    %28 = vector.broadcast %27 : vector<1x16xf32> to vector<8x16xf32>
    %29 = arith.addf %26, %28 : vector<8x16xf32>
    %cst_14 = arith.constant 0.000000e+00 : f32
    %30 = vector.broadcast %cst_14 : f32 to vector<8x16xf32>
    %31 = arith.maximumf %29, %30 : vector<8x16xf32>
    %c0_15 = arith.constant 0 : index
    %c0_16 = arith.constant 0 : index
    %32 = vector.load %arg11[%c0_15, %c0_16] : memref<16x96xf32, #tpu.memory_space<vmem>>, vector<16x96xf32>
    %c0_17 = arith.constant 0 : index
    %c0_18 = arith.constant 0 : index
    %33 = vector.load %arg13[%c0_17, %c0_18] : memref<1x96xf32, #tpu.memory_space<vmem>>, vector<1x96xf32>
    %cst_19 = arith.constant dense<0.000000e+00> : vector<32x96xf32>
    %34 = tpu.matmul %21, %32, %cst_19 {dimension_numbers = #tpu.dot_dimension_numbers<[1], [0], [0], [1], [0, 0, 1, 1], [], []>} : vector<32x16xf32>, vector<16x96xf32>, vector<32x96xf32> -> vector<32x96xf32>
    %35 = vector.broadcast %33 : vector<1x96xf32> to vector<32x96xf32>
    %36 = arith.addf %34, %35 : vector<32x96xf32>
    %cst_20 = arith.constant dense<0.000000e+00> : vector<8x96xf32>
    %37 = tpu.matmul %31, %32, %cst_20 {dimension_numbers = #tpu.dot_dimension_numbers<[1], [0], [0], [1], [0, 0, 1, 1], [], []>} : vector<8x16xf32>, vector<16x96xf32>, vector<8x96xf32> -> vector<8x96xf32>
    %38 = vector.broadcast %33 : vector<1x96xf32> to vector<8x96xf32>
    %39 = arith.addf %37, %38 : vector<8x96xf32>
    %c0_21 = arith.constant 0 : index
    %c0_22 = arith.constant 0 : index
    %40 = vector.load %arg12[%c0_21, %c0_22] : memref<32x96xf32, #tpu.memory_space<vmem>>, vector<32x96xf32>
    %c0_23 = arith.constant 0 : index
    %c0_24 = arith.constant 0 : index
    %41 = vector.load %arg14[%c0_23, %c0_24] : memref<1x32xf32, #tpu.memory_space<vmem>>, vector<1x32xf32>
    %42 = vector.shape_cast %41 : vector<1x32xf32> to vector<1x32xf32>
    %43 = vector.broadcast %42 : vector<1x32xf32> to vector<8x32xf32>
    %c0_25 = arith.constant 0 : index
    %c0_26 = arith.constant 0 : index
    %c0_27 = arith.constant 0 : index
    %44 = vector.load %arg4[%c0_25, %c0_26, %c0_27] : memref<4x8x32xf32, #tpu.memory_space<vmem>>, vector<1x8x32xf32>
    %45 = vector.shape_cast %44 : vector<1x8x32xf32> to vector<8x32xf32>
    %46 = vector.extract_strided_slice %36 {offsets = [0, 0], sizes = [8, 96], strides = [1, 1]} : vector<32x96xf32> to vector<8x96xf32>
    %cst_28 = arith.constant dense<0.000000e+00> : vector<8x96xf32>
    %47 = tpu.matmul %45, %40, %cst_28 {dimension_numbers = #tpu.dot_dimension_numbers<[1], [0], [0], [1], [0, 0, 1, 1], [], []>} : vector<8x32xf32>, vector<32x96xf32>, vector<8x96xf32> -> vector<8x96xf32>
    %48 = vector.extract_strided_slice %46 {offsets = [0, 0], sizes = [8, 32], strides = [1, 1]} : vector<8x96xf32> to vector<8x32xf32>
    %49 = vector.extract_strided_slice %47 {offsets = [0, 0], sizes = [8, 32], strides = [1, 1]} : vector<8x96xf32> to vector<8x32xf32>
    %50 = arith.addf %48, %49 : vector<8x32xf32>
    %51 = arith.negf %50 : vector<8x32xf32>
    %52 = math.exp %51 : vector<8x32xf32>
    %cst_29 = arith.constant 1.000000e+00 : f32
    %53 = vector.broadcast %cst_29 : f32 to vector<8x32xf32>
    %54 = arith.addf %53, %52 : vector<8x32xf32>
    %55 = arith.divf %53, %54 : vector<8x32xf32>
    %56 = vector.extract_strided_slice %46 {offsets = [0, 32], sizes = [8, 32], strides = [1, 1]} : vector<8x96xf32> to vector<8x32xf32>
    %57 = vector.extract_strided_slice %47 {offsets = [0, 32], sizes = [8, 32], strides = [1, 1]} : vector<8x96xf32> to vector<8x32xf32>
    %58 = arith.addf %56, %57 : vector<8x32xf32>
    %59 = arith.negf %58 : vector<8x32xf32>
    %60 = math.exp %59 : vector<8x32xf32>
    %cst_30 = arith.constant 1.000000e+00 : f32
    %61 = vector.broadcast %cst_30 : f32 to vector<8x32xf32>
    %62 = arith.addf %61, %60 : vector<8x32xf32>
    %63 = arith.divf %61, %62 : vector<8x32xf32>
    %64 = vector.extract_strided_slice %46 {offsets = [0, 64], sizes = [8, 32], strides = [1, 1]} : vector<8x96xf32> to vector<8x32xf32>
    %65 = vector.extract_strided_slice %47 {offsets = [0, 64], sizes = [8, 32], strides = [1, 1]} : vector<8x96xf32> to vector<8x32xf32>
    %66 = arith.addf %65, %43 : vector<8x32xf32>
    %67 = arith.mulf %55, %66 : vector<8x32xf32>
    %68 = arith.addf %64, %67 : vector<8x32xf32>
    %69 = math.tanh %68 : vector<8x32xf32>
    %cst_31 = arith.constant 1.000000e+00 : f32
    %70 = vector.broadcast %cst_31 : f32 to vector<8x32xf32>
    %71 = arith.subf %70, %63 : vector<8x32xf32>
    %72 = arith.mulf %71, %69 : vector<8x32xf32>
    %73 = arith.mulf %63, %45 : vector<8x32xf32>
    %74 = arith.addf %72, %73 : vector<8x32xf32>
    %75 = vector.extract_strided_slice %36 {offsets = [8, 0], sizes = [8, 96], strides = [1, 1]} : vector<32x96xf32> to vector<8x96xf32>
    %cst_32 = arith.constant dense<0.000000e+00> : vector<8x96xf32>
    %76 = tpu.matmul %74, %40, %cst_32 {dimension_numbers = #tpu.dot_dimension_numbers<[1], [0], [0], [1], [0, 0, 1, 1], [], []>} : vector<8x32xf32>, vector<32x96xf32>, vector<8x96xf32> -> vector<8x96xf32>
    %77 = vector.extract_strided_slice %75 {offsets = [0, 0], sizes = [8, 32], strides = [1, 1]} : vector<8x96xf32> to vector<8x32xf32>
    %78 = vector.extract_strided_slice %76 {offsets = [0, 0], sizes = [8, 32], strides = [1, 1]} : vector<8x96xf32> to vector<8x32xf32>
    %79 = arith.addf %77, %78 : vector<8x32xf32>
    %80 = arith.negf %79 : vector<8x32xf32>
    %81 = math.exp %80 : vector<8x32xf32>
    %cst_33 = arith.constant 1.000000e+00 : f32
    %82 = vector.broadcast %cst_33 : f32 to vector<8x32xf32>
    %83 = arith.addf %82, %81 : vector<8x32xf32>
    %84 = arith.divf %82, %83 : vector<8x32xf32>
    %85 = vector.extract_strided_slice %75 {offsets = [0, 32], sizes = [8, 32], strides = [1, 1]} : vector<8x96xf32> to vector<8x32xf32>
    %86 = vector.extract_strided_slice %76 {offsets = [0, 32], sizes = [8, 32], strides = [1, 1]} : vector<8x96xf32> to vector<8x32xf32>
    %87 = arith.addf %85, %86 : vector<8x32xf32>
    %88 = arith.negf %87 : vector<8x32xf32>
    %89 = math.exp %88 : vector<8x32xf32>
    %cst_34 = arith.constant 1.000000e+00 : f32
    %90 = vector.broadcast %cst_34 : f32 to vector<8x32xf32>
    %91 = arith.addf %90, %89 : vector<8x32xf32>
    %92 = arith.divf %90, %91 : vector<8x32xf32>
    %93 = vector.extract_strided_slice %75 {offsets = [0, 64], sizes = [8, 32], strides = [1, 1]} : vector<8x96xf32> to vector<8x32xf32>
    %94 = vector.extract_strided_slice %76 {offsets = [0, 64], sizes = [8, 32], strides = [1, 1]} : vector<8x96xf32> to vector<8x32xf32>
    %95 = arith.addf %94, %43 : vector<8x32xf32>
    %96 = arith.mulf %84, %95 : vector<8x32xf32>
    %97 = arith.addf %93, %96 : vector<8x32xf32>
    %98 = math.tanh %97 : vector<8x32xf32>
    %cst_35 = arith.constant 1.000000e+00 : f32
    %99 = vector.broadcast %cst_35 : f32 to vector<8x32xf32>
    %100 = arith.subf %99, %92 : vector<8x32xf32>
    %101 = arith.mulf %100, %98 : vector<8x32xf32>
    %102 = arith.mulf %92, %74 : vector<8x32xf32>
    %103 = arith.addf %101, %102 : vector<8x32xf32>
    %104 = vector.extract_strided_slice %36 {offsets = [16, 0], sizes = [8, 96], strides = [1, 1]} : vector<32x96xf32> to vector<8x96xf32>
    %cst_36 = arith.constant dense<0.000000e+00> : vector<8x96xf32>
    %105 = tpu.matmul %103, %40, %cst_36 {dimension_numbers = #tpu.dot_dimension_numbers<[1], [0], [0], [1], [0, 0, 1, 1], [], []>} : vector<8x32xf32>, vector<32x96xf32>, vector<8x96xf32> -> vector<8x96xf32>
    %106 = vector.extract_strided_slice %104 {offsets = [0, 0], sizes = [8, 32], strides = [1, 1]} : vector<8x96xf32> to vector<8x32xf32>
    %107 = vector.extract_strided_slice %105 {offsets = [0, 0], sizes = [8, 32], strides = [1, 1]} : vector<8x96xf32> to vector<8x32xf32>
    %108 = arith.addf %106, %107 : vector<8x32xf32>
    %109 = arith.negf %108 : vector<8x32xf32>
    %110 = math.exp %109 : vector<8x32xf32>
    %cst_37 = arith.constant 1.000000e+00 : f32
    %111 = vector.broadcast %cst_37 : f32 to vector<8x32xf32>
    %112 = arith.addf %111, %110 : vector<8x32xf32>
    %113 = arith.divf %111, %112 : vector<8x32xf32>
    %114 = vector.extract_strided_slice %104 {offsets = [0, 32], sizes = [8, 32], strides = [1, 1]} : vector<8x96xf32> to vector<8x32xf32>
    %115 = vector.extract_strided_slice %105 {offsets = [0, 32], sizes = [8, 32], strides = [1, 1]} : vector<8x96xf32> to vector<8x32xf32>
    %116 = arith.addf %114, %115 : vector<8x32xf32>
    %117 = arith.negf %116 : vector<8x32xf32>
    %118 = math.exp %117 : vector<8x32xf32>
    %cst_38 = arith.constant 1.000000e+00 : f32
    %119 = vector.broadcast %cst_38 : f32 to vector<8x32xf32>
    %120 = arith.addf %119, %118 : vector<8x32xf32>
    %121 = arith.divf %119, %120 : vector<8x32xf32>
    %122 = vector.extract_strided_slice %104 {offsets = [0, 64], sizes = [8, 32], strides = [1, 1]} : vector<8x96xf32> to vector<8x32xf32>
    %123 = vector.extract_strided_slice %105 {offsets = [0, 64], sizes = [8, 32], strides = [1, 1]} : vector<8x96xf32> to vector<8x32xf32>
    %124 = arith.addf %123, %43 : vector<8x32xf32>
    %125 = arith.mulf %113, %124 : vector<8x32xf32>
    %126 = arith.addf %122, %125 : vector<8x32xf32>
    %127 = math.tanh %126 : vector<8x32xf32>
    %cst_39 = arith.constant 1.000000e+00 : f32
    %128 = vector.broadcast %cst_39 : f32 to vector<8x32xf32>
    %129 = arith.subf %128, %121 : vector<8x32xf32>
    %130 = arith.mulf %129, %127 : vector<8x32xf32>
    %131 = arith.mulf %121, %103 : vector<8x32xf32>
    %132 = arith.addf %130, %131 : vector<8x32xf32>
    %133 = vector.extract_strided_slice %36 {offsets = [24, 0], sizes = [8, 96], strides = [1, 1]} : vector<32x96xf32> to vector<8x96xf32>
    %cst_40 = arith.constant dense<0.000000e+00> : vector<8x96xf32>
    %134 = tpu.matmul %132, %40, %cst_40 {dimension_numbers = #tpu.dot_dimension_numbers<[1], [0], [0], [1], [0, 0, 1, 1], [], []>} : vector<8x32xf32>, vector<32x96xf32>, vector<8x96xf32> -> vector<8x96xf32>
    %135 = vector.extract_strided_slice %133 {offsets = [0, 0], sizes = [8, 32], strides = [1, 1]} : vector<8x96xf32> to vector<8x32xf32>
    %136 = vector.extract_strided_slice %134 {offsets = [0, 0], sizes = [8, 32], strides = [1, 1]} : vector<8x96xf32> to vector<8x32xf32>
    %137 = arith.addf %135, %136 : vector<8x32xf32>
    %138 = arith.negf %137 : vector<8x32xf32>
    %139 = math.exp %138 : vector<8x32xf32>
    %cst_41 = arith.constant 1.000000e+00 : f32
    %140 = vector.broadcast %cst_41 : f32 to vector<8x32xf32>
    %141 = arith.addf %140, %139 : vector<8x32xf32>
    %142 = arith.divf %140, %141 : vector<8x32xf32>
    %143 = vector.extract_strided_slice %133 {offsets = [0, 32], sizes = [8, 32], strides = [1, 1]} : vector<8x96xf32> to vector<8x32xf32>
    %144 = vector.extract_strided_slice %134 {offsets = [0, 32], sizes = [8, 32], strides = [1, 1]} : vector<8x96xf32> to vector<8x32xf32>
    %145 = arith.addf %143, %144 : vector<8x32xf32>
    %146 = arith.negf %145 : vector<8x32xf32>
    %147 = math.exp %146 : vector<8x32xf32>
    %cst_42 = arith.constant 1.000000e+00 : f32
    %148 = vector.broadcast %cst_42 : f32 to vector<8x32xf32>
    %149 = arith.addf %148, %147 : vector<8x32xf32>
    %150 = arith.divf %148, %149 : vector<8x32xf32>
    %151 = vector.extract_strided_slice %133 {offsets = [0, 64], sizes = [8, 32], strides = [1, 1]} : vector<8x96xf32> to vector<8x32xf32>
    %152 = vector.extract_strided_slice %134 {offsets = [0, 64], sizes = [8, 32], strides = [1, 1]} : vector<8x96xf32> to vector<8x32xf32>
    %153 = arith.addf %152, %43 : vector<8x32xf32>
    %154 = arith.mulf %142, %153 : vector<8x32xf32>
    %155 = arith.addf %151, %154 : vector<8x32xf32>
    %156 = math.tanh %155 : vector<8x32xf32>
    %cst_43 = arith.constant 1.000000e+00 : f32
    %157 = vector.broadcast %cst_43 : f32 to vector<8x32xf32>
    %158 = arith.subf %157, %150 : vector<8x32xf32>
    %159 = arith.mulf %158, %156 : vector<8x32xf32>
    %160 = arith.mulf %150, %132 : vector<8x32xf32>
    %161 = arith.addf %159, %160 : vector<8x32xf32>
    %cst_44 = arith.constant dense<0.000000e+00> : vector<8x96xf32>
    %162 = tpu.matmul %161, %40, %cst_44 {dimension_numbers = #tpu.dot_dimension_numbers<[1], [0], [0], [1], [0, 0, 1, 1], [], []>} : vector<8x32xf32>, vector<32x96xf32>, vector<8x96xf32> -> vector<8x96xf32>
    %163 = vector.extract_strided_slice %39 {offsets = [0, 0], sizes = [8, 32], strides = [1, 1]} : vector<8x96xf32> to vector<8x32xf32>
    %164 = vector.extract_strided_slice %162 {offsets = [0, 0], sizes = [8, 32], strides = [1, 1]} : vector<8x96xf32> to vector<8x32xf32>
    %165 = arith.addf %163, %164 : vector<8x32xf32>
    %166 = arith.negf %165 : vector<8x32xf32>
    %167 = math.exp %166 : vector<8x32xf32>
    %cst_45 = arith.constant 1.000000e+00 : f32
    %168 = vector.broadcast %cst_45 : f32 to vector<8x32xf32>
    %169 = arith.addf %168, %167 : vector<8x32xf32>
    %170 = arith.divf %168, %169 : vector<8x32xf32>
    %171 = vector.extract_strided_slice %39 {offsets = [0, 32], sizes = [8, 32], strides = [1, 1]} : vector<8x96xf32> to vector<8x32xf32>
    %172 = vector.extract_strided_slice %162 {offsets = [0, 32], sizes = [8, 32], strides = [1, 1]} : vector<8x96xf32> to vector<8x32xf32>
    %173 = arith.addf %171, %172 : vector<8x32xf32>
    %174 = arith.negf %173 : vector<8x32xf32>
    %175 = math.exp %174 : vector<8x32xf32>
    %cst_46 = arith.constant 1.000000e+00 : f32
    %176 = vector.broadcast %cst_46 : f32 to vector<8x32xf32>
    %177 = arith.addf %176, %175 : vector<8x32xf32>
    %178 = arith.divf %176, %177 : vector<8x32xf32>
    %179 = vector.extract_strided_slice %39 {offsets = [0, 64], sizes = [8, 32], strides = [1, 1]} : vector<8x96xf32> to vector<8x32xf32>
    %180 = vector.extract_strided_slice %162 {offsets = [0, 64], sizes = [8, 32], strides = [1, 1]} : vector<8x96xf32> to vector<8x32xf32>
    %181 = arith.addf %180, %43 : vector<8x32xf32>
    %182 = arith.mulf %170, %181 : vector<8x32xf32>
    %183 = arith.addf %179, %182 : vector<8x32xf32>
    %184 = math.tanh %183 : vector<8x32xf32>
    %cst_47 = arith.constant 1.000000e+00 : f32
    %185 = vector.broadcast %cst_47 : f32 to vector<8x32xf32>
    %186 = arith.subf %185, %178 : vector<8x32xf32>
    %187 = arith.mulf %186, %184 : vector<8x32xf32>
    %188 = arith.mulf %178, %161 : vector<8x32xf32>
    %189 = arith.addf %187, %188 : vector<8x32xf32>
    %c0_48 = arith.constant 0 : index
    %c0_49 = arith.constant 0 : index
    %c0_50 = arith.constant 0 : index
    %190 = vector.load %arg15[%c0_48, %c0_49, %c0_50] : memref<3x64x128xf32, #tpu.memory_space<vmem>>, vector<1x64x128xf32>
    %191 = vector.shape_cast %190 : vector<1x64x128xf32> to vector<64x128xf32>
    %c0_51 = arith.constant 0 : index
    %c0_52 = arith.constant 0 : index
    %c0_53 = arith.constant 0 : index
    %192 = vector.load %arg16[%c0_51, %c0_52, %c0_53] : memref<3x1x128xf32, #tpu.memory_space<vmem>>, vector<1x1x128xf32>
    %193 = vector.shape_cast %192 : vector<1x1x128xf32> to vector<1x128xf32>
    %c1 = arith.constant 1 : index
    %c0_54 = arith.constant 0 : index
    %c0_55 = arith.constant 0 : index
    %194 = vector.load %arg4[%c1, %c0_54, %c0_55] : memref<4x8x32xf32, #tpu.memory_space<vmem>>, vector<1x8x32xf32>
    %195 = vector.shape_cast %194 : vector<1x8x32xf32> to vector<8x32xf32>
    %196 = tpu.concatenate %74, %195 in 1 : vector<8x32xf32>, vector<8x32xf32> -> vector<8x64xf32>
    %cst_56 = arith.constant dense<0.000000e+00> : vector<8x128xf32>
    %197 = tpu.matmul %196, %191, %cst_56 {dimension_numbers = #tpu.dot_dimension_numbers<[1], [0], [0], [1], [0, 0, 1, 1], [], []>} : vector<8x64xf32>, vector<64x128xf32>, vector<8x128xf32> -> vector<8x128xf32>
    %198 = vector.broadcast %193 : vector<1x128xf32> to vector<8x128xf32>
    %199 = arith.addf %197, %198 : vector<8x128xf32>
    %200 = vector.extract_strided_slice %199 {offsets = [0, 0], sizes = [8, 32], strides = [1, 1]} : vector<8x128xf32> to vector<8x32xf32>
    %201 = arith.negf %200 : vector<8x32xf32>
    %202 = math.exp %201 : vector<8x32xf32>
    %cst_57 = arith.constant 1.000000e+00 : f32
    %203 = vector.broadcast %cst_57 : f32 to vector<8x32xf32>
    %204 = arith.addf %203, %202 : vector<8x32xf32>
    %205 = arith.divf %203, %204 : vector<8x32xf32>
    %206 = vector.extract_strided_slice %199 {offsets = [0, 32], sizes = [8, 32], strides = [1, 1]} : vector<8x128xf32> to vector<8x32xf32>
    %207 = arith.negf %206 : vector<8x32xf32>
    %208 = math.exp %207 : vector<8x32xf32>
    %cst_58 = arith.constant 1.000000e+00 : f32
    %209 = vector.broadcast %cst_58 : f32 to vector<8x32xf32>
    %210 = arith.addf %209, %208 : vector<8x32xf32>
    %211 = arith.divf %209, %210 : vector<8x32xf32>
    %212 = vector.extract_strided_slice %199 {offsets = [0, 64], sizes = [8, 32], strides = [1, 1]} : vector<8x128xf32> to vector<8x32xf32>
    %213 = vector.extract_strided_slice %199 {offsets = [0, 96], sizes = [8, 32], strides = [1, 1]} : vector<8x128xf32> to vector<8x32xf32>
    %214 = arith.mulf %205, %213 : vector<8x32xf32>
    %215 = arith.addf %212, %214 : vector<8x32xf32>
    %216 = math.tanh %215 : vector<8x32xf32>
    %cst_59 = arith.constant 1.000000e+00 : f32
    %217 = vector.broadcast %cst_59 : f32 to vector<8x32xf32>
    %218 = arith.subf %217, %211 : vector<8x32xf32>
    %219 = arith.mulf %218, %216 : vector<8x32xf32>
    %220 = arith.mulf %211, %195 : vector<8x32xf32>
    %221 = arith.addf %219, %220 : vector<8x32xf32>
    %222 = tpu.concatenate %103, %221 in 1 : vector<8x32xf32>, vector<8x32xf32> -> vector<8x64xf32>
    %cst_60 = arith.constant dense<0.000000e+00> : vector<8x128xf32>
    %223 = tpu.matmul %222, %191, %cst_60 {dimension_numbers = #tpu.dot_dimension_numbers<[1], [0], [0], [1], [0, 0, 1, 1], [], []>} : vector<8x64xf32>, vector<64x128xf32>, vector<8x128xf32> -> vector<8x128xf32>
    %224 = vector.broadcast %193 : vector<1x128xf32> to vector<8x128xf32>
    %225 = arith.addf %223, %224 : vector<8x128xf32>
    %226 = vector.extract_strided_slice %225 {offsets = [0, 0], sizes = [8, 32], strides = [1, 1]} : vector<8x128xf32> to vector<8x32xf32>
    %227 = arith.negf %226 : vector<8x32xf32>
    %228 = math.exp %227 : vector<8x32xf32>
    %cst_61 = arith.constant 1.000000e+00 : f32
    %229 = vector.broadcast %cst_61 : f32 to vector<8x32xf32>
    %230 = arith.addf %229, %228 : vector<8x32xf32>
    %231 = arith.divf %229, %230 : vector<8x32xf32>
    %232 = vector.extract_strided_slice %225 {offsets = [0, 32], sizes = [8, 32], strides = [1, 1]} : vector<8x128xf32> to vector<8x32xf32>
    %233 = arith.negf %232 : vector<8x32xf32>
    %234 = math.exp %233 : vector<8x32xf32>
    %cst_62 = arith.constant 1.000000e+00 : f32
    %235 = vector.broadcast %cst_62 : f32 to vector<8x32xf32>
    %236 = arith.addf %235, %234 : vector<8x32xf32>
    %237 = arith.divf %235, %236 : vector<8x32xf32>
    %238 = vector.extract_strided_slice %225 {offsets = [0, 64], sizes = [8, 32], strides = [1, 1]} : vector<8x128xf32> to vector<8x32xf32>
    %239 = vector.extract_strided_slice %225 {offsets = [0, 96], sizes = [8, 32], strides = [1, 1]} : vector<8x128xf32> to vector<8x32xf32>
    %240 = arith.mulf %231, %239 : vector<8x32xf32>
    %241 = arith.addf %238, %240 : vector<8x32xf32>
    %242 = math.tanh %241 : vector<8x32xf32>
    %cst_63 = arith.constant 1.000000e+00 : f32
    %243 = vector.broadcast %cst_63 : f32 to vector<8x32xf32>
    %244 = arith.subf %243, %237 : vector<8x32xf32>
    %245 = arith.mulf %244, %242 : vector<8x32xf32>
    %246 = arith.mulf %237, %221 : vector<8x32xf32>
    %247 = arith.addf %245, %246 : vector<8x32xf32>
    %248 = tpu.concatenate %132, %247 in 1 : vector<8x32xf32>, vector<8x32xf32> -> vector<8x64xf32>
    %cst_64 = arith.constant dense<0.000000e+00> : vector<8x128xf32>
    %249 = tpu.matmul %248, %191, %cst_64 {dimension_numbers = #tpu.dot_dimension_numbers<[1], [0], [0], [1], [0, 0, 1, 1], [], []>} : vector<8x64xf32>, vector<64x128xf32>, vector<8x128xf32> -> vector<8x128xf32>
    %250 = vector.broadcast %193 : vector<1x128xf32> to vector<8x128xf32>
    %251 = arith.addf %249, %250 : vector<8x128xf32>
    %252 = vector.extract_strided_slice %251 {offsets = [0, 0], sizes = [8, 32], strides = [1, 1]} : vector<8x128xf32> to vector<8x32xf32>
    %253 = arith.negf %252 : vector<8x32xf32>
    %254 = math.exp %253 : vector<8x32xf32>
    %cst_65 = arith.constant 1.000000e+00 : f32
    %255 = vector.broadcast %cst_65 : f32 to vector<8x32xf32>
    %256 = arith.addf %255, %254 : vector<8x32xf32>
    %257 = arith.divf %255, %256 : vector<8x32xf32>
    %258 = vector.extract_strided_slice %251 {offsets = [0, 32], sizes = [8, 32], strides = [1, 1]} : vector<8x128xf32> to vector<8x32xf32>
    %259 = arith.negf %258 : vector<8x32xf32>
    %260 = math.exp %259 : vector<8x32xf32>
    %cst_66 = arith.constant 1.000000e+00 : f32
    %261 = vector.broadcast %cst_66 : f32 to vector<8x32xf32>
    %262 = arith.addf %261, %260 : vector<8x32xf32>
    %263 = arith.divf %261, %262 : vector<8x32xf32>
    %264 = vector.extract_strided_slice %251 {offsets = [0, 64], sizes = [8, 32], strides = [1, 1]} : vector<8x128xf32> to vector<8x32xf32>
    %265 = vector.extract_strided_slice %251 {offsets = [0, 96], sizes = [8, 32], strides = [1, 1]} : vector<8x128xf32> to vector<8x32xf32>
    %266 = arith.mulf %257, %265 : vector<8x32xf32>
    %267 = arith.addf %264, %266 : vector<8x32xf32>
    %268 = math.tanh %267 : vector<8x32xf32>
    %cst_67 = arith.constant 1.000000e+00 : f32
    %269 = vector.broadcast %cst_67 : f32 to vector<8x32xf32>
    %270 = arith.subf %269, %263 : vector<8x32xf32>
    %271 = arith.mulf %270, %268 : vector<8x32xf32>
    %272 = arith.mulf %263, %247 : vector<8x32xf32>
    %273 = arith.addf %271, %272 : vector<8x32xf32>
    %274 = tpu.concatenate %161, %273 in 1 : vector<8x32xf32>, vector<8x32xf32> -> vector<8x64xf32>
    %cst_68 = arith.constant dense<0.000000e+00> : vector<8x128xf32>
    %275 = tpu.matmul %274, %191, %cst_68 {dimension_numbers = #tpu.dot_dimension_numbers<[1], [0], [0], [1], [0, 0, 1, 1], [], []>} : vector<8x64xf32>, vector<64x128xf32>, vector<8x128xf32> -> vector<8x128xf32>
    %276 = vector.broadcast %193 : vector<1x128xf32> to vector<8x128xf32>
    %277 = arith.addf %275, %276 : vector<8x128xf32>
    %278 = vector.extract_strided_slice %277 {offsets = [0, 0], sizes = [8, 32], strides = [1, 1]} : vector<8x128xf32> to vector<8x32xf32>
    %279 = arith.negf %278 : vector<8x32xf32>
    %280 = math.exp %279 : vector<8x32xf32>
    %cst_69 = arith.constant 1.000000e+00 : f32
    %281 = vector.broadcast %cst_69 : f32 to vector<8x32xf32>
    %282 = arith.addf %281, %280 : vector<8x32xf32>
    %283 = arith.divf %281, %282 : vector<8x32xf32>
    %284 = vector.extract_strided_slice %277 {offsets = [0, 32], sizes = [8, 32], strides = [1, 1]} : vector<8x128xf32> to vector<8x32xf32>
    %285 = arith.negf %284 : vector<8x32xf32>
    %286 = math.exp %285 : vector<8x32xf32>
    %cst_70 = arith.constant 1.000000e+00 : f32
    %287 = vector.broadcast %cst_70 : f32 to vector<8x32xf32>
    %288 = arith.addf %287, %286 : vector<8x32xf32>
    %289 = arith.divf %287, %288 : vector<8x32xf32>
    %290 = vector.extract_strided_slice %277 {offsets = [0, 64], sizes = [8, 32], strides = [1, 1]} : vector<8x128xf32> to vector<8x32xf32>
    %291 = vector.extract_strided_slice %277 {offsets = [0, 96], sizes = [8, 32], strides = [1, 1]} : vector<8x128xf32> to vector<8x32xf32>
    %292 = arith.mulf %283, %291 : vector<8x32xf32>
    %293 = arith.addf %290, %292 : vector<8x32xf32>
    %294 = math.tanh %293 : vector<8x32xf32>
    %cst_71 = arith.constant 1.000000e+00 : f32
    %295 = vector.broadcast %cst_71 : f32 to vector<8x32xf32>
    %296 = arith.subf %295, %289 : vector<8x32xf32>
    %297 = arith.mulf %296, %294 : vector<8x32xf32>
    %298 = arith.mulf %289, %273 : vector<8x32xf32>
    %299 = arith.addf %297, %298 : vector<8x32xf32>
    %300 = tpu.concatenate %189, %299 in 1 : vector<8x32xf32>, vector<8x32xf32> -> vector<8x64xf32>
    %cst_72 = arith.constant dense<0.000000e+00> : vector<8x128xf32>
    %301 = tpu.matmul %300, %191, %cst_72 {dimension_numbers = #tpu.dot_dimension_numbers<[1], [0], [0], [1], [0, 0, 1, 1], [], []>} : vector<8x64xf32>, vector<64x128xf32>, vector<8x128xf32> -> vector<8x128xf32>
    %302 = vector.broadcast %193 : vector<1x128xf32> to vector<8x128xf32>
    %303 = arith.addf %301, %302 : vector<8x128xf32>
    %304 = vector.extract_strided_slice %303 {offsets = [0, 0], sizes = [8, 32], strides = [1, 1]} : vector<8x128xf32> to vector<8x32xf32>
    %305 = arith.negf %304 : vector<8x32xf32>
    %306 = math.exp %305 : vector<8x32xf32>
    %cst_73 = arith.constant 1.000000e+00 : f32
    %307 = vector.broadcast %cst_73 : f32 to vector<8x32xf32>
    %308 = arith.addf %307, %306 : vector<8x32xf32>
    %309 = arith.divf %307, %308 : vector<8x32xf32>
    %310 = vector.extract_strided_slice %303 {offsets = [0, 32], sizes = [8, 32], strides = [1, 1]} : vector<8x128xf32> to vector<8x32xf32>
    %311 = arith.negf %310 : vector<8x32xf32>
    %312 = math.exp %311 : vector<8x32xf32>
    %cst_74 = arith.constant 1.000000e+00 : f32
    %313 = vector.broadcast %cst_74 : f32 to vector<8x32xf32>
    %314 = arith.addf %313, %312 : vector<8x32xf32>
    %315 = arith.divf %313, %314 : vector<8x32xf32>
    %316 = vector.extract_strided_slice %303 {offsets = [0, 64], sizes = [8, 32], strides = [1, 1]} : vector<8x128xf32> to vector<8x32xf32>
    %317 = vector.extract_strided_slice %303 {offsets = [0, 96], sizes = [8, 32], strides = [1, 1]} : vector<8x128xf32> to vector<8x32xf32>
    %318 = arith.mulf %309, %317 : vector<8x32xf32>
    %319 = arith.addf %316, %318 : vector<8x32xf32>
    %320 = math.tanh %319 : vector<8x32xf32>
    %cst_75 = arith.constant 1.000000e+00 : f32
    %321 = vector.broadcast %cst_75 : f32 to vector<8x32xf32>
    %322 = arith.subf %321, %315 : vector<8x32xf32>
    %323 = arith.mulf %322, %320 : vector<8x32xf32>
    %324 = arith.mulf %315, %299 : vector<8x32xf32>
    %325 = arith.addf %323, %324 : vector<8x32xf32>
    %c1_76 = arith.constant 1 : index
    %c0_77 = arith.constant 0 : index
    %c0_78 = arith.constant 0 : index
    %326 = vector.load %arg15[%c1_76, %c0_77, %c0_78] : memref<3x64x128xf32, #tpu.memory_space<vmem>>, vector<1x64x128xf32>
    %327 = vector.shape_cast %326 : vector<1x64x128xf32> to vector<64x128xf32>
    %c1_79 = arith.constant 1 : index
    %c0_80 = arith.constant 0 : index
    %c0_81 = arith.constant 0 : index
    %328 = vector.load %arg16[%c1_79, %c0_80, %c0_81] : memref<3x1x128xf32, #tpu.memory_space<vmem>>, vector<1x1x128xf32>
    %329 = vector.shape_cast %328 : vector<1x1x128xf32> to vector<1x128xf32>
    %c2 = arith.constant 2 : index
    %c0_82 = arith.constant 0 : index
    %c0_83 = arith.constant 0 : index
    %330 = vector.load %arg4[%c2, %c0_82, %c0_83] : memref<4x8x32xf32, #tpu.memory_space<vmem>>, vector<1x8x32xf32>
    %331 = vector.shape_cast %330 : vector<1x8x32xf32> to vector<8x32xf32>
    %332 = tpu.concatenate %221, %331 in 1 : vector<8x32xf32>, vector<8x32xf32> -> vector<8x64xf32>
    %cst_84 = arith.constant dense<0.000000e+00> : vector<8x128xf32>
    %333 = tpu.matmul %332, %327, %cst_84 {dimension_numbers = #tpu.dot_dimension_numbers<[1], [0], [0], [1], [0, 0, 1, 1], [], []>} : vector<8x64xf32>, vector<64x128xf32>, vector<8x128xf32> -> vector<8x128xf32>
    %334 = vector.broadcast %329 : vector<1x128xf32> to vector<8x128xf32>
    %335 = arith.addf %333, %334 : vector<8x128xf32>
    %336 = vector.extract_strided_slice %335 {offsets = [0, 0], sizes = [8, 32], strides = [1, 1]} : vector<8x128xf32> to vector<8x32xf32>
    %337 = arith.negf %336 : vector<8x32xf32>
    %338 = math.exp %337 : vector<8x32xf32>
    %cst_85 = arith.constant 1.000000e+00 : f32
    %339 = vector.broadcast %cst_85 : f32 to vector<8x32xf32>
    %340 = arith.addf %339, %338 : vector<8x32xf32>
    %341 = arith.divf %339, %340 : vector<8x32xf32>
    %342 = vector.extract_strided_slice %335 {offsets = [0, 32], sizes = [8, 32], strides = [1, 1]} : vector<8x128xf32> to vector<8x32xf32>
    %343 = arith.negf %342 : vector<8x32xf32>
    %344 = math.exp %343 : vector<8x32xf32>
    %cst_86 = arith.constant 1.000000e+00 : f32
    %345 = vector.broadcast %cst_86 : f32 to vector<8x32xf32>
    %346 = arith.addf %345, %344 : vector<8x32xf32>
    %347 = arith.divf %345, %346 : vector<8x32xf32>
    %348 = vector.extract_strided_slice %335 {offsets = [0, 64], sizes = [8, 32], strides = [1, 1]} : vector<8x128xf32> to vector<8x32xf32>
    %349 = vector.extract_strided_slice %335 {offsets = [0, 96], sizes = [8, 32], strides = [1, 1]} : vector<8x128xf32> to vector<8x32xf32>
    %350 = arith.mulf %341, %349 : vector<8x32xf32>
    %351 = arith.addf %348, %350 : vector<8x32xf32>
    %352 = math.tanh %351 : vector<8x32xf32>
    %cst_87 = arith.constant 1.000000e+00 : f32
    %353 = vector.broadcast %cst_87 : f32 to vector<8x32xf32>
    %354 = arith.subf %353, %347 : vector<8x32xf32>
    %355 = arith.mulf %354, %352 : vector<8x32xf32>
    %356 = arith.mulf %347, %331 : vector<8x32xf32>
    %357 = arith.addf %355, %356 : vector<8x32xf32>
    %358 = tpu.concatenate %247, %357 in 1 : vector<8x32xf32>, vector<8x32xf32> -> vector<8x64xf32>
    %cst_88 = arith.constant dense<0.000000e+00> : vector<8x128xf32>
    %359 = tpu.matmul %358, %327, %cst_88 {dimension_numbers = #tpu.dot_dimension_numbers<[1], [0], [0], [1], [0, 0, 1, 1], [], []>} : vector<8x64xf32>, vector<64x128xf32>, vector<8x128xf32> -> vector<8x128xf32>
    %360 = vector.broadcast %329 : vector<1x128xf32> to vector<8x128xf32>
    %361 = arith.addf %359, %360 : vector<8x128xf32>
    %362 = vector.extract_strided_slice %361 {offsets = [0, 0], sizes = [8, 32], strides = [1, 1]} : vector<8x128xf32> to vector<8x32xf32>
    %363 = arith.negf %362 : vector<8x32xf32>
    %364 = math.exp %363 : vector<8x32xf32>
    %cst_89 = arith.constant 1.000000e+00 : f32
    %365 = vector.broadcast %cst_89 : f32 to vector<8x32xf32>
    %366 = arith.addf %365, %364 : vector<8x32xf32>
    %367 = arith.divf %365, %366 : vector<8x32xf32>
    %368 = vector.extract_strided_slice %361 {offsets = [0, 32], sizes = [8, 32], strides = [1, 1]} : vector<8x128xf32> to vector<8x32xf32>
    %369 = arith.negf %368 : vector<8x32xf32>
    %370 = math.exp %369 : vector<8x32xf32>
    %cst_90 = arith.constant 1.000000e+00 : f32
    %371 = vector.broadcast %cst_90 : f32 to vector<8x32xf32>
    %372 = arith.addf %371, %370 : vector<8x32xf32>
    %373 = arith.divf %371, %372 : vector<8x32xf32>
    %374 = vector.extract_strided_slice %361 {offsets = [0, 64], sizes = [8, 32], strides = [1, 1]} : vector<8x128xf32> to vector<8x32xf32>
    %375 = vector.extract_strided_slice %361 {offsets = [0, 96], sizes = [8, 32], strides = [1, 1]} : vector<8x128xf32> to vector<8x32xf32>
    %376 = arith.mulf %367, %375 : vector<8x32xf32>
    %377 = arith.addf %374, %376 : vector<8x32xf32>
    %378 = math.tanh %377 : vector<8x32xf32>
    %cst_91 = arith.constant 1.000000e+00 : f32
    %379 = vector.broadcast %cst_91 : f32 to vector<8x32xf32>
    %380 = arith.subf %379, %373 : vector<8x32xf32>
    %381 = arith.mulf %380, %378 : vector<8x32xf32>
    %382 = arith.mulf %373, %357 : vector<8x32xf32>
    %383 = arith.addf %381, %382 : vector<8x32xf32>
    %384 = tpu.concatenate %273, %383 in 1 : vector<8x32xf32>, vector<8x32xf32> -> vector<8x64xf32>
    %cst_92 = arith.constant dense<0.000000e+00> : vector<8x128xf32>
    %385 = tpu.matmul %384, %327, %cst_92 {dimension_numbers = #tpu.dot_dimension_numbers<[1], [0], [0], [1], [0, 0, 1, 1], [], []>} : vector<8x64xf32>, vector<64x128xf32>, vector<8x128xf32> -> vector<8x128xf32>
    %386 = vector.broadcast %329 : vector<1x128xf32> to vector<8x128xf32>
    %387 = arith.addf %385, %386 : vector<8x128xf32>
    %388 = vector.extract_strided_slice %387 {offsets = [0, 0], sizes = [8, 32], strides = [1, 1]} : vector<8x128xf32> to vector<8x32xf32>
    %389 = arith.negf %388 : vector<8x32xf32>
    %390 = math.exp %389 : vector<8x32xf32>
    %cst_93 = arith.constant 1.000000e+00 : f32
    %391 = vector.broadcast %cst_93 : f32 to vector<8x32xf32>
    %392 = arith.addf %391, %390 : vector<8x32xf32>
    %393 = arith.divf %391, %392 : vector<8x32xf32>
    %394 = vector.extract_strided_slice %387 {offsets = [0, 32], sizes = [8, 32], strides = [1, 1]} : vector<8x128xf32> to vector<8x32xf32>
    %395 = arith.negf %394 : vector<8x32xf32>
    %396 = math.exp %395 : vector<8x32xf32>
    %cst_94 = arith.constant 1.000000e+00 : f32
    %397 = vector.broadcast %cst_94 : f32 to vector<8x32xf32>
    %398 = arith.addf %397, %396 : vector<8x32xf32>
    %399 = arith.divf %397, %398 : vector<8x32xf32>
    %400 = vector.extract_strided_slice %387 {offsets = [0, 64], sizes = [8, 32], strides = [1, 1]} : vector<8x128xf32> to vector<8x32xf32>
    %401 = vector.extract_strided_slice %387 {offsets = [0, 96], sizes = [8, 32], strides = [1, 1]} : vector<8x128xf32> to vector<8x32xf32>
    %402 = arith.mulf %393, %401 : vector<8x32xf32>
    %403 = arith.addf %400, %402 : vector<8x32xf32>
    %404 = math.tanh %403 : vector<8x32xf32>
    %cst_95 = arith.constant 1.000000e+00 : f32
    %405 = vector.broadcast %cst_95 : f32 to vector<8x32xf32>
    %406 = arith.subf %405, %399 : vector<8x32xf32>
    %407 = arith.mulf %406, %404 : vector<8x32xf32>
    %408 = arith.mulf %399, %383 : vector<8x32xf32>
    %409 = arith.addf %407, %408 : vector<8x32xf32>
    %410 = tpu.concatenate %299, %409 in 1 : vector<8x32xf32>, vector<8x32xf32> -> vector<8x64xf32>
    %cst_96 = arith.constant dense<0.000000e+00> : vector<8x128xf32>
    %411 = tpu.matmul %410, %327, %cst_96 {dimension_numbers = #tpu.dot_dimension_numbers<[1], [0], [0], [1], [0, 0, 1, 1], [], []>} : vector<8x64xf32>, vector<64x128xf32>, vector<8x128xf32> -> vector<8x128xf32>
    %412 = vector.broadcast %329 : vector<1x128xf32> to vector<8x128xf32>
    %413 = arith.addf %411, %412 : vector<8x128xf32>
    %414 = vector.extract_strided_slice %413 {offsets = [0, 0], sizes = [8, 32], strides = [1, 1]} : vector<8x128xf32> to vector<8x32xf32>
    %415 = arith.negf %414 : vector<8x32xf32>
    %416 = math.exp %415 : vector<8x32xf32>
    %cst_97 = arith.constant 1.000000e+00 : f32
    %417 = vector.broadcast %cst_97 : f32 to vector<8x32xf32>
    %418 = arith.addf %417, %416 : vector<8x32xf32>
    %419 = arith.divf %417, %418 : vector<8x32xf32>
    %420 = vector.extract_strided_slice %413 {offsets = [0, 32], sizes = [8, 32], strides = [1, 1]} : vector<8x128xf32> to vector<8x32xf32>
    %421 = arith.negf %420 : vector<8x32xf32>
    %422 = math.exp %421 : vector<8x32xf32>
    %cst_98 = arith.constant 1.000000e+00 : f32
    %423 = vector.broadcast %cst_98 : f32 to vector<8x32xf32>
    %424 = arith.addf %423, %422 : vector<8x32xf32>
    %425 = arith.divf %423, %424 : vector<8x32xf32>
    %426 = vector.extract_strided_slice %413 {offsets = [0, 64], sizes = [8, 32], strides = [1, 1]} : vector<8x128xf32> to vector<8x32xf32>
    %427 = vector.extract_strided_slice %413 {offsets = [0, 96], sizes = [8, 32], strides = [1, 1]} : vector<8x128xf32> to vector<8x32xf32>
    %428 = arith.mulf %419, %427 : vector<8x32xf32>
    %429 = arith.addf %426, %428 : vector<8x32xf32>
    %430 = math.tanh %429 : vector<8x32xf32>
    %cst_99 = arith.constant 1.000000e+00 : f32
    %431 = vector.broadcast %cst_99 : f32 to vector<8x32xf32>
    %432 = arith.subf %431, %425 : vector<8x32xf32>
    %433 = arith.mulf %432, %430 : vector<8x32xf32>
    %434 = arith.mulf %425, %409 : vector<8x32xf32>
    %435 = arith.addf %433, %434 : vector<8x32xf32>
    %436 = tpu.concatenate %325, %435 in 1 : vector<8x32xf32>, vector<8x32xf32> -> vector<8x64xf32>
    %cst_100 = arith.constant dense<0.000000e+00> : vector<8x128xf32>
    %437 = tpu.matmul %436, %327, %cst_100 {dimension_numbers = #tpu.dot_dimension_numbers<[1], [0], [0], [1], [0, 0, 1, 1], [], []>} : vector<8x64xf32>, vector<64x128xf32>, vector<8x128xf32> -> vector<8x128xf32>
    %438 = vector.broadcast %329 : vector<1x128xf32> to vector<8x128xf32>
    %439 = arith.addf %437, %438 : vector<8x128xf32>
    %440 = vector.extract_strided_slice %439 {offsets = [0, 0], sizes = [8, 32], strides = [1, 1]} : vector<8x128xf32> to vector<8x32xf32>
    %441 = arith.negf %440 : vector<8x32xf32>
    %442 = math.exp %441 : vector<8x32xf32>
    %cst_101 = arith.constant 1.000000e+00 : f32
    %443 = vector.broadcast %cst_101 : f32 to vector<8x32xf32>
    %444 = arith.addf %443, %442 : vector<8x32xf32>
    %445 = arith.divf %443, %444 : vector<8x32xf32>
    %446 = vector.extract_strided_slice %439 {offsets = [0, 32], sizes = [8, 32], strides = [1, 1]} : vector<8x128xf32> to vector<8x32xf32>
    %447 = arith.negf %446 : vector<8x32xf32>
    %448 = math.exp %447 : vector<8x32xf32>
    %cst_102 = arith.constant 1.000000e+00 : f32
    %449 = vector.broadcast %cst_102 : f32 to vector<8x32xf32>
    %450 = arith.addf %449, %448 : vector<8x32xf32>
    %451 = arith.divf %449, %450 : vector<8x32xf32>
    %452 = vector.extract_strided_slice %439 {offsets = [0, 64], sizes = [8, 32], strides = [1, 1]} : vector<8x128xf32> to vector<8x32xf32>
    %453 = vector.extract_strided_slice %439 {offsets = [0, 96], sizes = [8, 32], strides = [1, 1]} : vector<8x128xf32> to vector<8x32xf32>
    %454 = arith.mulf %445, %453 : vector<8x32xf32>
    %455 = arith.addf %452, %454 : vector<8x32xf32>
    %456 = math.tanh %455 : vector<8x32xf32>
    %cst_103 = arith.constant 1.000000e+00 : f32
    %457 = vector.broadcast %cst_103 : f32 to vector<8x32xf32>
    %458 = arith.subf %457, %451 : vector<8x32xf32>
    %459 = arith.mulf %458, %456 : vector<8x32xf32>
    %460 = arith.mulf %451, %435 : vector<8x32xf32>
    %461 = arith.addf %459, %460 : vector<8x32xf32>
    %c2_104 = arith.constant 2 : index
    %c0_105 = arith.constant 0 : index
    %c0_106 = arith.constant 0 : index
    %462 = vector.load %arg15[%c2_104, %c0_105, %c0_106] : memref<3x64x128xf32, #tpu.memory_space<vmem>>, vector<1x64x128xf32>
    %463 = vector.shape_cast %462 : vector<1x64x128xf32> to vector<64x128xf32>
    %c2_107 = arith.constant 2 : index
    %c0_108 = arith.constant 0 : index
    %c0_109 = arith.constant 0 : index
    %464 = vector.load %arg16[%c2_107, %c0_108, %c0_109] : memref<3x1x128xf32, #tpu.memory_space<vmem>>, vector<1x1x128xf32>
    %465 = vector.shape_cast %464 : vector<1x1x128xf32> to vector<1x128xf32>
    %c3 = arith.constant 3 : index
    %c0_110 = arith.constant 0 : index
    %c0_111 = arith.constant 0 : index
    %466 = vector.load %arg4[%c3, %c0_110, %c0_111] : memref<4x8x32xf32, #tpu.memory_space<vmem>>, vector<1x8x32xf32>
    %467 = vector.shape_cast %466 : vector<1x8x32xf32> to vector<8x32xf32>
    %468 = tpu.concatenate %357, %467 in 1 : vector<8x32xf32>, vector<8x32xf32> -> vector<8x64xf32>
    %cst_112 = arith.constant dense<0.000000e+00> : vector<8x128xf32>
    %469 = tpu.matmul %468, %463, %cst_112 {dimension_numbers = #tpu.dot_dimension_numbers<[1], [0], [0], [1], [0, 0, 1, 1], [], []>} : vector<8x64xf32>, vector<64x128xf32>, vector<8x128xf32> -> vector<8x128xf32>
    %470 = vector.broadcast %465 : vector<1x128xf32> to vector<8x128xf32>
    %471 = arith.addf %469, %470 : vector<8x128xf32>
    %472 = vector.extract_strided_slice %471 {offsets = [0, 0], sizes = [8, 32], strides = [1, 1]} : vector<8x128xf32> to vector<8x32xf32>
    %473 = arith.negf %472 : vector<8x32xf32>
    %474 = math.exp %473 : vector<8x32xf32>
    %cst_113 = arith.constant 1.000000e+00 : f32
    %475 = vector.broadcast %cst_113 : f32 to vector<8x32xf32>
    %476 = arith.addf %475, %474 : vector<8x32xf32>
    %477 = arith.divf %475, %476 : vector<8x32xf32>
    %478 = vector.extract_strided_slice %471 {offsets = [0, 32], sizes = [8, 32], strides = [1, 1]} : vector<8x128xf32> to vector<8x32xf32>
    %479 = arith.negf %478 : vector<8x32xf32>
    %480 = math.exp %479 : vector<8x32xf32>
    %cst_114 = arith.constant 1.000000e+00 : f32
    %481 = vector.broadcast %cst_114 : f32 to vector<8x32xf32>
    %482 = arith.addf %481, %480 : vector<8x32xf32>
    %483 = arith.divf %481, %482 : vector<8x32xf32>
    %484 = vector.extract_strided_slice %471 {offsets = [0, 64], sizes = [8, 32], strides = [1, 1]} : vector<8x128xf32> to vector<8x32xf32>
    %485 = vector.extract_strided_slice %471 {offsets = [0, 96], sizes = [8, 32], strides = [1, 1]} : vector<8x128xf32> to vector<8x32xf32>
    %486 = arith.mulf %477, %485 : vector<8x32xf32>
    %487 = arith.addf %484, %486 : vector<8x32xf32>
    %488 = math.tanh %487 : vector<8x32xf32>
    %cst_115 = arith.constant 1.000000e+00 : f32
    %489 = vector.broadcast %cst_115 : f32 to vector<8x32xf32>
    %490 = arith.subf %489, %483 : vector<8x32xf32>
    %491 = arith.mulf %490, %488 : vector<8x32xf32>
    %492 = arith.mulf %483, %467 : vector<8x32xf32>
    %493 = arith.addf %491, %492 : vector<8x32xf32>
    %494 = tpu.concatenate %383, %493 in 1 : vector<8x32xf32>, vector<8x32xf32> -> vector<8x64xf32>
    %cst_116 = arith.constant dense<0.000000e+00> : vector<8x128xf32>
    %495 = tpu.matmul %494, %463, %cst_116 {dimension_numbers = #tpu.dot_dimension_numbers<[1], [0], [0], [1], [0, 0, 1, 1], [], []>} : vector<8x64xf32>, vector<64x128xf32>, vector<8x128xf32> -> vector<8x128xf32>
    %496 = vector.broadcast %465 : vector<1x128xf32> to vector<8x128xf32>
    %497 = arith.addf %495, %496 : vector<8x128xf32>
    %498 = vector.extract_strided_slice %497 {offsets = [0, 0], sizes = [8, 32], strides = [1, 1]} : vector<8x128xf32> to vector<8x32xf32>
    %499 = arith.negf %498 : vector<8x32xf32>
    %500 = math.exp %499 : vector<8x32xf32>
    %cst_117 = arith.constant 1.000000e+00 : f32
    %501 = vector.broadcast %cst_117 : f32 to vector<8x32xf32>
    %502 = arith.addf %501, %500 : vector<8x32xf32>
    %503 = arith.divf %501, %502 : vector<8x32xf32>
    %504 = vector.extract_strided_slice %497 {offsets = [0, 32], sizes = [8, 32], strides = [1, 1]} : vector<8x128xf32> to vector<8x32xf32>
    %505 = arith.negf %504 : vector<8x32xf32>
    %506 = math.exp %505 : vector<8x32xf32>
    %cst_118 = arith.constant 1.000000e+00 : f32
    %507 = vector.broadcast %cst_118 : f32 to vector<8x32xf32>
    %508 = arith.addf %507, %506 : vector<8x32xf32>
    %509 = arith.divf %507, %508 : vector<8x32xf32>
    %510 = vector.extract_strided_slice %497 {offsets = [0, 64], sizes = [8, 32], strides = [1, 1]} : vector<8x128xf32> to vector<8x32xf32>
    %511 = vector.extract_strided_slice %497 {offsets = [0, 96], sizes = [8, 32], strides = [1, 1]} : vector<8x128xf32> to vector<8x32xf32>
    %512 = arith.mulf %503, %511 : vector<8x32xf32>
    %513 = arith.addf %510, %512 : vector<8x32xf32>
    %514 = math.tanh %513 : vector<8x32xf32>
    %cst_119 = arith.constant 1.000000e+00 : f32
    %515 = vector.broadcast %cst_119 : f32 to vector<8x32xf32>
    %516 = arith.subf %515, %509 : vector<8x32xf32>
    %517 = arith.mulf %516, %514 : vector<8x32xf32>
    %518 = arith.mulf %509, %493 : vector<8x32xf32>
    %519 = arith.addf %517, %518 : vector<8x32xf32>
    %520 = tpu.concatenate %409, %519 in 1 : vector<8x32xf32>, vector<8x32xf32> -> vector<8x64xf32>
    %cst_120 = arith.constant dense<0.000000e+00> : vector<8x128xf32>
    %521 = tpu.matmul %520, %463, %cst_120 {dimension_numbers = #tpu.dot_dimension_numbers<[1], [0], [0], [1], [0, 0, 1, 1], [], []>} : vector<8x64xf32>, vector<64x128xf32>, vector<8x128xf32> -> vector<8x128xf32>
    %522 = vector.broadcast %465 : vector<1x128xf32> to vector<8x128xf32>
    %523 = arith.addf %521, %522 : vector<8x128xf32>
    %524 = vector.extract_strided_slice %523 {offsets = [0, 0], sizes = [8, 32], strides = [1, 1]} : vector<8x128xf32> to vector<8x32xf32>
    %525 = arith.negf %524 : vector<8x32xf32>
    %526 = math.exp %525 : vector<8x32xf32>
    %cst_121 = arith.constant 1.000000e+00 : f32
    %527 = vector.broadcast %cst_121 : f32 to vector<8x32xf32>
    %528 = arith.addf %527, %526 : vector<8x32xf32>
    %529 = arith.divf %527, %528 : vector<8x32xf32>
    %530 = vector.extract_strided_slice %523 {offsets = [0, 32], sizes = [8, 32], strides = [1, 1]} : vector<8x128xf32> to vector<8x32xf32>
    %531 = arith.negf %530 : vector<8x32xf32>
    %532 = math.exp %531 : vector<8x32xf32>
    %cst_122 = arith.constant 1.000000e+00 : f32
    %533 = vector.broadcast %cst_122 : f32 to vector<8x32xf32>
    %534 = arith.addf %533, %532 : vector<8x32xf32>
    %535 = arith.divf %533, %534 : vector<8x32xf32>
    %536 = vector.extract_strided_slice %523 {offsets = [0, 64], sizes = [8, 32], strides = [1, 1]} : vector<8x128xf32> to vector<8x32xf32>
    %537 = vector.extract_strided_slice %523 {offsets = [0, 96], sizes = [8, 32], strides = [1, 1]} : vector<8x128xf32> to vector<8x32xf32>
    %538 = arith.mulf %529, %537 : vector<8x32xf32>
    %539 = arith.addf %536, %538 : vector<8x32xf32>
    %540 = math.tanh %539 : vector<8x32xf32>
    %cst_123 = arith.constant 1.000000e+00 : f32
    %541 = vector.broadcast %cst_123 : f32 to vector<8x32xf32>
    %542 = arith.subf %541, %535 : vector<8x32xf32>
    %543 = arith.mulf %542, %540 : vector<8x32xf32>
    %544 = arith.mulf %535, %519 : vector<8x32xf32>
    %545 = arith.addf %543, %544 : vector<8x32xf32>
    %546 = tpu.concatenate %435, %545 in 1 : vector<8x32xf32>, vector<8x32xf32> -> vector<8x64xf32>
    %cst_124 = arith.constant dense<0.000000e+00> : vector<8x128xf32>
    %547 = tpu.matmul %546, %463, %cst_124 {dimension_numbers = #tpu.dot_dimension_numbers<[1], [0], [0], [1], [0, 0, 1, 1], [], []>} : vector<8x64xf32>, vector<64x128xf32>, vector<8x128xf32> -> vector<8x128xf32>
    %548 = vector.broadcast %465 : vector<1x128xf32> to vector<8x128xf32>
    %549 = arith.addf %547, %548 : vector<8x128xf32>
    %550 = vector.extract_strided_slice %549 {offsets = [0, 0], sizes = [8, 32], strides = [1, 1]} : vector<8x128xf32> to vector<8x32xf32>
    %551 = arith.negf %550 : vector<8x32xf32>
    %552 = math.exp %551 : vector<8x32xf32>
    %cst_125 = arith.constant 1.000000e+00 : f32
    %553 = vector.broadcast %cst_125 : f32 to vector<8x32xf32>
    %554 = arith.addf %553, %552 : vector<8x32xf32>
    %555 = arith.divf %553, %554 : vector<8x32xf32>
    %556 = vector.extract_strided_slice %549 {offsets = [0, 32], sizes = [8, 32], strides = [1, 1]} : vector<8x128xf32> to vector<8x32xf32>
    %557 = arith.negf %556 : vector<8x32xf32>
    %558 = math.exp %557 : vector<8x32xf32>
    %cst_126 = arith.constant 1.000000e+00 : f32
    %559 = vector.broadcast %cst_126 : f32 to vector<8x32xf32>
    %560 = arith.addf %559, %558 : vector<8x32xf32>
    %561 = arith.divf %559, %560 : vector<8x32xf32>
    %562 = vector.extract_strided_slice %549 {offsets = [0, 64], sizes = [8, 32], strides = [1, 1]} : vector<8x128xf32> to vector<8x32xf32>
    %563 = vector.extract_strided_slice %549 {offsets = [0, 96], sizes = [8, 32], strides = [1, 1]} : vector<8x128xf32> to vector<8x32xf32>
    %564 = arith.mulf %555, %563 : vector<8x32xf32>
    %565 = arith.addf %562, %564 : vector<8x32xf32>
    %566 = math.tanh %565 : vector<8x32xf32>
    %cst_127 = arith.constant 1.000000e+00 : f32
    %567 = vector.broadcast %cst_127 : f32 to vector<8x32xf32>
    %568 = arith.subf %567, %561 : vector<8x32xf32>
    %569 = arith.mulf %568, %566 : vector<8x32xf32>
    %570 = arith.mulf %561, %545 : vector<8x32xf32>
    %571 = arith.addf %569, %570 : vector<8x32xf32>
    %572 = tpu.concatenate %461, %571 in 1 : vector<8x32xf32>, vector<8x32xf32> -> vector<8x64xf32>
    %cst_128 = arith.constant dense<0.000000e+00> : vector<8x128xf32>
    %573 = tpu.matmul %572, %463, %cst_128 {dimension_numbers = #tpu.dot_dimension_numbers<[1], [0], [0], [1], [0, 0, 1, 1], [], []>} : vector<8x64xf32>, vector<64x128xf32>, vector<8x128xf32> -> vector<8x128xf32>
    %574 = vector.broadcast %465 : vector<1x128xf32> to vector<8x128xf32>
    %575 = arith.addf %573, %574 : vector<8x128xf32>
    %576 = vector.extract_strided_slice %575 {offsets = [0, 0], sizes = [8, 32], strides = [1, 1]} : vector<8x128xf32> to vector<8x32xf32>
    %577 = arith.negf %576 : vector<8x32xf32>
    %578 = math.exp %577 : vector<8x32xf32>
    %cst_129 = arith.constant 1.000000e+00 : f32
    %579 = vector.broadcast %cst_129 : f32 to vector<8x32xf32>
    %580 = arith.addf %579, %578 : vector<8x32xf32>
    %581 = arith.divf %579, %580 : vector<8x32xf32>
    %582 = vector.extract_strided_slice %575 {offsets = [0, 32], sizes = [8, 32], strides = [1, 1]} : vector<8x128xf32> to vector<8x32xf32>
    %583 = arith.negf %582 : vector<8x32xf32>
    %584 = math.exp %583 : vector<8x32xf32>
    %cst_130 = arith.constant 1.000000e+00 : f32
    %585 = vector.broadcast %cst_130 : f32 to vector<8x32xf32>
    %586 = arith.addf %585, %584 : vector<8x32xf32>
    %587 = arith.divf %585, %586 : vector<8x32xf32>
    %588 = vector.extract_strided_slice %575 {offsets = [0, 64], sizes = [8, 32], strides = [1, 1]} : vector<8x128xf32> to vector<8x32xf32>
    %589 = vector.extract_strided_slice %575 {offsets = [0, 96], sizes = [8, 32], strides = [1, 1]} : vector<8x128xf32> to vector<8x32xf32>
    %590 = arith.mulf %581, %589 : vector<8x32xf32>
    %591 = arith.addf %588, %590 : vector<8x32xf32>
    %592 = math.tanh %591 : vector<8x32xf32>
    %cst_131 = arith.constant 1.000000e+00 : f32
    %593 = vector.broadcast %cst_131 : f32 to vector<8x32xf32>
    %594 = arith.subf %593, %587 : vector<8x32xf32>
    %595 = arith.mulf %594, %592 : vector<8x32xf32>
    %596 = arith.mulf %587, %571 : vector<8x32xf32>
    %597 = arith.addf %595, %596 : vector<8x32xf32>
    %c0_132 = arith.constant 0 : index
    %c0_133 = arith.constant 0 : index
    %598 = vector.load %arg20[%c0_132, %c0_133] : memref<1x32xf32, #tpu.memory_space<vmem>>, vector<1x32xf32>
    %599 = vector.shape_cast %598 : vector<1x32xf32> to vector<1x32xf32>
    %600 = vector.broadcast %599 : vector<1x32xf32> to vector<8x32xf32>
    %c0_134 = arith.constant 0 : index
    %c0_135 = arith.constant 0 : index
    %601 = vector.load %arg3[%c0_134, %c0_135] : memref<8x1xf32, #tpu.memory_space<vmem>>, vector<8x1xf32>
    %c0_136 = arith.constant 0 : index
    %c0_137 = arith.constant 0 : index
    %602 = vector.load %arg17[%c0_136, %c0_137] : memref<1x96xf32, #tpu.memory_space<vmem>>, vector<1x96xf32>
    %603 = vector.broadcast %601 : vector<8x1xf32> to vector<8x96xf32>
    %604 = vector.broadcast %602 : vector<1x96xf32> to vector<8x96xf32>
    %605 = arith.mulf %603, %604 : vector<8x96xf32>
    %c0_138 = arith.constant 0 : index
    %c0_139 = arith.constant 0 : index
    %606 = vector.load %arg19[%c0_138, %c0_139] : memref<1x96xf32, #tpu.memory_space<vmem>>, vector<1x96xf32>
    %607 = vector.broadcast %606 : vector<1x96xf32> to vector<8x96xf32>
    %608 = arith.addf %605, %607 : vector<8x96xf32>
    %c0_140 = arith.constant 0 : index
    %c0_141 = arith.constant 0 : index
    %609 = vector.load %arg18[%c0_140, %c0_141] : memref<32x96xf32, #tpu.memory_space<vmem>>, vector<32x96xf32>
    %cst_142 = arith.constant dense<0.000000e+00> : vector<8x96xf32>
    %610 = tpu.matmul %189, %609, %cst_142 {dimension_numbers = #tpu.dot_dimension_numbers<[1], [0], [0], [1], [0, 0, 1, 1], [], []>} : vector<8x32xf32>, vector<32x96xf32>, vector<8x96xf32> -> vector<8x96xf32>
    %611 = vector.extract_strided_slice %608 {offsets = [0, 0], sizes = [8, 32], strides = [1, 1]} : vector<8x96xf32> to vector<8x32xf32>
    %612 = vector.extract_strided_slice %610 {offsets = [0, 0], sizes = [8, 32], strides = [1, 1]} : vector<8x96xf32> to vector<8x32xf32>
    %613 = arith.addf %611, %612 : vector<8x32xf32>
    %614 = arith.negf %613 : vector<8x32xf32>
    %615 = math.exp %614 : vector<8x32xf32>
    %cst_143 = arith.constant 1.000000e+00 : f32
    %616 = vector.broadcast %cst_143 : f32 to vector<8x32xf32>
    %617 = arith.addf %616, %615 : vector<8x32xf32>
    %618 = arith.divf %616, %617 : vector<8x32xf32>
    %619 = vector.extract_strided_slice %608 {offsets = [0, 32], sizes = [8, 32], strides = [1, 1]} : vector<8x96xf32> to vector<8x32xf32>
    %620 = vector.extract_strided_slice %610 {offsets = [0, 32], sizes = [8, 32], strides = [1, 1]} : vector<8x96xf32> to vector<8x32xf32>
    %621 = arith.addf %619, %620 : vector<8x32xf32>
    %622 = arith.negf %621 : vector<8x32xf32>
    %623 = math.exp %622 : vector<8x32xf32>
    %cst_144 = arith.constant 1.000000e+00 : f32
    %624 = vector.broadcast %cst_144 : f32 to vector<8x32xf32>
    %625 = arith.addf %624, %623 : vector<8x32xf32>
    %626 = arith.divf %624, %625 : vector<8x32xf32>
    %627 = vector.extract_strided_slice %608 {offsets = [0, 64], sizes = [8, 32], strides = [1, 1]} : vector<8x96xf32> to vector<8x32xf32>
    %628 = vector.extract_strided_slice %610 {offsets = [0, 64], sizes = [8, 32], strides = [1, 1]} : vector<8x96xf32> to vector<8x32xf32>
    %629 = arith.addf %628, %600 : vector<8x32xf32>
    %630 = arith.mulf %618, %629 : vector<8x32xf32>
    %631 = arith.addf %627, %630 : vector<8x32xf32>
    %632 = math.tanh %631 : vector<8x32xf32>
    %cst_145 = arith.constant 1.000000e+00 : f32
    %633 = vector.broadcast %cst_145 : f32 to vector<8x32xf32>
    %634 = arith.subf %633, %626 : vector<8x32xf32>
    %635 = arith.mulf %634, %632 : vector<8x32xf32>
    %636 = arith.mulf %626, %189 : vector<8x32xf32>
    %637 = arith.addf %635, %636 : vector<8x32xf32>
    %c0_146 = arith.constant 0 : index
    %c0_147 = arith.constant 0 : index
    %c0_148 = arith.constant 0 : index
    %638 = vector.load %arg21[%c0_146, %c0_147, %c0_148] : memref<3x64x128xf32, #tpu.memory_space<vmem>>, vector<1x64x128xf32>
    %639 = vector.shape_cast %638 : vector<1x64x128xf32> to vector<64x128xf32>
    %c0_149 = arith.constant 0 : index
    %c0_150 = arith.constant 0 : index
    %c0_151 = arith.constant 0 : index
    %640 = vector.load %arg22[%c0_149, %c0_150, %c0_151] : memref<3x1x128xf32, #tpu.memory_space<vmem>>, vector<1x1x128xf32>
    %641 = vector.shape_cast %640 : vector<1x1x128xf32> to vector<1x128xf32>
    %642 = tpu.concatenate %637, %325 in 1 : vector<8x32xf32>, vector<8x32xf32> -> vector<8x64xf32>
    %cst_152 = arith.constant dense<0.000000e+00> : vector<8x128xf32>
    %643 = tpu.matmul %642, %639, %cst_152 {dimension_numbers = #tpu.dot_dimension_numbers<[1], [0], [0], [1], [0, 0, 1, 1], [], []>} : vector<8x64xf32>, vector<64x128xf32>, vector<8x128xf32> -> vector<8x128xf32>
    %644 = vector.broadcast %641 : vector<1x128xf32> to vector<8x128xf32>
    %645 = arith.addf %643, %644 : vector<8x128xf32>
    %646 = vector.extract_strided_slice %645 {offsets = [0, 0], sizes = [8, 32], strides = [1, 1]} : vector<8x128xf32> to vector<8x32xf32>
    %647 = arith.negf %646 : vector<8x32xf32>
    %648 = math.exp %647 : vector<8x32xf32>
    %cst_153 = arith.constant 1.000000e+00 : f32
    %649 = vector.broadcast %cst_153 : f32 to vector<8x32xf32>
    %650 = arith.addf %649, %648 : vector<8x32xf32>
    %651 = arith.divf %649, %650 : vector<8x32xf32>
    %652 = vector.extract_strided_slice %645 {offsets = [0, 32], sizes = [8, 32], strides = [1, 1]} : vector<8x128xf32> to vector<8x32xf32>
    %653 = arith.negf %652 : vector<8x32xf32>
    %654 = math.exp %653 : vector<8x32xf32>
    %cst_154 = arith.constant 1.000000e+00 : f32
    %655 = vector.broadcast %cst_154 : f32 to vector<8x32xf32>
    %656 = arith.addf %655, %654 : vector<8x32xf32>
    %657 = arith.divf %655, %656 : vector<8x32xf32>
    %658 = vector.extract_strided_slice %645 {offsets = [0, 64], sizes = [8, 32], strides = [1, 1]} : vector<8x128xf32> to vector<8x32xf32>
    %659 = vector.extract_strided_slice %645 {offsets = [0, 96], sizes = [8, 32], strides = [1, 1]} : vector<8x128xf32> to vector<8x32xf32>
    %660 = arith.mulf %651, %659 : vector<8x32xf32>
    %661 = arith.addf %658, %660 : vector<8x32xf32>
    %662 = math.tanh %661 : vector<8x32xf32>
    %cst_155 = arith.constant 1.000000e+00 : f32
    %663 = vector.broadcast %cst_155 : f32 to vector<8x32xf32>
    %664 = arith.subf %663, %657 : vector<8x32xf32>
    %665 = arith.mulf %664, %662 : vector<8x32xf32>
    %666 = arith.mulf %657, %325 : vector<8x32xf32>
    %667 = arith.addf %665, %666 : vector<8x32xf32>
    %c1_156 = arith.constant 1 : index
    %c0_157 = arith.constant 0 : index
    %c0_158 = arith.constant 0 : index
    %668 = vector.load %arg21[%c1_156, %c0_157, %c0_158] : memref<3x64x128xf32, #tpu.memory_space<vmem>>, vector<1x64x128xf32>
    %669 = vector.shape_cast %668 : vector<1x64x128xf32> to vector<64x128xf32>
    %c1_159 = arith.constant 1 : index
    %c0_160 = arith.constant 0 : index
    %c0_161 = arith.constant 0 : index
    %670 = vector.load %arg22[%c1_159, %c0_160, %c0_161] : memref<3x1x128xf32, #tpu.memory_space<vmem>>, vector<1x1x128xf32>
    %671 = vector.shape_cast %670 : vector<1x1x128xf32> to vector<1x128xf32>
    %672 = tpu.concatenate %667, %461 in 1 : vector<8x32xf32>, vector<8x32xf32> -> vector<8x64xf32>
    %cst_162 = arith.constant dense<0.000000e+00> : vector<8x128xf32>
    %673 = tpu.matmul %672, %669, %cst_162 {dimension_numbers = #tpu.dot_dimension_numbers<[1], [0], [0], [1], [0, 0, 1, 1], [], []>} : vector<8x64xf32>, vector<64x128xf32>, vector<8x128xf32> -> vector<8x128xf32>
    %674 = vector.broadcast %671 : vector<1x128xf32> to vector<8x128xf32>
    %675 = arith.addf %673, %674 : vector<8x128xf32>
    %676 = vector.extract_strided_slice %675 {offsets = [0, 0], sizes = [8, 32], strides = [1, 1]} : vector<8x128xf32> to vector<8x32xf32>
    %677 = arith.negf %676 : vector<8x32xf32>
    %678 = math.exp %677 : vector<8x32xf32>
    %cst_163 = arith.constant 1.000000e+00 : f32
    %679 = vector.broadcast %cst_163 : f32 to vector<8x32xf32>
    %680 = arith.addf %679, %678 : vector<8x32xf32>
    %681 = arith.divf %679, %680 : vector<8x32xf32>
    %682 = vector.extract_strided_slice %675 {offsets = [0, 32], sizes = [8, 32], strides = [1, 1]} : vector<8x128xf32> to vector<8x32xf32>
    %683 = arith.negf %682 : vector<8x32xf32>
    %684 = math.exp %683 : vector<8x32xf32>
    %cst_164 = arith.constant 1.000000e+00 : f32
    %685 = vector.broadcast %cst_164 : f32 to vector<8x32xf32>
    %686 = arith.addf %685, %684 : vector<8x32xf32>
    %687 = arith.divf %685, %686 : vector<8x32xf32>
    %688 = vector.extract_strided_slice %675 {offsets = [0, 64], sizes = [8, 32], strides = [1, 1]} : vector<8x128xf32> to vector<8x32xf32>
    %689 = vector.extract_strided_slice %675 {offsets = [0, 96], sizes = [8, 32], strides = [1, 1]} : vector<8x128xf32> to vector<8x32xf32>
    %690 = arith.mulf %681, %689 : vector<8x32xf32>
    %691 = arith.addf %688, %690 : vector<8x32xf32>
    %692 = math.tanh %691 : vector<8x32xf32>
    %cst_165 = arith.constant 1.000000e+00 : f32
    %693 = vector.broadcast %cst_165 : f32 to vector<8x32xf32>
    %694 = arith.subf %693, %687 : vector<8x32xf32>
    %695 = arith.mulf %694, %692 : vector<8x32xf32>
    %696 = arith.mulf %687, %461 : vector<8x32xf32>
    %697 = arith.addf %695, %696 : vector<8x32xf32>
    %c2_166 = arith.constant 2 : index
    %c0_167 = arith.constant 0 : index
    %c0_168 = arith.constant 0 : index
    %698 = vector.load %arg21[%c2_166, %c0_167, %c0_168] : memref<3x64x128xf32, #tpu.memory_space<vmem>>, vector<1x64x128xf32>
    %699 = vector.shape_cast %698 : vector<1x64x128xf32> to vector<64x128xf32>
    %c2_169 = arith.constant 2 : index
    %c0_170 = arith.constant 0 : index
    %c0_171 = arith.constant 0 : index
    %700 = vector.load %arg22[%c2_169, %c0_170, %c0_171] : memref<3x1x128xf32, #tpu.memory_space<vmem>>, vector<1x1x128xf32>
    %701 = vector.shape_cast %700 : vector<1x1x128xf32> to vector<1x128xf32>
    %702 = tpu.concatenate %697, %597 in 1 : vector<8x32xf32>, vector<8x32xf32> -> vector<8x64xf32>
    %cst_172 = arith.constant dense<0.000000e+00> : vector<8x128xf32>
    %703 = tpu.matmul %702, %699, %cst_172 {dimension_numbers = #tpu.dot_dimension_numbers<[1], [0], [0], [1], [0, 0, 1, 1], [], []>} : vector<8x64xf32>, vector<64x128xf32>, vector<8x128xf32> -> vector<8x128xf32>
    %704 = vector.broadcast %701 : vector<1x128xf32> to vector<8x128xf32>
    %705 = arith.addf %703, %704 : vector<8x128xf32>
    %706 = vector.extract_strided_slice %705 {offsets = [0, 0], sizes = [8, 32], strides = [1, 1]} : vector<8x128xf32> to vector<8x32xf32>
    %707 = arith.negf %706 : vector<8x32xf32>
    %708 = math.exp %707 : vector<8x32xf32>
    %cst_173 = arith.constant 1.000000e+00 : f32
    %709 = vector.broadcast %cst_173 : f32 to vector<8x32xf32>
    %710 = arith.addf %709, %708 : vector<8x32xf32>
    %711 = arith.divf %709, %710 : vector<8x32xf32>
    %712 = vector.extract_strided_slice %705 {offsets = [0, 32], sizes = [8, 32], strides = [1, 1]} : vector<8x128xf32> to vector<8x32xf32>
    %713 = arith.negf %712 : vector<8x32xf32>
    %714 = math.exp %713 : vector<8x32xf32>
    %cst_174 = arith.constant 1.000000e+00 : f32
    %715 = vector.broadcast %cst_174 : f32 to vector<8x32xf32>
    %716 = arith.addf %715, %714 : vector<8x32xf32>
    %717 = arith.divf %715, %716 : vector<8x32xf32>
    %718 = vector.extract_strided_slice %705 {offsets = [0, 64], sizes = [8, 32], strides = [1, 1]} : vector<8x128xf32> to vector<8x32xf32>
    %719 = vector.extract_strided_slice %705 {offsets = [0, 96], sizes = [8, 32], strides = [1, 1]} : vector<8x128xf32> to vector<8x32xf32>
    %720 = arith.mulf %711, %719 : vector<8x32xf32>
    %721 = arith.addf %718, %720 : vector<8x32xf32>
    %722 = math.tanh %721 : vector<8x32xf32>
    %cst_175 = arith.constant 1.000000e+00 : f32
    %723 = vector.broadcast %cst_175 : f32 to vector<8x32xf32>
    %724 = arith.subf %723, %717 : vector<8x32xf32>
    %725 = arith.mulf %724, %722 : vector<8x32xf32>
    %726 = arith.mulf %717, %597 : vector<8x32xf32>
    %727 = arith.addf %725, %726 : vector<8x32xf32>
    %728 = tpu.concatenate %493, %519, %545, %571, %597, %727 in 0 : vector<8x32xf32>, vector<8x32xf32>, vector<8x32xf32>, vector<8x32xf32>, vector<8x32xf32>, vector<8x32xf32> -> vector<48x32xf32>
    %c0_176 = arith.constant 0 : index
    %c0_177 = arith.constant 0 : index
    %729 = vector.load %arg9[%c0_176, %c0_177] : memref<32x2xf32, #tpu.memory_space<vmem>>, vector<32x2xf32>
    %cst_178 = arith.constant dense<0.000000e+00> : vector<48x2xf32>
    %730 = tpu.matmul %728, %729, %cst_178 {dimension_numbers = #tpu.dot_dimension_numbers<[1], [0], [0], [1], [0, 0, 1, 1], [], []>} : vector<48x32xf32>, vector<32x2xf32>, vector<48x2xf32> -> vector<48x2xf32>
    %c0_179 = arith.constant 0 : index
    %c0_180 = arith.constant 0 : index
    %731 = vector.load %arg10[%c0_179, %c0_180] : memref<1x2xf32, #tpu.memory_space<vmem>>, vector<1x2xf32>
    %732 = vector.broadcast %731 : vector<1x2xf32> to vector<48x2xf32>
    %733 = arith.addf %730, %732 : vector<48x2xf32>
    %734 = vector.extract_strided_slice %733 {offsets = [40, 0], sizes = [8, 2], strides = [1, 1]} : vector<48x2xf32> to vector<8x2xf32>
    %735 = vector.extract_strided_slice %733 {offsets = [0, 0], sizes = [8, 2], strides = [1, 1]} : vector<48x2xf32> to vector<8x2xf32>
    %736 = arith.addf %735, %734 : vector<8x2xf32>
    %737 = vector.extract_strided_slice %4 {offsets = [24, 0], sizes = [8, 2], strides = [1, 1]} : vector<32x2xf32> to vector<8x2xf32>
    %738 = arith.addf %736, %737 : vector<8x2xf32>
    %c0_181 = arith.constant 0 : index
    %c0_182 = arith.constant 0 : index
    %c0_183 = arith.constant 0 : index
    %739 = vector.load %arg23[%c0_181, %c0_182, %c0_183] : memref<1x8x2xf32, #tpu.memory_space<vmem>>, vector<1x8x2xf32>
    %740 = vector.shape_cast %739 : vector<1x8x2xf32> to vector<8x2xf32>
    %741 = vector.shape_cast %738 : vector<8x2xf32> to vector<1x8x2xf32>
    tpu.vector_store %arg23[%c0_181, %c0_182, %c0_183], %741 {strides = array<i32>} : memref<1x8x2xf32, #tpu.memory_space<vmem>>, vector<1x8x2xf32>,
    %742 = vector.extract_strided_slice %733 {offsets = [0, 0], sizes = [32, 2], strides = [1, 1]} : vector<48x2xf32> to vector<32x2xf32>
    %743 = tpu.concatenate %734, %734, %734, %734 in 0 : vector<8x2xf32>, vector<8x2xf32>, vector<8x2xf32>, vector<8x2xf32> -> vector<32x2xf32>
    %744 = arith.addf %742, %743 : vector<32x2xf32>
    %745 = arith.addf %744, %4 : vector<32x2xf32>
    %c0_184 = arith.constant 0 : index
    %c0_185 = arith.constant 0 : index
    %746 = vector.load %arg25[%c0_184, %c0_185] : memref<32x2xf32, #tpu.memory_space<vmem>>, vector<32x2xf32>
    tpu.vector_store %arg25[%c0_184, %c0_185], %745 {strides = array<i32>} : memref<32x2xf32, #tpu.memory_space<vmem>>, vector<32x2xf32>,
    %747 = vector.shape_cast %637 : vector<8x32xf32> to vector<1x8x32xf32>
    %748 = vector.shape_cast %667 : vector<8x32xf32> to vector<1x8x32xf32>
    %749 = vector.shape_cast %697 : vector<8x32xf32> to vector<1x8x32xf32>
    %750 = vector.shape_cast %727 : vector<8x32xf32> to vector<1x8x32xf32>
    %751 = tpu.concatenate %747, %748, %749, %750 in 0 : vector<1x8x32xf32>, vector<1x8x32xf32>, vector<1x8x32xf32>, vector<1x8x32xf32> -> vector<4x8x32xf32>
    %c0_186 = arith.constant 0 : index
    %c0_187 = arith.constant 0 : index
    %c0_188 = arith.constant 0 : index
    %752 = vector.load %arg24[%c0_186, %c0_187, %c0_188] : memref<4x8x32xf32, #tpu.memory_space<vmem>>, vector<4x8x32xf32>
    tpu.vector_store %arg24[%c0_186, %c0_187, %c0_188], %751 {strides = array<i32>} : memref<4x8x32xf32, #tpu.memory_space<vmem>>, vector<4x8x32xf32>,
    return
  }
  func.func @transform_0(%arg0: i32) -> (i32, i32) {
    %c0_i32 = arith.constant 0 : i32
    %c0_i32_0 = arith.constant 0 : i32
    %c0_i32_1 = arith.constant 0 : i32
    return %c0_i32, %c0_i32_0 : i32, i32
  }
  func.func @transform_1(%arg0: i32) -> (i32, i32) {
    %c0_i32 = arith.constant 0 : i32
    %c0_i32_0 = arith.constant 0 : i32
    %c0_i32_1 = arith.constant 0 : i32
    return %c0_i32, %c0_i32_0 : i32, i32
  }
  func.func @transform_2(%arg0: i32) -> (i32, i32) {
    %c0_i32 = arith.constant 0 : i32
    %c0_i32_0 = arith.constant 0 : i32
    %c0_i32_1 = arith.constant 0 : i32
    return %c0_i32, %c0_i32_0 : i32, i32
  }
  func.func @transform_3(%arg0: i32) -> (i32, i32, i32) {
    %c0_i32 = arith.constant 0 : i32
    %c0_i32_0 = arith.constant 0 : i32
    %c0_i32_1 = arith.constant 0 : i32
    %c0_i32_2 = arith.constant 0 : i32
    return %c0_i32, %c0_i32_0, %c0_i32_1 : i32, i32, i32
  }
  func.func @transform_4(%arg0: i32) -> (i32, i32) {
    %c0_i32 = arith.constant 0 : i32
    %c0_i32_0 = arith.constant 0 : i32
    %c0_i32_1 = arith.constant 0 : i32
    return %c0_i32, %c0_i32_0 : i32, i32
  }
  func.func @transform_5(%arg0: i32) -> (i32, i32) {
    %c0_i32 = arith.constant 0 : i32
    %c0_i32_0 = arith.constant 0 : i32
    %c0_i32_1 = arith.constant 0 : i32
    return %c0_i32, %c0_i32_0 : i32, i32
  }
  func.func @transform_6(%arg0: i32) -> (i32, i32) {
    %c0_i32 = arith.constant 0 : i32
    %c0_i32_0 = arith.constant 0 : i32
    %c0_i32_1 = arith.constant 0 : i32
    return %c0_i32, %c0_i32_0 : i32, i32
  }
  func.func @transform_7(%arg0: i32) -> (i32, i32) {
    %c0_i32 = arith.constant 0 : i32
    %c0_i32_0 = arith.constant 0 : i32
    %c0_i32_1 = arith.constant 0 : i32
    return %c0_i32, %c0_i32_0 : i32, i32
  }
  func.func @transform_8(%arg0: i32) -> (i32, i32) {
    %c0_i32 = arith.constant 0 : i32
    %c0_i32_0 = arith.constant 0 : i32
    %c0_i32_1 = arith.constant 0 : i32
    return %c0_i32, %c0_i32_0 : i32, i32
  }
  func.func @transform_9(%arg0: i32) -> (i32, i32) {
    %c0_i32 = arith.constant 0 : i32
    %c0_i32_0 = arith.constant 0 : i32
    %c0_i32_1 = arith.constant 0 : i32
    return %c0_i32, %c0_i32_0 : i32, i32
  }
  func.func @transform_10(%arg0: i32) -> (i32, i32) {
    %c0_i32 = arith.constant 0 : i32
    %c0_i32_0 = arith.constant 0 : i32
    %c0_i32_1 = arith.constant 0 : i32
    return %c0_i32, %c0_i32_0 : i32, i32
  }
  func.func @transform_11(%arg0: i32) -> (i32, i32) {
    %c0_i32 = arith.constant 0 : i32
    %c0_i32_0 = arith.constant 0 : i32
    %c0_i32_1 = arith.constant 0 : i32
    return %c0_i32, %c0_i32_0 : i32, i32
  }
  func.func @transform_12(%arg0: i32) -> (i32, i32) {
    %c0_i32 = arith.constant 0 : i32
    %c0_i32_0 = arith.constant 0 : i32
    %c0_i32_1 = arith.constant 0 : i32
    return %c0_i32, %c0_i32_0 : i32, i32
  }
  func.func @transform_13(%arg0: i32) -> (i32, i32) {
    %c0_i32 = arith.constant 0 : i32
    %c0_i32_0 = arith.constant 0 : i32
    %c0_i32_1 = arith.constant 0 : i32
    return %c0_i32, %c0_i32_0 : i32, i32
  }
  func.func @transform_14(%arg0: i32) -> (i32, i32, i32) {
    %c0_i32 = arith.constant 0 : i32
    %c0_i32_0 = arith.constant 0 : i32
    %c0_i32_1 = arith.constant 0 : i32
    %c0_i32_2 = arith.constant 0 : i32
    return %c0_i32, %c0_i32_0, %c0_i32_1 : i32, i32, i32
  }
  func.func @transform_15(%arg0: i32) -> (i32, i32, i32) {
    %c0_i32 = arith.constant 0 : i32
    %c0_i32_0 = arith.constant 0 : i32
    %c0_i32_1 = arith.constant 0 : i32
    %c0_i32_2 = arith.constant 0 : i32
    return %c0_i32, %c0_i32_0, %c0_i32_1 : i32, i32, i32
  }
  func.func @transform_16(%arg0: i32) -> (i32, i32) {
    %c0_i32 = arith.constant 0 : i32
    %c0_i32_0 = arith.constant 0 : i32
    %c0_i32_1 = arith.constant 0 : i32
    return %c0_i32, %c0_i32_0 : i32, i32
  }
  func.func @transform_17(%arg0: i32) -> (i32, i32) {
    %c0_i32 = arith.constant 0 : i32
    %c0_i32_0 = arith.constant 0 : i32
    %c0_i32_1 = arith.constant 0 : i32
    return %c0_i32, %c0_i32_0 : i32, i32
  }
  func.func @transform_18(%arg0: i32) -> (i32, i32) {
    %c0_i32 = arith.constant 0 : i32
    %c0_i32_0 = arith.constant 0 : i32
    %c0_i32_1 = arith.constant 0 : i32
    return %c0_i32, %c0_i32_0 : i32, i32
  }
  func.func @transform_19(%arg0: i32) -> (i32, i32) {
    %c0_i32 = arith.constant 0 : i32
    %c0_i32_0 = arith.constant 0 : i32
    %c0_i32_1 = arith.constant 0 : i32
    return %c0_i32, %c0_i32_0 : i32, i32
  }
  func.func @transform_20(%arg0: i32) -> (i32, i32, i32) {
    %c0_i32 = arith.constant 0 : i32
    %c0_i32_0 = arith.constant 0 : i32
    %c0_i32_1 = arith.constant 0 : i32
    %c0_i32_2 = arith.constant 0 : i32
    return %c0_i32, %c0_i32_0, %c0_i32_1 : i32, i32, i32
  }
  func.func @transform_21(%arg0: i32) -> (i32, i32, i32) {
    %c0_i32 = arith.constant 0 : i32
    %c0_i32_0 = arith.constant 0 : i32
    %c0_i32_1 = arith.constant 0 : i32
    %c0_i32_2 = arith.constant 0 : i32
    return %c0_i32, %c0_i32_0, %c0_i32_1 : i32, i32, i32
  }
  func.func @transform_22(%arg0: i32) -> (i32, i32, i32) {
    %c2_i32 = arith.constant 2 : i32
    %0 = arith.subi %c2_i32, %arg0 : i32
    %c0_i32 = arith.constant 0 : i32
    %c0_i32_0 = arith.constant 0 : i32
    %c0_i32_1 = arith.constant 0 : i32
    return %0, %c0_i32, %c0_i32_0 : i32, i32, i32
  }
  func.func @transform_23(%arg0: i32) -> (i32, i32, i32) {
    %c0_i32 = arith.constant 0 : i32
    %c0_i32_0 = arith.constant 0 : i32
    %c0_i32_1 = arith.constant 0 : i32
    %c0_i32_2 = arith.constant 0 : i32
    return %c0_i32, %c0_i32_0, %c0_i32_1 : i32, i32, i32
  }
}

</mosaic_0001>

<bundles_post_ra>
// kernel: lstm_network_forward.1
= control target key start
LH: loop header
LB: loop body
LE: loop exit
PB: predicated region body
PF: predicated region fallthrough
CT: control target
= control target key end

     0   :  { %s6592_s0 = inlined_call_operand.vmem [shape: f32[32,2], index: 0, kind: input, shape index: {}]   ;;  %s6593_s1 = inlined_call_operand.vmem [shape: f32[8,1], index: 1, kind: input, shape index: {}]   ;;  %s6594_s2 = inlined_call_operand.vmem [shape: f32[8,1], index: 2, kind: input, shape index: {}]   ;;  %s6595_s3 = inlined_call_operand.vmem [shape: f32[4,8,32], index: 3, kind: input, shape index: {}]   ;;  %s6596_s4 = inlined_call_operand.hbm [shape: f32[2,16], index: 4, kind: input, shape index: {}]   ;;  %s6597_s5 = inlined_call_operand.vmem [shape: f32[1,16], index: 5, kind: input, shape index: {}]   ;;  %s6598_s6 = inlined_call_operand.hbm [shape: f32[1,16], index: 6, kind: input, shape index: {}]   ;;  %s6599_s7 = inlined_call_operand.vmem [shape: f32[1,16], index: 7, kind: input, shape index: {}]   ;;  %s6600_s8 = inlined_call_operand.vmem [shape: f32[32,2], index: 8, kind: input, shape index: {}]   ;;  %s6601_s9 = inlined_call_operand.vmem [shape: f32[1,2], index: 9, kind: input, shape index: {}]   ;;  %s6602_s10 = inlined_call_operand.vmem [shape: f32[16,96], index: 10, kind: input, shape index: {}]   ;;  %s6603_s11 = inlined_call_operand.vmem [shape: f32[32,96], index: 11, kind: input, shape index: {}]   ;;  %s6604_s12 = inlined_call_operand.vmem [shape: f32[1,96], index: 12, kind: input, shape index: {}]   ;;  %s6605_s13 = inlined_call_operand.vmem [shape: f32[1,32], index: 13, kind: input, shape index: {}]   ;;  %s6606_s14 = inlined_call_operand.hbm [shape: f32[3,64,128], index: 14, kind: input, shape index: {}]   ;;  %s6607_s15 = inlined_call_operand.vmem [shape: f32[3,1,128], index: 15, kind: input, shape index: {}]   ;;  %s6608_s16 = inlined_call_operand.hbm [shape: f32[1,96], index: 16, kind: input, shape index: {}]   ;;  %s6609_s17 = inlined_call_operand.vmem [shape: f32[32,96], index: 17, kind: input, shape index: {}]   ;;  %s6610_s18 = inlined_call_operand.hbm [shape: f32[1,96], index: 18, kind: input, shape index: {}]   ;;  %s6611_s19 = inlined_call_operand.hbm [shape: f32[1,32], index: 19, kind: input, shape index: {}]   ;;  %s6612_s20 = inlined_call_operand.hbm [shape: f32[3,64,128], index: 20, kind: input, shape index: {}]   ;;  %s6613_s21 = inlined_call_operand.vmem [shape: f32[3,1,128], index: 21, kind: input, shape index: {}]   ;;  %s6614_s22 = inlined_call_operand.vmem [shape: f32[3,8,2], index: 22, kind: output, shape index: {0}]   ;;  %s6615_s23 = inlined_call_operand.hbm [shape: f32[4,8,32], index: 23, kind: output, shape index: {1}]  }
   0x1   :  { %6628 = sst [smem:[#allocation22_spill]] %s6592_s0 }
   0x2   :  { %6629 = sst [smem:[#allocation23_spill]] %s6593_s1 }
   0x3   :  { %6630 = sst [smem:[#allocation24_spill]] %s6594_s2 }
   0x4   :  { %6631 = sst [smem:[#allocation25_spill]] %s6595_s3 }
   0x5   :  { %6632 = sst [smem:[#allocation26_spill]] %s6596_s4 }
   0x6   :  { %6633 = sst [smem:[#allocation27_spill]] %s6597_s5 }
   0x7   :  { %6634 = sst [smem:[#allocation28_spill]] %s6598_s6 }
   0x8   :  { %6635 = sst [smem:[#allocation29_spill]] %s6599_s7 }
   0x9   :  { %6636 = sst [smem:[#allocation30_spill]] %s6600_s8 }
   0xa   :  { %6637 = sst [smem:[#allocation31_spill]] %s6601_s9 }
   0xb   :  { %6638 = sst [smem:[#allocation32_spill]] %s6615_s23 }
   0xc   :  { %29 = vsyncpa [#allocation4], 0 }
   0xd   :  { %30 = vsyncpa [#allocation7], 0 }
   0xe   :  { %31 = vsyncpa [#allocation10], 0 }
   0xf   :  { %32 = vsyncpa [#allocation13], 0 }
  0x10   :  { %33 = vsyncpa [#allocation5], 0  ;;  %s5657_s4 = smov 0  }
  0x11 LB: > { %6639 = sst [smem:[#allocation21_spill]] %s5515_s4  ;;  %s5517_s30 = smov [#allocation6]   ;;  %s5515_s4 = sphi %s5657_s4, %s39_s4  }
  0x12   : > { %s594_s24 = sshll.u32 %s5517_s30, 4  ;;  %s5663_s25 = sadd.s32 4294967295, %s5515_s4   ;;  %s5669_s24 = int_to_ptr.vmem [resolvable:$true] %s594_s24 }
  0x13   : > { %p3996_p0 = scmp.ge.s32.totalorder %s5515_s4, 1  ;;  %p555_p1 = scmp.lt.s32.totalorder %s5515_s4, 4 }
  0x14   : > { %p6624_p3 = scmp.eq.s32.totalorder %s5663_s25, 0  ;;  %s5518_s1 = smov [#allocation9]  }
  0x15   : > { %p5671_p4 = pnand %p3996_p0, %p555_p1  ;;  %s642_s26 = sshll.u32 %s5518_s1, 4  ;;  %s5677_s26 = int_to_ptr.vmem [resolvable:$true] %s642_s26 }
  0x16   : > { %s5519_s2 = smov [#allocation12]   ;;  %s5520_s7 = smov [#allocation3]  }
  0x17   : > { %s6640_s5 = scalar_select %p5671_p4, 1, 0 }
  0x18   : > { %p5051_p5 = pneg %p5671_p4  ;;  %s667_s6 = sshll.u32 %s5519_s2, 4  ;;  %s5685_s6 = int_to_ptr.vmem [resolvable:$true] %s667_s6 }
  0x19   : > { %s580_s28 = sshll.u32 %s5520_s7, 4  ;;  %s6642_s0 = sld [smem:[#allocation28_spill]]  ;;  %s5687_s28 = int_to_ptr.vmem [resolvable:$true] %s580_s28 }
  0x1a   : > { %p5681_p6 = pnand %p6624_p3, %p5051_p5 }
  0x1c   : > { %p5697_p8 = pneg %p5681_p6 }
  0x1f   : > { %s5267_s30 = scalar_lea.hbm %s6642_s0, 16 }
  0x20   : > { %p5268_p7 = scmp.ne.s32.totalorder %s6642_s0, %s5267_s30  ;;  %p5274_p11 = scmp.lt.u32.totalorder %s5267_s30, %s6642_s0 }
  0x22   : > { %p5270_p9 = pnand %p5697_p8, %p5268_p7 }
  0x24   : > { %p5271_p10 = pneg %p5270_p9 }
  0x26   : > { %p5276_p12 = pnand %p5274_p11, %p5271_p10 }
  0x28   : > { %5279 = shalt.err (!%p5276_p12)
}
  0x29   : > { %s5280_s4 = scalar_lea.vmem %s5669_s24, 16  ;;  %s5287_s29 = scalar_lea.vmem %s5669_s24, 32 }
  0x2a   : > { %p5281_p13 = scmp.ne.s32.totalorder %s5669_s24, %s5280_s4  ;;  %p5288_p5 = scmp.lt.s32.totalorder %s5669_s24, %s5669_s24 }
  0x2b   : > { %p5289_p7 = scmp.lt.s32.totalorder %s5287_s29, %s5280_s4 }
  0x2c   : > { %p5283_p0 = pnand %p5281_p13, %p5697_p8 }
  0x2d   : > { %p5290_p9 = por %p5289_p7, %p5288_p5 }
  0x2e   : > { %p5284_p1 = pneg %p5283_p0 }
  0x30   : > { %p5291_p2 = pnand %p5290_p9, %p5284_p1 }
  0x32   : > { %5294 = shalt.err (!%p5291_p2)
}
  0x33   : > { %5057 = dma.hbm_to_vmem [thread:$0]  (!%p5681_p6), %s6642_s0, 16, %s5669_s24, [#allocation7]  }
  0x34   : > { %s5295_s7 = scalar_lea.hbm %s6608_s16, 16 }
  0x35   : > { %p5296_p10 = scmp.ne.s32.totalorder %s6608_s16, %s5295_s7  ;;  %p5302_p2 = scmp.lt.u32.totalorder %s5295_s7, %s6608_s16 }
  0x37   : > { %p5298_p11 = pnand %p5296_p10, %p5697_p8 }
  0x39   : > { %p5299_p12 = pneg %p5298_p11 }
  0x3b   : > { %p5304_p13 = pnand %p5302_p2, %p5299_p12 }
  0x3d   : > { %5307 = shalt.err (!%p5304_p13)
}
  0x3e   : > { %s5308_s24 = scalar_lea.vmem %s5677_s26, 16  ;;  %s5315_s8 = scalar_lea.vmem %s5677_s26, 32 }
  0x3f   : > { %p5309_p0 = scmp.ne.s32.totalorder %s5677_s26, %s5308_s24  ;;  %p5316_p7 = scmp.lt.s32.totalorder %s5677_s26, %s5677_s26 }
  0x40   : > { %p5317_p9 = scmp.lt.s32.totalorder %s5315_s8, %s5308_s24 }
  0x41   : > { %p5311_p1 = pnand %p5309_p0, %p5697_p8 }
  0x42   : > { %p5318_p10 = por %p5317_p9, %p5316_p7 }
  0x43   : > { %p5312_p5 = pneg %p5311_p1 }
  0x45   : > { %p5319_p11 = pnand %p5318_p10, %p5312_p5 }
  0x47   : > { %5322 = shalt.err (!%p5319_p11)
}
  0x48   : > { %5063 = dma.hbm_to_vmem [thread:$0]  (!%p5681_p6), %s6608_s16, 16, %s5677_s26, [#allocation10]  }
  0x49   : > { %s5323_s1 = scalar_lea.hbm %s6611_s19, 16 }
  0x4a   : > { %p5324_p12 = scmp.ne.s32.totalorder %s6611_s19, %s5323_s1  ;;  %p5330_p0 = scmp.lt.u32.totalorder %s5323_s1, %s6611_s19 }
  0x4c   : > { %p5326_p2 = pnand %p5324_p12, %p5697_p8 }
  0x4e   : > { %p5327_p13 = pneg %p5326_p2 }
  0x50   : > { %p5332_p1 = pnand %p5330_p0, %p5327_p13 }
  0x52   : > { %5335 = shalt.err (!%p5332_p1)
}
  0x53   : > { %s5336_s26 = scalar_lea.vmem %s5685_s6, 16  ;;  %s5343_s8 = scalar_lea.vmem %s5685_s6, 32 }
  0x54   : > { %p5337_p5 = scmp.ne.s32.totalorder %s5685_s6, %s5336_s26  ;;  %p5344_p10 = scmp.lt.s32.totalorder %s5685_s6, %s5685_s6 }
  0x55   : > { %p5345_p11 = scmp.lt.s32.totalorder %s5343_s8, %s5336_s26 }
  0x56   : > { %p5339_p7 = pnand %p5337_p5, %p5697_p8 }
  0x57   : > { %p5346_p12 = por %p5345_p11, %p5344_p10 }
  0x58   : > { %p5340_p9 = pneg %p5339_p7 }
  0x5a   : > { %p5347_p2 = pnand %p5346_p12, %p5340_p9 }
  0x5c   : > { %5350 = shalt.err (!%p5347_p2)
}
  0x5d   : > { %5069 = dma.hbm_to_vmem [thread:$0]  (!%p5681_p6), %s6611_s19, 16, %s5685_s6, [#allocation13]  }
  0x5e   : > { %s6644_s1 = sld [smem:[#allocation26_spill]] }
  0x64   : > { %s5351_s7 = scalar_lea.hbm %s6644_s1, 32 }
  0x65   : > { %p5352_p13 = scmp.ne.s32.totalorder %s6644_s1, %s5351_s7  ;;  %p5358_p5 = scmp.lt.u32.totalorder %s5351_s7, %s6644_s1 }
  0x67   : > { %p5354_p0 = pnand %p5352_p13, %p5697_p8 }
  0x69   : > { %p5355_p1 = pneg %p5354_p0 }
  0x6b   : > { %p5360_p7 = pnand %p5358_p5, %p5355_p1 }
  0x6d   : > { %5363 = shalt.err (!%p5360_p7)
}
  0x6e   : > { %s5364_s6 = scalar_lea.vmem %s5687_s28, 32  ;;  %p5372_p12 = scmp.lt.s32.totalorder %s5687_s28, %s5687_s28 }
  0x6f   : > { %p5365_p9 = scmp.ne.s32.totalorder %s5687_s28, %s5364_s6  ;;  %p5373_p2 = scmp.lt.s32.totalorder %s5364_s6, %s5364_s6 }
  0x71   : > { %p5367_p10 = pnand %p5365_p9, %p5697_p8  ;;  %p5374_p13 = por %p5373_p2, %p5372_p12 }
  0x73   : > { %p5368_p11 = pneg %p5367_p10 }
  0x75   : > { %p5375_p0 = pnand %p5374_p13, %p5368_p11 }
  0x77   : > { %5378 = shalt.err (!%p5375_p0)
}
  0x78   : > { %5054 = dma.hbm_to_vmem [thread:$0]  (!%p5681_p6), %s6644_s1, 32, %s5687_s28, [#allocation4]  }
  0x79   : > { %s5521_s9 = smov [#allocation8]   ;;  %s5379_s4 = scalar_lea.hbm %s6606_s14, 3072 }
  0x7a   : > { %s625_s3 = sshll.u32 %s5521_s9, 4  ;;  %p5380_p1 = scmp.ne.s32.totalorder %s6606_s14, %s5379_s4  ;;  %s626_s3 = int_to_ptr.vmem [resolvable:$true] %s625_s3 }
  0x7b   : > { %p5386_p9 = scmp.lt.u32.totalorder %s5379_s4, %s6606_s14 }
  0x7c   : > { %p5382_p5 = pnand %p5380_p1, %p5697_p8 }
  0x7e   : > { %p5383_p7 = pneg %p5382_p5 }
  0x80   : > { %p5388_p10 = pnand %p5386_p9, %p5383_p7 }
  0x82   : > { %5391 = shalt.err (!%p5388_p10)
}
  0x83   : > { %s5392_s28 = scalar_lea.vmem %s626_s3, 3072  ;;  %p5400_p13 = scmp.lt.s32.totalorder %s626_s3, %s626_s3 }
  0x84   : > { %p5393_p11 = scmp.ne.s32.totalorder %s626_s3, %s5392_s28  ;;  %p5401_p0 = scmp.lt.s32.totalorder %s5392_s28, %s5392_s28 }
  0x86   : > { %p5395_p12 = pnand %p5393_p11, %p5697_p8  ;;  %p5402_p3 = por %p5401_p0, %p5400_p13 }
  0x88   : > { %p5396_p2 = pneg %p5395_p12 }
  0x8a   : > { %p5403_p4 = pnand %p5402_p3, %p5396_p2 }
  0x8c   : > { %5406 = shalt.err (!%p5403_p4)
}
  0x8d   : > { %s5522_s8 = smov 128   ;;  %s5523_s23 = smov 8  }
  0x8e   : > { %5060 = dma.hbm_to_vmem [thread:$0]  (!%p5681_p6), %s6606_s14, 3072, %s626_s3, [#allocation7], %s5522_s8, %s5522_s8, %s5523_s23  }
  0x8f   : > { %s5524_s7 = smov [#allocation11]   ;;  %s5525_s29 = smov [#allocation14]  }
  0x90   : > { %s656_s4 = sshll.u32 %s5524_s7, 4  ;;  %s677_s24 = sshll.u32 %s5525_s29, 4  ;;  %s657_s4 = int_to_ptr.vmem [resolvable:$true] %s656_s4  ;;  %s5811_s24 = int_to_ptr.vmem [resolvable:$true] %s677_s24 }
  0x91   : > { %s5407_s28 = scalar_lea.hbm %s6610_s18, 16 }
  0x92   : > { %p5408_p3 = scmp.ne.s32.totalorder %s6610_s18, %s5407_s28  ;;  %p5414_p5 = scmp.lt.u32.totalorder %s5407_s28, %s6610_s18 }
  0x94   : > { %p5410_p4 = pnand %p5408_p3, %p5697_p8 }
  0x96   : > { %p5411_p1 = pneg %p5410_p4 }
  0x98   : > { %p5416_p7 = pnand %p5414_p5, %p5411_p1 }
  0x9a   : > { %5419 = shalt.err (!%p5416_p7)
}
  0x9b   : > { %s5420_s30 = scalar_lea.vmem %s657_s4, 16  ;;  %s5427_s7 = scalar_lea.vmem %s657_s4, 32 }
  0x9c   : > { %p5421_p9 = scmp.ne.s32.totalorder %s657_s4, %s5420_s30  ;;  %p5428_p12 = scmp.lt.s32.totalorder %s657_s4, %s657_s4 }
  0x9d   : > { %p5429_p2 = scmp.lt.s32.totalorder %s5427_s7, %s5420_s30 }
  0x9e   : > { %p5423_p10 = pnand %p5421_p9, %p5697_p8 }
  0x9f   : > { %p5430_p13 = por %p5429_p2, %p5428_p12 }
  0xa0   : > { %p5424_p11 = pneg %p5423_p10 }
  0xa2   : > { %p5431_p0 = pnand %p5430_p13, %p5424_p11 }
  0xa4   : > { %5434 = shalt.err (!%p5431_p0)
}
  0xa5   : > { %5066 = dma.hbm_to_vmem [thread:$0]  (!%p5681_p6), %s6610_s18, 16, %s657_s4, [#allocation10]  }
  0xa6   : > { %s5435_s6 = scalar_lea.hbm %s6612_s20, 3072 }
  0xa7   : > { %p5436_p3 = scmp.ne.s32.totalorder %s6612_s20, %s5435_s6  ;;  %p5442_p5 = scmp.lt.u32.totalorder %s5435_s6, %s6612_s20 }
  0xa9   : > { %p5438_p4 = pnand %p5436_p3, %p5697_p8 }
  0xab   : > { %p5439_p1 = pneg %p5438_p4 }
  0xad   : > { %p5444_p7 = pnand %p5442_p5, %p5439_p1 }
  0xaf   : > { %5447 = shalt.err (!%p5444_p7)
}
  0xb0   : > { %s5448_s4 = scalar_lea.vmem %s5811_s24, 3072  ;;  %p5456_p12 = scmp.lt.s32.totalorder %s5811_s24, %s5811_s24 }
  0xb1   : > { %p5449_p9 = scmp.ne.s32.totalorder %s5811_s24, %s5448_s4  ;;  %p5457_p2 = scmp.lt.s32.totalorder %s5448_s4, %s5448_s4 }
  0xb3   : > { %p5451_p10 = pnand %p5449_p9, %p5697_p8  ;;  %p5458_p13 = por %p5457_p2, %p5456_p12 }
  0xb5   : > { %p5452_p11 = pneg %p5451_p10 }
  0xb7   : > { %p5459_p0 = pnand %p5458_p13, %p5452_p11 }
  0xb9   : > { %5462 = shalt.err (!%p5459_p0)
}
  0xba   : > { %5072 = dma.hbm_to_vmem [thread:$0]  (!%p5681_p6), %s6612_s20, 3072, %s5811_s24, [#allocation13], %s5522_s8, %s5522_s8, %s5523_s23  }
  0xbb   : > { %p6645_p3 = scmp.ne.s32.totalorder %s6640_s5, 0 }
  0xbc   : > { %p6646_p8 = scmp.eq.s32.totalorder (!%p6645_p3), %s5663_s25, 0 }
  0xbd   : > { %696 = sbr.rel (%p6645_p3) target bundleno = 10836 (0x2a54), region = 108 }
  0xc4   : > { %5494 = dma.done.wait (%p6646_p8), [#allocation4], 32   ;;  %p6647_p4 = pmov %p6646_p8 }
  0xc6   : > { %5496 = vsyncadd (%p6647_p4), [#allocation4], 4294967264  ;;  %p6648_p1 = pmov %p6647_p4 }
  0xc8   : > { %5498 = dma.done.wait (%p6648_p1), [#allocation7], 3088   ;;  %p6649_p5 = pmov %p6648_p1 }
  0xc9   : > { %p6650_p7 = pmov %p6648_p1 }
  0xca   : > { %5500 = vsyncadd (%p6649_p5), [#allocation7], 4294964208 }
  0xcb   : > { %5502 = dma.done.wait (%p6650_p7), [#allocation10], 32   ;;  %p6651_p6 = pmov %p6648_p1 }
  0xcc   : > { %p6652_p9 = pmov %p6648_p1 }
  0xcd   : > { %5504 = vsyncadd (%p6651_p6), [#allocation10], 4294967264 }
  0xce   : > { %5506 = dma.done.wait (%p6652_p9), [#allocation13], 3088   ;;  %p6653_p10 = pmov %p6648_p1 }
  0xcf   : > { %s779_s5 = ssub.s32 2, %s5663_s25  ;;  %p6654_p12 = scmp.ne.s32.totalorder %s5663_s25, 0 }
  0xd0   : > { %5508 = vsyncadd (%p6653_p10), [#allocation13], 4294964208  ;;  %p780_p11 = scmp.lt.s32.totalorder %s779_s5, 2  ;;  %s6655_s29 = sld [smem:[#allocation22_spill]] (!%p6654_p12)  ;;  %vm793_vm0 = vcmask (!%p6654_p12), 15360  }
  0xd1   : > { %788 = sbr.rel (%p6654_p12) target bundleno = 217 (0xd9), region = 140 }
  0xd2   : > { %s6667_s5 = smov (!%p780_p11, %s779_s5), 2 }
  0xd3   : > { %s4012_s27 = sshll.u32 %s6667_s5, 3 }
  0xd4   : > { %s5879_s23 = scalar_lea.vmem %s6614_s22, %s4012_s27 }
  0xd6   : > { %v789_v0 = vld [vmem:[%s6655_s29] sm:$0xff] (!%p6654_p12)  ;;  %v790_v1 = vld [vmem:[%s6655_s29 + $0x8] sm:$0xff] (!%p6654_p12)  ;;  %v791_v2 = vld [vmem:[%s6655_s29 + $0x10] sm:$0xff] (!%p6654_p12) }
  0xd7   : > { %794 = vst.msk [vmem:[#allocation2] sm:$0xff] (!%p6654_p12), %vm793_vm0, %v789_v0  ;;  %795 = vst.msk [vmem:[#allocation2 + $0x8] sm:$0xff] (!%p6654_p12), %vm793_vm0, %v790_v1  ;;  %v792_v3 = vld [vmem:[%s6655_s29 + $0x18] sm:$0xff] (!%p6654_p12) }
  0xd8   : > { %796 = vst.msk [vmem:[#allocation2 + $0x10] sm:$0xff] %vm793_vm0, %v791_v2  ;;  %797 = vst.msk [vmem:[#allocation2 + $0x18] sm:$0xff] %vm793_vm0, %v792_v3 }
  0xd9 PF: > { %v5526_v6 = vmov 0   ;;  %v5527_v7 = vmov 1   ;;  %v901_v9 = vld [vmem:[%s6602_s10] sm:$0xff]  ;;  %v902_v10 = vld [vmem:[%s6602_s10 + $0x8] sm:$0xff]  ;;  %v5528_v13 = vmov 0.0|0.0   ;;  %vm5529_vm1 = vmmov 0  }
  0xda   : > { %5119 = vset.pattern.permute.xlu1 %v5526_v6  ;;  %5117 = vset.pattern.permute.xlu0 %v5526_v6  ;;  %v4752_v11 = vpack.c.bf16 %v902_v10, %v901_v9  ;;  %v5530_v14 = vmov 0.0   ;;  %v4023_v15 = vld [vmem:[%s6605_s13] ss:$0 sm:$0xff]  ;;  %s5531_s8 = smov 64   ;;  %v827_v16 = vlaneseq  ;;  %s6656_s29 = sld [smem:[#allocation27_spill]]  ;;  %v1082_v36 = vld [vmem:[%s6603_s11 + $0x8] sm:$0xff] }
  0xdb   : > { %4756 = vmatprep.subr.bf16.mxu1 %v5528_v13  ;;  %4324 = vmatprep.mubr.msk.f32.mxu1 %vm5529_vm1, %v5530_v14  ;;  %v806_v20 = vld [vmem:[#allocation3] sm:$0x3]  ;;  %vm910_vm2 = vcmask 130048   ;;  %v1083_v47 = vld [vmem:[%s6603_s11 + $0x10] sm:$0xff]  ;;  %v1084_v48 = vld [vmem:[%s6603_s11 + $0x18] sm:$0xff]  ;;  %s6657_s27 = sld [smem:[#allocation25_spill]] }
  0xdc   : > { %4753 = vmatprep.subr.bf16.mxu0 %v4752_v11  ;;  %4758 = vmatpush3.bf16.msra.mxu1 %v4752_v11  ;;  %v828_v17 = vshrl.u32 %v827_v16, 7  ;;  %v1081_v35 = vld [vmem:[%s6603_s11] sm:$0xff]  ;;  %v5930_v53 = vpack.c.bf16 %v1084_v48, %v1083_v47  ;;  %vm1092_vm3 = vcmask 261120   ;;  %s5532_s1 = smov 32   ;;  %s6658_s28 = sld [smem:[#allocation23_spill]]  ;;  %vm1630_vm4 = vcmask 523264  }
  0xdd   : > { %4755 = vmatpush3.bf16.msra.mxu0 %v4752_v11  ;;  %4765 = vmatprep.subr.bf16.mxu1 %v5528_v13  ;;  %v5919_v44 = vpack.c.bf16 %v1082_v36, %v1081_v35  ;;  %v5962_v3 = vld [vmem:[%s6604_s12] ss:$0 sm:$0xff]  ;;  %s6659_s30 = sld [smem:[#allocation29_spill]]  ;;  %s6660_s0 = sld [smem:[#allocation24_spill]] }
  0xde   : > { %4759 = vmatprep.subr.bf16.mxu0 %v5528_v13  ;;  %v829_v18 = vsub.s32 0, %v828_v17  ;;  %v853_v19 = vsub.s32 1, %v828_v17  ;;  %s6661_s6 = sld [smem:[#allocation30_spill]]  ;;  %p5087_p2 = scmp.eq.s32.totalorder %s5663_s25, 2 }
  0xdf   : > { %v799_v4 = vld [vmem:[#allocation2 + $0x8] sm:$0xff]  ;;  %v798_v5 = vld [vmem:[#allocation2] sm:$0xff]  ;;  %v800_v8 = vld [vmem:[#allocation2 + $0x10] sm:$0xff]  ;;  %s5534_s4 = smov [#allocation15]  }
  0xe0   : > { %814 = vperm.xlu1 %5119, %v799_v4   ;;  %809 = vperm.xlu0 %5117, %v798_v5   ;;  %v801_v12 = vld [vmem:[#allocation2 + $0x18] sm:$0xff]  ;;  %v830_v23 = vrot.slane %v806_v20, %v829_v18  ;;  %v854_v24 = vrot.slane %v806_v20, %v853_v19  ;;  %v4014_v31 = vld [vmem:[%s6656_s29] ss:$0 sm:$0xff]  ;;  %s5533_s29 = smov 96   ;;  %s3870_s7 = sshll.u32 %s5534_s4, 4  ;;  %s3871_s7 = int_to_ptr.vmem [resolvable:$true] %s3870_s7 }
  0xe1   : > { %v1091_v58 = vld [vmem:[%s6657_s27] sm:$0xff]  ;;  %p5470_p8 = scmp.lt.s32.totalorder %s3871_s7, %s3871_s7 }
  0xe2   : > { %v878_v17 = vld [vmem:[%s6658_s28] sm:$0xff] }
  0xe4   : > { %5120 = vset.pattern.permute.xlu1 %v5527_v7  ;;  %5118 = vset.pattern.permute.xlu0 %v5527_v7 }
  0xe5   : > { %840 = vperm.xlu1 %5120, %v799_v4   ;;  %836 = vperm.xlu0 %5118, %v798_v5  }
  0xe9   : > { %5121 = vset.pattern.permute.xlu1 %v5526_v6  ;;  %844 = vperm.xlu0 %5118, %v800_v8  }
  0xea   : > { %819 = vperm.xlu1 %5121, %v800_v8  }
  0xed   : > { %848 = vperm.xlu0 %5118, %v801_v12  }
  0xee   : > { %824 = vperm.xlu1 %5121, %v801_v12  }
  0xf1   : > { %5122 = vset.pattern.permute.xlu0 %v5526_v6 }
  0xf2   : > { %1173 = vrot.lane.b32.xlu1 %v4023_v15, %s5531_s8 }
 0x15f   : > { %v815_v21 = vpop.permute.xlu1 %814  ;;  %v810_v22 = vpop.permute.xlu0 %809 }
 0x160   : > { %v832_v27 = vmul.f32 %v830_v23, %v815_v21  ;;  %v831_v28 = vmul.f32 %v830_v23, %v810_v22 }
 0x164   : > { %v841_v25 = vpop.permute.xlu1 %840  ;;  %v837_v26 = vpop.permute.xlu0 %836 }
 0x165   : > { %v856_v29 = vmul.f32 %v854_v24, %v841_v25  ;;  %v855_v30 = vmul.f32 %v854_v24, %v837_v26  ;;  %v4016_v25 = vld [vmem:[%s6659_s30] ss:$0 sm:$0xff] }
 0x167   : > { %v860_v32 = vadd.f32 %v856_v29, %v832_v27  ;;  %v859_v33 = vadd.f32 %v855_v30, %v831_v28 }
 0x168   : > { %v845_v34 = vpop.permute.xlu0 %844 }
 0x169   : > { %v871_v37 = vadd.f32 %v4014_v31, %v860_v32  ;;  %v857_v38 = vmul.f32 %v854_v24, %v845_v34  ;;  %v820_v39 = vpop.permute.xlu1 %819  ;;  %v870_v40 = vadd.f32 %v4014_v31, %v859_v33 }
 0x16a   : > { %v833_v41 = vmul.f32 %v830_v23, %v820_v39 }
 0x16b   : > { %v875_v42 = vmax.f32 %v871_v37, 0.0  ;;  %v874_v43 = vmax.f32 %v870_v40, 0.0 }
 0x16c   : > { %v861_v45 = vadd.f32 %v857_v38, %v833_v41  ;;  %v849_v46 = vpop.permute.xlu0 %848 }
 0x16d   : > { %v858_v49 = vmul.f32 %v854_v24, %v849_v46  ;;  %v825_v50 = vpop.permute.xlu1 %824  ;;  %4314 = vmatprep.mubr.msk.f32.mxu0 %vm910_vm2, %v874_v43  ;;  %v4015_v24 = vld [vmem:[#allocation6] ss:$0 sm:$0xff] }
 0x16e   : > { %v872_v51 = vadd.f32 %v4014_v31, %v861_v45  ;;  %v834_v52 = vmul.f32 %v830_v23, %v825_v50  ;;  %4315 = vmatmul.mubr.msk.f32.vlgmr.msra.gmra.mrb[0].mxu0 %vm910_vm2, %v875_v42 }
 0x16f   : > { %4761 = vmatpush3.bf16.msra.mxu0 %v5919_v44 }
 0x170   : > { %v876_v54 = vmax.f32 %v872_v51, 0.0  ;;  %v862_v55 = vadd.f32 %v858_v49, %v834_v52  ;;  %4762 = vmatprep.subr.bf16.mxu0 %v5528_v13 }
 0x171   : > { %v5955_v63 = vpop.permute.xlu1 %1173 }
 0x172   : > { %v873_v56 = vadd.f32 %v4014_v31, %v862_v55  ;;  %4317 = vmatprep.mubr.msk.f32.mxu0 %vm910_vm2, %v876_v54 }
 0x173   : > { %4764 = vmatpush3.bf16.msra.mxu0 %v5930_v53 }
 0x174   : > { %v877_v57 = vmax.f32 %v873_v56, 0.0  ;;  %4771 = vmatprep.subr.bf16.mxu0 %v5528_v13 }
 0x176   : > { %4318 = vmatmul.mubr.msk.f32.gmra.mrb[2].mxu0 %vm910_vm2, %v877_v57 }
 0x177   : > { %4335 = vmatprep.mubr.msk.f32.mxu0 %vm5529_vm1, %v5530_v14 }
 0x17a   : > { %4336 = vmatmul.mubr.msk.f32.vlgmr.msra.gmra.mrb[4].mxu0 %vm1092_vm3, %v1091_v58 }
 0x17b   : > { %4773 = vmatpush3.bf16.msra.mxu0 %v5919_v44  ;;  %4357 = vmatprep.mubr.msk.f32.mxu0 %vm5529_vm1, %v5530_v14 }
 0x17c   : > { %4774 = vmatprep.subr.bf16.mxu0 %v5528_v13 }
 0x17f   : > { %4776 = vmatpush3.bf16.msra.mxu0 %v5930_v53 }
 0x180   : > { %4783 = vmatprep.subr.bf16.mxu0 %v5528_v13 }
 0x241   : > { %v5949_v59 = vpop.f32.mrb[0].mxu0 }
 0x242   : > { %v989_v60 = vpop.f32.mrb[1].mxu0  ;;  %v995_v36 = vadd.f32 %v5949_v59, %v5962_v3 }
 0x243   : > { %v990_v4 = vadd.f32 %v5962_v3, %v989_v60 }
 0x249   : > { %v5951_v61 = vpop.f32.mrb[2].mxu0 }
 0x24a   : > { %v5953_v62 = vpop.f32.mrb[3].mxu0 }
 0x24d   : > { %v1162_v0 = vpop.f32.mrb[4].mxu0 }
 0x24e   : > { %v1176_v1 = vadd.f32 %v5955_v63, %v1162_v0  ;;  %v4337_v2 = vpop.f32.mrb[5].mxu0  ;;  %v1166_v5 = vadd.f32 %v1162_v0, %v990_v4 }
 0x250   : > { %1178 = vrot.lane.b32.xlu0 %v1176_v1, %s5531_s8  ;;  %v4025_v6 = vmul.f32 -1.442695, %v1166_v5 }
 0x252   : > { %5123 = vpow2.f32 %v4025_v6 }
 0x25c   : > { %v5124_v7 = vpop.eup %5123 }
 0x25d   : > { %v1170_v8 = vadd.f32 1.0, %v5124_v7 }
 0x25f   : > { %5125 = vrcp.f32 %v1170_v8 }
 0x269   : > { %v5126_v9 = vpop.eup %5125 }
 0x26a   : > { %v1188_v19 = vsub.f32 1.0, %v5126_v9 }
 0x2c2   : > { %v1179_v10 = vpop.permute.xlu0 %1178 }
 0x2c3   : > { %v1181_v11 = vmul.f32 %v5126_v9, %v1179_v10 }
 0x2c5   : > { %1183 = vrot.lane.b32.xlu1 %v1181_v11, %s5531_s8 }
 0x2c9   : > { %1194 = vrot.lane.b32.xlu1 %v1091_v58, %s5532_s1  ;;  %v1000_v58 = vadd.f32 %v5962_v3, %v5953_v62  ;;  %v4034_v62 = vld [vmem:[%s6657_s27 + $0x8] sm:$0xff] }
 0x337   : > { %v1184_v12 = vpop.permute.xlu1 %1183 }
 0x338   : > { %v1186_v15 = vadd.f32 %v1184_v12, %v990_v4  ;;  %v1607_v12 = vld [vmem:[#allocation8] sm:$0xff] }
 0x33a   : > { %5127 = vtanh.f32 %v1186_v15  ;;  %v1608_v15 = vld [vmem:[#allocation8 + $0x8] sm:$0xff] }
 0x33b   : > { %v1195_v18 = vpop.permute.xlu1 %1194 }
 0x33c   : > { %v1197_v21 = vmul.f32 %v5126_v9, %v1195_v18  ;;  %v1610_v18 = vld [vmem:[#allocation8 + $0x18] sm:$0xff] }
 0x344   : > { %v5128_v16 = vpop.eup %5127 }
 0x345   : > { %1190 = vrot.lane.b32.xlu0 %v5128_v16, %s5533_s29  ;;  %v6025_v16 = vpack.c.bf16 %v1608_v15, %v1607_v12 }
 0x349   : > { %882 = vperm.xlu0 %5122, %v878_v17   ;;  %v1609_v17 = vld [vmem:[#allocation8 + $0x10] sm:$0xff] }
 0x3b7   : > { %v1191_v20 = vpop.permute.xlu0 %1190 }
 0x3b8   : > { %v1193_v22 = vmul.f32 %v1191_v20, %v1188_v19  ;;  %v6032_v20 = vpack.c.bf16 %v1610_v18, %v1609_v17 }
 0x3ba   : > { %v1198_v23 = vadd.f32 %v1197_v21, %v1193_v22  ;;  %v1611_v21 = vld [vmem:[#allocation8 + $0x20] sm:$0xff]  ;;  %v1612_v22 = vld [vmem:[#allocation8 + $0x28] sm:$0xff] }
 0x3bc   : > { %1200 = vrot.lane.b32.xlu1 %v1198_v23, %s5533_s29 }
 0x3c8   : > { %v883_v26 = vpop.permute.xlu0 %882 }
 0x3c9   : > { %v891_v27 = vmul.f32 %v4015_v24, %v883_v26  ;;  %v1613_v24 = vld [vmem:[#allocation8 + $0x30] sm:$0xff] }
 0x3cb   : > { %v899_v28 = vadd.f32 %v4016_v25, %v891_v27  ;;  %v1614_v25 = vld [vmem:[#allocation8 + $0x38] sm:$0xff] }
 0x3cc   : > { %v6042_v26 = vpack.c.bf16 %v1614_v25, %v1613_v24 }
 0x3cd   : > { %v900_v29 = vmax.f32 %v899_v28, 0.0 }
 0x3cf   : > { %4325 = vmatmul.mubr.msk.f32.vlgmr.msra.gmra.mrb[0].mxu1 %vm910_vm2, %v900_v29 }
 0x3d0   : > { %4767 = vmatpush3.bf16.msra.mxu1 %v5919_v44  ;;  %4346 = vmatprep.mubr.msk.f32.mxu1 %vm5529_vm1, %v5530_v14 }
 0x3d1   : > { %4768 = vmatprep.subr.bf16.mxu1 %v5528_v13 }
 0x3d4   : > { %4770 = vmatpush3.bf16.msra.mxu1 %v5930_v53 }
 0x3d5   : > { %4777 = vmatprep.subr.bf16.mxu1 %v5528_v13 }
 0x42e   : > { %v5982_v30 = vpop.permute.xlu1 %1200 }
 0x42f   : > { %4347 = vmatmul.mubr.msk.f32.vlgmr.msra.gmra.mrb[2].mxu1 %vm1092_vm3, %v5982_v30 }
 0x430   : > { %4779 = vmatpush3.bf16.msra.mxu1 %v5919_v44  ;;  %4368 = vmatprep.mubr.msk.f32.mxu1 %vm5529_vm1, %v5530_v14 }
 0x431   : > { %4780 = vmatprep.subr.bf16.mxu1 %v5528_v13 }
 0x434   : > { %4782 = vmatpush3.bf16.msra.mxu1 %v5930_v53 }
 0x435   : > { %4789 = vmatprep.subr.bf16.mxu1 %v5528_v13 }
 0x4a2   : > { %v5992_v31 = vpop.f32.mrb[0].mxu1 }
 0x4a3   : > { %v4326_v32 = vpop.f32.mrb[1].mxu1 }
 0x502   : > { %v1270_v33 = vpop.f32.mrb[2].mxu1 }
 0x503   : > { %v1281_v34 = vadd.f32 %v1270_v33, %v5955_v63  ;;  %v4348_v35 = vpop.f32.mrb[3].mxu1  ;;  %v1274_v37 = vadd.f32 %v1270_v33, %v995_v36  ;;  %v6068_v33 = vld [vmem:[%s6607_s15] ss:$0 sm:$0xff] }
 0x505   : > { %1283 = vrot.lane.b32.xlu1 %v1281_v34, %s5531_s8  ;;  %v4027_v38 = vmul.f32 -1.442695, %v1274_v37  ;;  %v1005_v37 = vadd.f32 %v5951_v61, %v5962_v3 }
 0x507   : > { %5129 = vpow2.f32 %v4027_v38 }
 0x511   : > { %v5130_v39 = vpop.eup %5129 }
 0x512   : > { %v1278_v40 = vadd.f32 1.0, %v5130_v39 }
 0x514   : > { %5131 = vrcp.f32 %v1278_v40 }
 0x51e   : > { %v5132_v41 = vpop.eup %5131 }
 0x51f   : > { %v1293_v48 = vsub.f32 1.0, %v5132_v41  ;;  %v1299_v50 = vmul.f32 %v5132_v41, %v1198_v23  ;;  %v6038_v23 = vpack.c.bf16 %v1612_v22, %v1611_v21 }
 0x577   : > { %v1284_v42 = vpop.permute.xlu1 %1283 }
 0x578   : > { %v1286_v43 = vmul.f32 %v5132_v41, %v1284_v42 }
 0x57a   : > { %1288 = vrot.lane.b32.xlu0 %v1286_v43, %s5531_s8 }
 0x5ec   : > { %v1289_v45 = vpop.permute.xlu0 %1288 }
 0x5ed   : > { %v1291_v46 = vadd.f32 %v1289_v45, %v995_v36 }
 0x5ef   : > { %5133 = vtanh.f32 %v1291_v46 }
 0x5f9   : > { %v5134_v47 = vpop.eup %5133 }
 0x5fa   : > { %1295 = vrot.lane.b32.xlu1 %v5134_v47, %s5533_s29 }
 0x66c   : > { %v1296_v49 = vpop.permute.xlu1 %1295 }
 0x66d   : > { %v1298_v51 = vmul.f32 %v1296_v49, %v1293_v48 }
 0x66f   : > { %v1300_v52 = vadd.f32 %v1299_v50, %v1298_v51 }
 0x671   : > { %1302 = vrot.lane.b32.xlu0 %v1300_v52, %s5533_s29 }
 0x6e3   : > { %v6001_v54 = vpop.permute.xlu0 %1302 }
 0x6e4   : > { %4358 = vmatmul.mubr.msk.f32.vlgmr.msra.gmra.mrb[6].mxu0 %vm1092_vm3, %v6001_v54 }
 0x6e5   : > { %4785 = vmatpush3.bf16.msra.mxu0 %v5919_v44  ;;  %4379 = vmatprep.mubr.msk.f32.mxu0 %vm5529_vm1, %v5530_v14 }
 0x6e6   : > { %4786 = vmatprep.subr.bf16.mxu0 %v5528_v13 }
 0x6e9   : > { %4788 = vmatpush3.bf16.msra.mxu0 %v5930_v53 }
 0x6ea   : > { %4801 = vmatprep.subr.bf16.mxu0 %v5528_v13 }
 0x7b7   : > { %v1372_v55 = vpop.f32.mrb[6].mxu0 }
 0x7b8   : > { %v1383_v56 = vadd.f32 %v1372_v55, %v5955_v63  ;;  %v4359_v57 = vpop.f32.mrb[7].mxu0  ;;  %v1376_v59 = vadd.f32 %v1372_v55, %v1000_v58 }
 0x7ba   : > { %1385 = vrot.lane.b32.xlu1 %v1383_v56, %s5531_s8  ;;  %v4029_v44 = vmul.f32 -1.442695, %v1376_v59 }
 0x7bc   : > { %5135 = vpow2.f32 %v4029_v44 }
 0x7c6   : > { %v5136_v60 = vpop.eup %5135 }
 0x7c7   : > { %v1380_v0 = vadd.f32 1.0, %v5136_v60 }
 0x7c9   : > { %5137 = vrcp.f32 %v1380_v0 }
 0x7d3   : > { %v5138_v1 = vpop.eup %5137 }
 0x7d4   : > { %v1395_v7 = vsub.f32 1.0, %v5138_v1  ;;  %v1401_v9 = vmul.f32 %v5138_v1, %v1300_v52 }
 0x82c   : > { %v1386_v2 = vpop.permute.xlu1 %1385 }
 0x82d   : > { %v1388_v53 = vmul.f32 %v5138_v1, %v1386_v2 }
 0x82f   : > { %1390 = vrot.lane.b32.xlu0 %v1388_v53, %s5531_s8 }
 0x8a1   : > { %v1391_v4 = vpop.permute.xlu0 %1390 }
 0x8a2   : > { %v1393_v5 = vadd.f32 %v1391_v4, %v1000_v58 }
 0x8a4   : > { %5139 = vtanh.f32 %v1393_v5 }
 0x8ae   : > { %v5140_v6 = vpop.eup %5139 }
 0x8af   : > { %1397 = vrot.lane.b32.xlu1 %v5140_v6, %s5533_s29 }
 0x8b3   : > { %1620 = vrot.lane.b32.xlu1 %v4034_v62, %s5532_s1 }
 0x921   : > { %v1398_v8 = vpop.permute.xlu1 %1397 }
 0x922   : > { %v1400_v10 = vmul.f32 %v1398_v8, %v1395_v7 }
 0x924   : > { %v6021_v11 = vadd.f32 %v1401_v9, %v1400_v10 }
 0x925   : > { %v6045_v27 = vpop.permute.xlu1 %1620 }
 0x926   : > { %1404 = vrot.lane.b32.xlu0 %v6021_v11, %s5533_s29  ;;  %v1623_v28 = vsel %vm1092_vm3, %v5982_v30, %v6045_v27 }
 0x998   : > { %v6027_v19 = vpop.permute.xlu0 %1404 }
 0x999   : > { %4369 = vmatmul.mubr.msk.f32.vlgmr.msra.gmra.mrb[4].mxu1 %vm1092_vm3, %v6027_v19 }
 0x99a   : > { %4791 = vmatpush3.bf16.msra.mxu1 %v6025_v16  ;;  %4398 = vmatprep.mubr.msk.f32.mxu1 %vm5529_vm1, %v5530_v14 }
 0x99b   : > { %4792 = vmatprep.subr.bf16.mxu1 %v5528_v13 }
 0x99e   : > { %4794 = vmatpush3.bf16.msra.mxu1 %v6032_v20 }
 0x99f   : > { %4795 = vmatprep.subr.bf16.mxu1 %v5528_v13 }
 0x9a2   : > { %4797 = vmatpush3.bf16.msra.mxu1 %v6038_v23 }
 0x9a3   : > { %4798 = vmatprep.subr.bf16.mxu1 %v5528_v13 }
 0x9a6   : > { %4800 = vmatpush3.bf16.msra.mxu1 %v6042_v26 }
 0x9a7   : > { %4813 = vmatprep.subr.bf16.mxu1 %v5528_v13 }
 0x9a9   : > { %4399 = vmatmul.mubr.msk.f32.vlgmr.msra.gmra.mrb[6].mxu1 %vm1630_vm4, %v1623_v28 }
 0x9aa   : > { %4815 = vmatpush3.bf16.msra.mxu1 %v6025_v16  ;;  %4436 = vmatprep.mubr.msk.f32.mxu1 %vm5529_vm1, %v5530_v14 }
 0x9ab   : > { %4816 = vmatprep.subr.bf16.mxu1 %v5528_v13 }
 0x9ae   : > { %4818 = vmatpush3.bf16.msra.mxu1 %v6032_v20 }
 0x9af   : > { %4819 = vmatprep.subr.bf16.mxu1 %v5528_v13 }
 0x9b2   : > { %4821 = vmatpush3.bf16.msra.mxu1 %v6038_v23 }
 0x9b3   : > { %4822 = vmatprep.subr.bf16.mxu1 %v5528_v13 }
 0x9b6   : > { %4824 = vmatpush3.bf16.msra.mxu1 %v6042_v26 }
 0x9b7   : > { %4837 = vmatprep.subr.bf16.mxu1 %v5528_v13 }
 0xa6c   : > { %v1474_v29 = vpop.f32.mrb[4].mxu1 }
 0xa6d   : > { %v1485_v30 = vadd.f32 %v1474_v29, %v5955_v63  ;;  %v4370_v32 = vpop.f32.mrb[5].mxu1  ;;  %v1478_v38 = vadd.f32 %v1474_v29, %v1005_v37 }
 0xa6f   : > { %1487 = vrot.lane.b32.xlu0 %v1485_v30, %s5531_s8  ;;  %v4031_v39 = vmul.f32 -1.442695, %v1478_v38 }
 0xa71   : > { %5141 = vpow2.f32 %v4031_v39 }
 0xa7b   : > { %v5142_v40 = vpop.eup %5141 }
 0xa7c   : > { %v1700_v34 = vpop.f32.mrb[6].mxu1  ;;  %v1482_v42 = vadd.f32 1.0, %v5142_v40 }
 0xa7d   : > { %v1701_v35 = vadd.f32 %v6068_v33, %v1700_v34  ;;  %v4400_v36 = vpop.f32.mrb[7].mxu1 }
 0xa7f   : > { %1711 = vrot.lane.b32.xlu0 %v1701_v35, %s5532_s1  ;;  %v4037_v41 = vmul.f32 -1.442695, %v1701_v35 }
 0xa81   : > { %5143 = vpow2.f32 %v4037_v41  ;;  %v6139_v41 = vadd.f32 %v5962_v3, %v5992_v31  ;;  %v4047_v31 = vld [vmem:[%s6657_s27 + $0x10] sm:$0xff] }
 0xa82   : > { %5145 = vrcp.f32 %v1482_v42 }
 0xa8b   : > { %v5144_v43 = vpop.eup %5143 }
 0xa8c   : > { %v5146_v45 = vpop.eup %5145  ;;  %v1707_v48 = vadd.f32 1.0, %v5144_v43 }
 0xa8d   : > { %v1497_v59 = vsub.f32 1.0, %v5146_v45  ;;  %v1503_v60 = vmul.f32 %v5146_v45, %v6021_v11 }
 0xa8e   : > { %5147 = vrcp.f32 %v1707_v48 }
 0xa98   : > { %v5148_v49 = vpop.eup %5147 }
 0xa99   : > { %v1721_v4 = vsub.f32 1.0, %v5148_v49  ;;  %v1727_v6 = vmul.f32 %v5148_v49, %v6045_v27 }
 0xae1   : > { %v1488_v46 = vpop.permute.xlu0 %1487 }
 0xae2   : > { %v1490_v47 = vmul.f32 %v5146_v45, %v1488_v46 }
 0xae4   : > { %1492 = vrot.lane.b32.xlu1 %v1490_v47, %s5531_s8 }
 0xaf1   : > { %v1712_v50 = vpop.permute.xlu0 %1711 }
 0xaf2   : > { %v1714_v51 = vmul.f32 %v5148_v49, %v1712_v50 }
 0xaf4   : > { %1716 = vrot.lane.b32.xlu0 %v1714_v51, %s5531_s8 }
 0xb56   : > { %v1493_v61 = vpop.permute.xlu1 %1492 }
 0xb57   : > { %v1495_v52 = vadd.f32 %v1493_v61, %v1005_v37 }
 0xb59   : > { %5149 = vtanh.f32 %v1495_v52 }
 0xb63   : > { %v5150_v55 = vpop.eup %5149 }
 0xb64   : > { %1499 = vrot.lane.b32.xlu1 %v5150_v55, %s5533_s29  ;;  %v2133_v55 = vld [vmem:[#allocation8 + $0x40] sm:$0xff] }
 0xb66   : > { %v1717_v56 = vpop.permute.xlu0 %1716 }
 0xb67   : > { %v1719_v57 = vadd.f32 %v1717_v56, %v1701_v35  ;;  %v2134_v56 = vld [vmem:[#allocation8 + $0x48] sm:$0xff] }
 0xb69   : > { %5151 = vtanh.f32 %v1719_v57 }
 0xb73   : > { %v5152_v58 = vpop.eup %5151 }
 0xb74   : > { %1723 = vrot.lane.b32.xlu0 %v5152_v58, %s5533_s29 }
 0xbd6   : > { %v1500_v44 = vpop.permute.xlu1 %1499 }
 0xbd7   : > { %v1502_v0 = vmul.f32 %v1500_v44, %v1497_v59  ;;  %v6154_v44 = vpack.c.bf16 %v2134_v56, %v2133_v55 }
 0xbd9   : > { %v6079_v1 = vadd.f32 %v1503_v60, %v1502_v0  ;;  %v2135_v60 = vld [vmem:[#allocation8 + $0x50] sm:$0xff]  ;;  %v2136_v0 = vld [vmem:[#allocation8 + $0x58] sm:$0xff] }
 0xbdb   : > { %1506 = vrot.lane.b32.xlu1 %v6079_v1, %s5533_s29 }
 0xbe6   : > { %v1724_v53 = vpop.permute.xlu0 %1723 }
 0xbe7   : > { %v1726_v5 = vmul.f32 %v1724_v53, %v1721_v4  ;;  %v6161_v4 = vpack.c.bf16 %v2136_v0, %v2135_v60 }
 0xbe9   : > { %v1728_v62 = vadd.f32 %v1727_v6, %v1726_v5  ;;  %v2137_v5 = vld [vmem:[#allocation8 + $0x60] sm:$0xff]  ;;  %v2138_v6 = vld [vmem:[#allocation8 + $0x68] sm:$0xff] }
 0xbeb   : > { %v1730_v7 = vsel %vm1092_vm3, %v6001_v54, %v1728_v62 }
 0xc4d   : > { %v6083_v2 = vpop.permute.xlu1 %1506 }
 0xc4e   : > { %4380 = vmatmul.mubr.msk.f32.vlgmr.msra.gmra.mrb[8].mxu0 %vm1092_vm3, %v6083_v2 }
 0xc4f   : > { %4803 = vmatpush3.bf16.msra.mxu0 %v6025_v16  ;;  %4417 = vmatprep.mubr.msk.f32.mxu0 %vm5529_vm1, %v5530_v14 }
 0xc50   : > { %4804 = vmatprep.subr.bf16.mxu0 %v5528_v13 }
 0xc53   : > { %4806 = vmatpush3.bf16.msra.mxu0 %v6032_v20 }
 0xc54   : > { %4807 = vmatprep.subr.bf16.mxu0 %v5528_v13 }
 0xc57   : > { %4809 = vmatpush3.bf16.msra.mxu0 %v6038_v23 }
 0xc58   : > { %4810 = vmatprep.subr.bf16.mxu0 %v5528_v13 }
 0xc5b   : > { %4812 = vmatpush3.bf16.msra.mxu0 %v6042_v26 }
 0xc5c   : > { %4825 = vmatprep.subr.bf16.mxu0 %v5528_v13 }
 0xc5e   : > { %4418 = vmatmul.mubr.msk.f32.vlgmr.msra.gmra.mrb[10].mxu0 %vm1630_vm4, %v1730_v7  ;;  %v2140_v7 = vld [vmem:[#allocation8 + $0x78] sm:$0xff] }
 0xc5f   : > { %4827 = vmatpush3.bf16.msra.mxu0 %v6025_v16  ;;  %4455 = vmatprep.mubr.msk.f32.mxu0 %vm5529_vm1, %v5530_v14 }
 0xc60   : > { %4828 = vmatprep.subr.bf16.mxu0 %v5528_v13 }
 0xc63   : > { %4830 = vmatpush3.bf16.msra.mxu0 %v6032_v20 }
 0xc64   : > { %4831 = vmatprep.subr.bf16.mxu0 %v5528_v13 }
 0xc67   : > { %4833 = vmatpush3.bf16.msra.mxu0 %v6038_v23 }
 0xc68   : > { %4834 = vmatprep.subr.bf16.mxu0 %v5528_v13 }
 0xc6b   : > { %4836 = vmatpush3.bf16.msra.mxu0 %v6042_v26 }
 0xc6c   : > { %4849 = vmatprep.subr.bf16.mxu0 %v5528_v13 }
 0xd21   : > { %v1576_v54 = vpop.f32.mrb[8].mxu0 }
 0xd22   : > { %v4381_v8 = vpop.f32.mrb[9].mxu0  ;;  %v1580_v42 = vadd.f32 %v1576_v54, %v6139_v41 }
 0xd24   : > { %v4033_v43 = vmul.f32 -1.442695, %v1580_v42 }
 0xd31   : > { %v1800_v9 = vpop.f32.mrb[10].mxu0 }
 0xd32   : > { %v1801_v10 = vadd.f32 %v6068_v33, %v1800_v9  ;;  %v4419_v11 = vpop.f32.mrb[11].mxu0 }
 0xd34   : > { %1811 = vrot.lane.b32.xlu1 %v1801_v10, %s5532_s1  ;;  %v4039_v12 = vmul.f32 -1.442695, %v1801_v10 }
 0xd36   : > { %5153 = vpow2.f32 %v4039_v12 }
 0xd40   : > { %v5154_v15 = vpop.eup %5153 }
 0xd41   : > { %v1807_v17 = vadd.f32 1.0, %v5154_v15 }
 0xd43   : > { %5155 = vrcp.f32 %v1807_v17 }
 0xd4d   : > { %v5156_v18 = vpop.eup %5155 }
 0xd4e   : > { %v1821_v28 = vsub.f32 1.0, %v5156_v18  ;;  %v1827_v30 = vmul.f32 %v5156_v18, %v1728_v62 }
 0xda6   : > { %v1812_v21 = vpop.permute.xlu1 %1811 }
 0xda7   : > { %v1814_v22 = vmul.f32 %v5156_v18, %v1812_v21  ;;  %v6197_v18 = vld [vmem:[%s6607_s15 + $0x1] ss:$0 sm:$0xff] }
 0xda9   : > { %1816 = vrot.lane.b32.xlu0 %v1814_v22, %s5531_s8 }
 0xe1b   : > { %v1817_v24 = vpop.permute.xlu0 %1816 }
 0xe1c   : > { %v1819_v25 = vadd.f32 %v1817_v24, %v1801_v10 }
 0xe1e   : > { %5157 = vtanh.f32 %v1819_v25 }
 0xe28   : > { %v5158_v27 = vpop.eup %5157 }
 0xe29   : > { %1823 = vrot.lane.b32.xlu1 %v5158_v27, %s5533_s29 }
 0xe9b   : > { %v1824_v29 = vpop.permute.xlu1 %1823 }
 0xe9c   : > { %v1826_v32 = vmul.f32 %v1824_v29, %v1821_v28 }
 0xe9e   : > { %v6115_v34 = vadd.f32 %v1827_v30, %v1826_v32 }
 0xea0   : > { %v1830_v35 = vsel %vm1092_vm3, %v6027_v19, %v6115_v34 }
 0xea1   : > { %4437 = vmatmul.mubr.msk.f32.vlgmr.msra.gmra.mrb[8].mxu1 %vm1630_vm4, %v1830_v35 }
 0xea2   : > { %4839 = vmatpush3.bf16.msra.mxu1 %v6025_v16  ;;  %4474 = vmatprep.mubr.msk.f32.mxu1 %vm5529_vm1, %v5530_v14 }
 0xea3   : > { %4840 = vmatprep.subr.bf16.mxu1 %v5528_v13 }
 0xea6   : > { %4842 = vmatpush3.bf16.msra.mxu1 %v6032_v20 }
 0xea7   : > { %4843 = vmatprep.subr.bf16.mxu1 %v5528_v13 }
 0xeaa   : > { %4845 = vmatpush3.bf16.msra.mxu1 %v6038_v23 }
 0xeab   : > { %4846 = vmatprep.subr.bf16.mxu1 %v5528_v13 }
 0xeae   : > { %4848 = vmatpush3.bf16.msra.mxu1 %v6042_v26  ;;  %v1587_v26 = vadd.f32 %v1576_v54, %v5955_v63 }
 0xeaf   : > { %4861 = vmatprep.subr.bf16.mxu1 %v5528_v13 }
 0xf74   : > { %v1900_v19 = vpop.f32.mrb[8].mxu1 }
 0xf75   : > { %v1901_v16 = vadd.f32 %v6068_v33, %v1900_v19  ;;  %v4438_v36 = vpop.f32.mrb[9].mxu1 }
 0xf77   : > { %1911 = vrot.lane.b32.xlu0 %v1901_v16, %s5532_s1  ;;  %v4041_v37 = vmul.f32 -1.442695, %v1901_v16 }
 0xf79   : > { %5159 = vpow2.f32 %v4041_v37 }
 0xf83   : > { %v5160_v38 = vpop.eup %5159 }
 0xf84   : > { %v1907_v20 = vadd.f32 1.0, %v5160_v38 }
 0xf86   : > { %5161 = vrcp.f32 %v1907_v20 }
 0xf87   : > { %5163 = vpow2.f32 %v4033_v43 }
 0xf90   : > { %v5162_v39 = vpop.eup %5161 }
 0xf91   : > { %v5164_v45 = vpop.eup %5163  ;;  %v1921_v61 = vsub.f32 1.0, %v5162_v39  ;;  %v1927_v57 = vmul.f32 %v5162_v39, %v6115_v34 }
 0xf92   : > { %v1584_v46 = vadd.f32 1.0, %v5164_v45 }
 0xf94   : > { %5165 = vrcp.f32 %v1584_v46 }
 0xf9e   : > { %v6142_v50 = vpop.eup %5165 }
 0xfe9   : > { %v1912_v40 = vpop.permute.xlu0 %1911 }
 0xfea   : > { %v1914_v23 = vmul.f32 %v5162_v39, %v1912_v40  ;;  %v1599_v39 = vsub.f32 1.0, %v6142_v50 }
 0xfec   : > { %1916 = vrot.lane.b32.xlu1 %v1914_v23, %s5531_s8  ;;  %v1605_v23 = vmul.f32 %v6142_v50, %v6079_v1 }
 0xff0   : > { %2146 = vrot.lane.b32.xlu1 %v1728_v62, %s5533_s29  ;;  %v6167_v62 = vpack.c.bf16 %v2138_v6, %v2137_v5 }
 0xff4   : > { %1589 = vrot.lane.b32.xlu1 %v1587_v26, %s5531_s8 }
0x105e   : > { %v1917_v47 = vpop.permute.xlu1 %1916 }
0x105f   : > { %v1919_v48 = vadd.f32 %v1917_v47, %v1901_v16 }
0x1061   : > { %5167 = vtanh.f32 %v1919_v48 }
0x1062   : > { %v2147_v49 = vpop.permute.xlu1 %2146 }
0x1066   : > { %v1590_v63 = vpop.permute.xlu1 %1589 }
0x1067   : > { %v1592_v51 = vmul.f32 %v6142_v50, %v1590_v63 }
0x1069   : > { %1594 = vrot.lane.b32.xlu1 %v1592_v51, %s5531_s8 }
0x106b   : > { %v5168_v3 = vpop.eup %5167 }
0x106c   : > { %1923 = vrot.lane.b32.xlu0 %v5168_v3, %s5533_s29 }
0x1070   : > { %2150 = vrot.lane.b32.xlu0 %v4047_v31, %s5532_s1 }
0x10db   : > { %v1595_v15 = vpop.permute.xlu1 %1594 }
0x10dc   : > { %v1597_v17 = vadd.f32 %v1595_v15, %v6139_v41 }
0x10de   : > { %v1924_v52 = vpop.permute.xlu0 %1923  ;;  %5169 = vtanh.f32 %v1597_v17 }
0x10df   : > { %v1926_v58 = vmul.f32 %v1924_v52, %v1921_v61 }
0x10e1   : > { %v6152_v59 = vadd.f32 %v1927_v57, %v1926_v58 }
0x10e2   : > { %v6174_v8 = vpop.permute.xlu0 %2150 }
0x10e3   : > { %v1930_v53 = vsel %vm1092_vm3, %v6083_v2, %v6152_v59  ;;  %v2139_v2 = vld [vmem:[#allocation8 + $0x70] sm:$0xff]  ;;  %v2153_v9 = vsel %vm1092_vm3, %v2147_v49, %v6174_v8 }
0x10e4   : > { %4456 = vmatmul.mubr.msk.f32.vlgmr.msra.gmra.mrb[12].mxu0 %vm1630_vm4, %v1930_v53  ;;  %v6171_v54 = vpack.c.bf16 %v2140_v7, %v2139_v2 }
0x10e5   : > { %4851 = vmatpush3.bf16.msra.mxu0 %v6154_v44  ;;  %4493 = vmatprep.mubr.msk.f32.mxu0 %vm5529_vm1, %v5530_v14 }
0x10e6   : > { %4852 = vmatprep.subr.bf16.mxu0 %v5528_v13 }
0x10e8   : > { %v5170_v25 = vpop.eup %5169 }
0x10e9   : > { %4854 = vmatpush3.bf16.msra.mxu0 %v6161_v4 }
0x10ea   : > { %4855 = vmatprep.subr.bf16.mxu0 %v5528_v13 }
0x10ed   : > { %4857 = vmatpush3.bf16.msra.mxu0 %v6167_v62 }
0x10ee   : > { %4858 = vmatprep.subr.bf16.mxu0 %v5528_v13 }
0x10f1   : > { %4860 = vmatpush3.bf16.msra.mxu0 %v6171_v54 }
0x10f2   : > { %4873 = vmatprep.subr.bf16.mxu0 %v5528_v13 }
0x10f4   : > { %4494 = vmatmul.mubr.msk.f32.vlgmr.msra.gmra.mrb[14].mxu0 %vm1630_vm4, %v2153_v9 }
0x10f5   : > { %4875 = vmatpush3.bf16.msra.mxu0 %v6154_v44  ;;  %4531 = vmatprep.mubr.msk.f32.mxu0 %vm5529_vm1, %v5530_v14 }
0x10f6   : > { %4876 = vmatprep.subr.bf16.mxu0 %v5528_v13 }
0x10f9   : > { %4878 = vmatpush3.bf16.msra.mxu0 %v6161_v4 }
0x10fa   : > { %4879 = vmatprep.subr.bf16.mxu0 %v5528_v13 }
0x10fd   : > { %4881 = vmatpush3.bf16.msra.mxu0 %v6167_v62 }
0x10fe   : > { %4882 = vmatprep.subr.bf16.mxu0 %v5528_v13 }
0x1101   : > { %4884 = vmatpush3.bf16.msra.mxu0 %v6171_v54 }
0x1102   : > { %4897 = vmatprep.subr.bf16.mxu0 %v5528_v13 }
0x11b7   : > { %v2000_v10 = vpop.f32.mrb[12].mxu0 }
0x11b8   : > { %v2001_v11 = vadd.f32 %v6068_v33, %v2000_v10  ;;  %v4457_v12 = vpop.f32.mrb[13].mxu0 }
0x11ba   : > { %2011 = vrot.lane.b32.xlu0 %v2001_v11, %s5532_s1  ;;  %v4043_v27 = vmul.f32 -1.442695, %v2001_v11 }
0x11bc   : > { %5171 = vpow2.f32 %v4043_v27 }
0x11c6   : > { %v5172_v28 = vpop.eup %5171 }
0x11c7   : > { %v2229_v21 = vpop.f32.mrb[14].mxu0  ;;  %v2007_v30 = vadd.f32 1.0, %v5172_v28 }
0x11c8   : > { %v2230_v22 = vadd.f32 %v6197_v18, %v2229_v21  ;;  %v4495_v24 = vpop.f32.mrb[15].mxu0 }
0x11ca   : > { %2240 = vrot.lane.b32.xlu0 %v2230_v22, %s5532_s1  ;;  %v4050_v29 = vmul.f32 -1.442695, %v2230_v22 }
0x11cc   : > { %5173 = vpow2.f32 %v4050_v29 }
0x11cd   : > { %5175 = vrcp.f32 %v2007_v30 }
0x11ce   : > { %1601 = vrot.lane.b32.xlu0 %v5170_v25, %s5533_s29 }
0x11d6   : > { %v5174_v32 = vpop.eup %5173 }
0x11d7   : > { %v5176_v35 = vpop.eup %5175  ;;  %v2236_v36 = vadd.f32 1.0, %v5174_v32 }
0x11d8   : > { %v2021_v1 = vsub.f32 1.0, %v5176_v35  ;;  %v2027_v50 = vmul.f32 %v5176_v35, %v6152_v59 }
0x11d9   : > { %5177 = vrcp.f32 %v2236_v36 }
0x11e3   : > { %v5178_v37 = vpop.eup %5177 }
0x11e4   : > { %v2250_v31 = vsub.f32 1.0, %v5178_v37  ;;  %v2256_v52 = vmul.f32 %v5178_v37, %v6174_v8 }
0x122c   : > { %v2012_v19 = vpop.permute.xlu0 %2011 }
0x122d   : > { %v2014_v16 = vmul.f32 %v5176_v35, %v2012_v19 }
0x122f   : > { %2016 = vrot.lane.b32.xlu1 %v2014_v16, %s5531_s8 }
0x123c   : > { %v2241_v38 = vpop.permute.xlu0 %2240 }
0x123d   : > { %v2243_v20 = vmul.f32 %v5178_v37, %v2241_v38 }
0x123f   : > { %2245 = vrot.lane.b32.xlu1 %v2243_v20, %s5531_s8 }
0x1240   : > { %v1602_v40 = vpop.permute.xlu0 %1601 }
0x1241   : > { %v1604_v26 = vmul.f32 %v1602_v40, %v1599_v39 }
0x1243   : > { %v6207_v41 = vadd.f32 %v1605_v23, %v1604_v26 }
0x1245   : > { %2030 = vrot.lane.b32.xlu1 %v6207_v41, %s5533_s29 }
0x1249   : > { %2259 = vrot.lane.b32.xlu1 %v6115_v34, %s5533_s29 }
0x12a1   : > { %v2017_v42 = vpop.permute.xlu1 %2016 }
0x12a2   : > { %v2019_v43 = vadd.f32 %v2017_v42, %v2001_v11 }
0x12a4   : > { %5179 = vtanh.f32 %v2019_v43  ;;  %v2671_v43 = vld [vmem:[#allocation8 + $0x80] sm:$0xff] }
0x12ae   : > { %v5180_v45 = vpop.eup %5179 }
0x12af   : > { %2023 = vrot.lane.b32.xlu0 %v5180_v45, %s5533_s29  ;;  %v2672_v45 = vld [vmem:[#allocation8 + $0x88] sm:$0xff] }
0x12b1   : > { %v2246_v46 = vpop.permute.xlu1 %2245 }
0x12b2   : > { %v2248_v47 = vadd.f32 %v2246_v46, %v2230_v22 }
0x12b4   : > { %5181 = vtanh.f32 %v2248_v47 }
0x12b7   : > { %v6218_v34 = vpop.permute.xlu1 %2030 }
0x12bb   : > { %v2260_v57 = vpop.permute.xlu1 %2259 }
0x12be   : > { %v5182_v48 = vpop.eup %5181 }
0x12bf   : > { %2252 = vrot.lane.b32.xlu0 %v5182_v48, %s5533_s29 }
0x1321   : > { %v2024_v49 = vpop.permute.xlu0 %2023 }
0x1322   : > { %v2026_v63 = vmul.f32 %v2024_v49, %v2021_v1  ;;  %v6289_v1 = vpack.c.bf16 %v2672_v45, %v2671_v43 }
0x1324   : > { %v6216_v51 = vadd.f32 %v2027_v50, %v2026_v63  ;;  %v2673_v50 = vld [vmem:[#allocation8 + $0x90] sm:$0xff]  ;;  %v2674_v63 = vld [vmem:[#allocation8 + $0x98] sm:$0xff] }
0x1326   : > { %v2033_v3 = vsel %vm1092_vm3, %v6218_v34, %v6216_v51 }
0x1327   : > { %4475 = vmatmul.mubr.msk.f32.vlgmr.msra.gmra.mrb[10].mxu1 %vm1630_vm4, %v2033_v3 }
0x1328   : > { %4863 = vmatpush3.bf16.msra.mxu1 %v6154_v44  ;;  %4512 = vmatprep.mubr.msk.f32.mxu1 %vm5529_vm1, %v5530_v14 }
0x1329   : > { %4864 = vmatprep.subr.bf16.mxu1 %v5528_v13 }
0x132c   : > { %4866 = vmatpush3.bf16.msra.mxu1 %v6161_v4 }
0x132d   : > { %4867 = vmatprep.subr.bf16.mxu1 %v5528_v13 }
0x1330   : > { %4869 = vmatpush3.bf16.msra.mxu1 %v6167_v62 }
0x1331   : > { %v2253_v61 = vpop.permute.xlu0 %2252  ;;  %4870 = vmatprep.subr.bf16.mxu1 %v5528_v13 }
0x1332   : > { %v2255_v55 = vmul.f32 %v2253_v61, %v2250_v31  ;;  %v6295_v31 = vpack.c.bf16 %v2674_v63, %v2673_v50 }
0x1334   : > { %v6233_v56 = vadd.f32 %v2256_v52, %v2255_v55  ;;  %4872 = vmatpush3.bf16.msra.mxu1 %v6171_v54  ;;  %v2675_v55 = vld [vmem:[#allocation8 + $0xa0] sm:$0xff] }
0x1335   : > { %4885 = vmatprep.subr.bf16.mxu1 %v5528_v13 }
0x1336   : > { %v2262_v58 = vsel %vm1092_vm3, %v2260_v57, %v6233_v56 }
0x1337   : > { %4513 = vmatmul.mubr.msk.f32.vlgmr.msra.gmra.mrb[12].mxu1 %vm1630_vm4, %v2262_v58 }
0x1338   : > { %4887 = vmatpush3.bf16.msra.mxu1 %v6154_v44  ;;  %4550 = vmatprep.mubr.msk.f32.mxu1 %vm5529_vm1, %v5530_v14 }
0x1339   : > { %4888 = vmatprep.subr.bf16.mxu1 %v5528_v13 }
0x133c   : > { %4890 = vmatpush3.bf16.msra.mxu1 %v6161_v4 }
0x133d   : > { %4891 = vmatprep.subr.bf16.mxu1 %v5528_v13 }
0x1340   : > { %4893 = vmatpush3.bf16.msra.mxu1 %v6167_v62 }
0x1341   : > { %4894 = vmatprep.subr.bf16.mxu1 %v5528_v13 }
0x1344   : > { %4896 = vmatpush3.bf16.msra.mxu1 %v6171_v54 }
0x1345   : > { %4909 = vmatprep.subr.bf16.mxu1 %v5528_v13 }
0x13fa   : > { %v2103_v60 = vpop.f32.mrb[10].mxu1 }
0x13fb   : > { %v4476_v0 = vpop.f32.mrb[11].mxu1  ;;  %v2104_v20 = vadd.f32 %v6068_v33, %v2103_v60  ;;  %v2677_v60 = vld [vmem:[#allocation8 + $0xb0] sm:$0xff] }
0x13fc   : > { %v2678_v0 = vld [vmem:[#allocation8 + $0xb8] sm:$0xff] }
0x13fd   : > { %v4045_v39 = vmul.f32 -1.442695, %v2104_v20 }
0x140a   : > { %v2332_v53 = vpop.f32.mrb[12].mxu1 }
0x140b   : > { %v2333_v5 = vadd.f32 %v6197_v18, %v2332_v53  ;;  %v4514_v6 = vpop.f32.mrb[13].mxu1  ;;  %v6309_v53 = vpack.c.bf16 %v2678_v0, %v2677_v60 }
0x140d   : > { %2343 = vrot.lane.b32.xlu0 %v2333_v5, %s5532_s1  ;;  %v4052_v2 = vmul.f32 -1.442695, %v2333_v5 }
0x140f   : > { %5183 = vpow2.f32 %v4052_v2 }
0x1419   : > { %v5184_v7 = vpop.eup %5183 }
0x141a   : > { %v2339_v8 = vadd.f32 1.0, %v5184_v7 }
0x141c   : > { %5185 = vrcp.f32 %v2339_v8 }
0x1426   : > { %v5186_v9 = vpop.eup %5185 }
0x1427   : > { %v2353_v21 = vsub.f32 1.0, %v5186_v9  ;;  %v2359_v24 = vmul.f32 %v5186_v9, %v6233_v56 }
0x147f   : > { %v2344_v10 = vpop.permute.xlu0 %2343 }
0x1480   : > { %v2346_v11 = vmul.f32 %v5186_v9, %v2344_v10 }
0x1482   : > { %2348 = vrot.lane.b32.xlu1 %v2346_v11, %s5531_s8  ;;  %v6334_v11 = vld [vmem:[%s6607_s15 + $0x2] ss:$0 sm:$0xff] }
0x1486   : > { %2362 = vrot.lane.b32.xlu1 %v6152_v59, %s5533_s29 }
0x14f4   : > { %v2349_v12 = vpop.permute.xlu1 %2348 }
0x14f5   : > { %v2351_v15 = vadd.f32 %v2349_v12, %v2333_v5 }
0x14f7   : > { %5187 = vtanh.f32 %v2351_v15 }
0x14f8   : > { %v2363_v28 = vpop.permute.xlu1 %2362 }
0x1501   : > { %v5188_v17 = vpop.eup %5187 }
0x1502   : > { %2355 = vrot.lane.b32.xlu0 %v5188_v17, %s5533_s29 }
0x1574   : > { %v2356_v22 = vpop.permute.xlu0 %2355 }
0x1575   : > { %v2358_v25 = vmul.f32 %v2356_v22, %v2353_v21 }
0x1577   : > { %v6257_v27 = vadd.f32 %v2359_v24, %v2358_v25 }
0x1579   : > { %v2365_v29 = vsel %vm1092_vm3, %v2363_v28, %v6257_v27 }
0x157a   : > { %4532 = vmatmul.mubr.msk.f32.vlgmr.msra.gmra.mrb[16].mxu0 %vm1630_vm4, %v2365_v29 }
0x157b   : > { %4899 = vmatpush3.bf16.msra.mxu0 %v6154_v44  ;;  %4569 = vmatprep.mubr.msk.f32.mxu0 %vm5529_vm1, %v5530_v14 }
0x157c   : > { %4900 = vmatprep.subr.bf16.mxu0 %v5528_v13 }
0x157f   : > { %4902 = vmatpush3.bf16.msra.mxu0 %v6161_v4 }
0x1580   : > { %4903 = vmatprep.subr.bf16.mxu0 %v5528_v13 }
0x1583   : > { %4905 = vmatpush3.bf16.msra.mxu0 %v6167_v62 }
0x1584   : > { %4906 = vmatprep.subr.bf16.mxu0 %v5528_v13 }
0x1587   : > { %4908 = vmatpush3.bf16.msra.mxu0 %v6171_v54  ;;  %v4060_v54 = vld [vmem:[%s6657_s27 + $0x18] sm:$0xff] }
0x1588   : > { %4921 = vmatprep.subr.bf16.mxu0 %v5528_v13 }
0x164d   : > { %v2435_v59 = vpop.f32.mrb[16].mxu0 }
0x164e   : > { %v2436_v44 = vadd.f32 %v6197_v18, %v2435_v59  ;;  %v4533_v30 = vpop.f32.mrb[17].mxu0 }
0x1650   : > { %2446 = vrot.lane.b32.xlu0 %v2436_v44, %s5532_s1  ;;  %v4054_v32 = vmul.f32 -1.442695, %v2436_v44 }
0x1652   : > { %5189 = vpow2.f32 %v4054_v32 }
0x165c   : > { %v5190_v35 = vpop.eup %5189 }
0x165d   : > { %v2442_v4 = vadd.f32 1.0, %v5190_v35 }
0x165f   : > { %5191 = vrcp.f32 %v2442_v4 }
0x1669   : > { %v5192_v19 = vpop.eup %5191 }
0x166a   : > { %v2456_v26 = vsub.f32 1.0, %v5192_v19  ;;  %v2462_v46 = vmul.f32 %v5192_v19, %v6257_v27 }
0x16c2   : > { %v2447_v16 = vpop.permute.xlu0 %2446 }
0x16c3   : > { %v2449_v62 = vmul.f32 %v5192_v19, %v2447_v16 }
0x16c5   : > { %2451 = vrot.lane.b32.xlu1 %v2449_v62, %s5531_s8 }
0x16c9   : > { %2465 = vrot.lane.b32.xlu1 %v6216_v51, %s5533_s29 }
0x16cd   : > { %2688 = vrot.lane.b32.xlu1 %v4060_v54, %s5532_s1 }
0x1737   : > { %v2452_v36 = vpop.permute.xlu1 %2451 }
0x1738   : > { %v2454_v37 = vadd.f32 %v2452_v36, %v2436_v44 }
0x173a   : > { %5193 = vtanh.f32 %v2454_v37 }
0x173b   : > { %5195 = vpow2.f32 %v4045_v39  ;;  %v2466_v49 = vpop.permute.xlu1 %2465 }
0x173f   : > { %v6312_v5 = vpop.permute.xlu1 %2688 }
0x1744   : > { %v5194_v38 = vpop.eup %5193 }
0x1745   : > { %2458 = vrot.lane.b32.xlu0 %v5194_v38, %s5533_s29  ;;  %v5196_v40 = vpop.eup %5195 }
0x1746   : > { %v2110_v23 = vadd.f32 1.0, %v5196_v40 }
0x1748   : > { %5197 = vrcp.f32 %v2110_v23 }
0x1749   : > { %2684 = vrot.lane.b32.xlu0 %v6233_v56, %s5533_s29  ;;  %v2676_v56 = vld [vmem:[#allocation8 + $0xa8] sm:$0xff] }
0x174a   : > { %v6305_v58 = vpack.c.bf16 %v2676_v56, %v2675_v55 }
0x174d   : > { %2114 = vrot.lane.b32.xlu0 %v2104_v20, %s5532_s1 }
0x1752   : > { %v6299_v61 = vpop.eup %5197 }
0x1753   : > { %v2124_v16 = vsub.f32 1.0, %v6299_v61  ;;  %v2130_v54 = vmul.f32 %v6299_v61, %v6216_v51 }
0x17b7   : > { %v2459_v42 = vpop.permute.xlu0 %2458 }
0x17b8   : > { %v2461_v47 = vmul.f32 %v2459_v42, %v2456_v26 }
0x17ba   : > { %v6287_v48 = vadd.f32 %v2462_v46, %v2461_v47 }
0x17bb   : > { %v2685_v33 = vpop.permute.xlu0 %2684 }
0x17bc   : > { %v2468_v3 = vsel %vm1092_vm3, %v2466_v49, %v6287_v48  ;;  %v2691_v6 = vsel %vm1092_vm3, %v2685_v33, %v6312_v5 }
0x17bd   : > { %4551 = vmatmul.mubr.msk.f32.vlgmr.msra.gmra.mrb[14].mxu1 %vm1630_vm4, %v2468_v3 }
0x17be   : > { %4911 = vmatpush3.bf16.msra.mxu1 %v6289_v1  ;;  %4588 = vmatprep.mubr.msk.f32.mxu1 %vm5529_vm1, %v5530_v14 }
0x17bf   : > { %v2115_v52 = vpop.permute.xlu0 %2114  ;;  %4912 = vmatprep.subr.bf16.mxu1 %v5528_v13 }
0x17c0   : > { %v2117_v57 = vmul.f32 %v6299_v61, %v2115_v52 }
0x17c2   : > { %4914 = vmatpush3.bf16.msra.mxu1 %v6295_v31  ;;  %2119 = vrot.lane.b32.xlu0 %v2117_v57, %s5531_s8 }
0x17c3   : > { %4915 = vmatprep.subr.bf16.mxu1 %v5528_v13 }
0x17c6   : > { %4917 = vmatpush3.bf16.msra.mxu1 %v6305_v58 }
0x17c7   : > { %4918 = vmatprep.subr.bf16.mxu1 %v5528_v13 }
0x17ca   : > { %4920 = vmatpush3.bf16.msra.mxu1 %v6309_v53 }
0x17cb   : > { %4933 = vmatprep.subr.bf16.mxu1 %v5528_v13 }
0x17cd   : > { %4589 = vmatmul.mubr.msk.f32.vlgmr.msra.gmra.mrb[16].mxu1 %vm1630_vm4, %v2691_v6 }
0x17ce   : > { %4935 = vmatpush3.bf16.msra.mxu1 %v6289_v1  ;;  %4626 = vmatprep.mubr.msk.f32.mxu1 %vm5529_vm1, %v5530_v14 }
0x17cf   : > { %4936 = vmatprep.subr.bf16.mxu1 %v5528_v13 }
0x17d2   : > { %4938 = vmatpush3.bf16.msra.mxu1 %v6295_v31 }
0x17d3   : > { %4939 = vmatprep.subr.bf16.mxu1 %v5528_v13 }
0x17d6   : > { %4941 = vmatpush3.bf16.msra.mxu1 %v6305_v58 }
0x17d7   : > { %4942 = vmatprep.subr.bf16.mxu1 %v5528_v13 }
0x17da   : > { %4944 = vmatpush3.bf16.msra.mxu1 %v6309_v53 }
0x17db   : > { %4957 = vmatprep.subr.bf16.mxu1 %v5528_v13 }
0x1834   : > { %v2120_v9 = vpop.permute.xlu0 %2119 }
0x1835   : > { %v2122_v10 = vadd.f32 %v2120_v9, %v2104_v20 }
0x1837   : > { %5199 = vtanh.f32 %v2122_v10 }
0x1841   : > { %v5200_v21 = vpop.eup %5199 }
0x1890   : > { %v2538_v2 = vpop.f32.mrb[14].mxu1 }
0x1891   : > { %v2539_v7 = vadd.f32 %v6197_v18, %v2538_v2  ;;  %v4552_v8 = vpop.f32.mrb[15].mxu1 }
0x1893   : > { %2549 = vrot.lane.b32.xlu1 %v2539_v7, %s5532_s1  ;;  %v4056_v22 = vmul.f32 -1.442695, %v2539_v7 }
0x1895   : > { %5201 = vpow2.f32 %v4056_v22 }
0x189f   : > { %v5202_v24 = vpop.eup %5201 }
0x18a0   : > { %v2767_v12 = vpop.f32.mrb[16].mxu1  ;;  %v2545_v28 = vadd.f32 1.0, %v5202_v24 }
0x18a1   : > { %v2768_v15 = vadd.f32 %v6334_v11, %v2767_v12  ;;  %v4590_v17 = vpop.f32.mrb[17].mxu1 }
0x18a3   : > { %2778 = vrot.lane.b32.xlu1 %v2768_v15, %s5532_s1  ;;  %v4063_v25 = vmul.f32 -1.442695, %v2768_v15 }
0x18a5   : > { %5203 = vpow2.f32 %v4063_v25 }
0x18a6   : > { %5205 = vrcp.f32 %v2545_v28 }
0x18a7   : > { %2126 = vrot.lane.b32.xlu1 %v5200_v21, %s5533_s29 }
0x18af   : > { %v5204_v29 = vpop.eup %5203 }
0x18b0   : > { %v5206_v59 = vpop.eup %5205  ;;  %v2774_v32 = vadd.f32 1.0, %v5204_v29 }
0x18b1   : > { %v2559_v51 = vsub.f32 1.0, %v5206_v59  ;;  %v2565_v43 = vmul.f32 %v5206_v59, %v6287_v48 }
0x18b2   : > { %5207 = vrcp.f32 %v2774_v32 }
0x18bc   : > { %v5208_v35 = vpop.eup %5207 }
0x18bd   : > { %v2788_v49 = vsub.f32 1.0, %v5208_v35  ;;  %v2794_v50 = vmul.f32 %v5208_v35, %v6312_v5 }
0x1905   : > { %v2550_v44 = vpop.permute.xlu1 %2549 }
0x1906   : > { %v2552_v30 = vmul.f32 %v5206_v59, %v2550_v44 }
0x1908   : > { %2554 = vrot.lane.b32.xlu0 %v2552_v30, %s5531_s8 }
0x1915   : > { %v2779_v4 = vpop.permute.xlu1 %2778 }
0x1916   : > { %v2781_v19 = vmul.f32 %v5208_v35, %v2779_v4 }
0x1918   : > { %2783 = vrot.lane.b32.xlu0 %v2781_v19, %s5531_s8 }
0x1919   : > { %v2127_v62 = vpop.permute.xlu1 %2126 }
0x191a   : > { %v2129_v36 = vmul.f32 %v2127_v62, %v2124_v16  ;;  %v4072_v62 = vld [vmem:[#allocation12] ss:$0 sm:$0xff] }
0x191c   : > { %v6344_v37 = vadd.f32 %v2130_v54, %v2129_v36 }
0x191e   : > { %2568 = vrot.lane.b32.xlu0 %v6344_v37, %s5533_s29 }
0x1922   : > { %2797 = vrot.lane.b32.xlu0 %v6257_v27, %s5533_s29 }
0x197a   : > { %v2555_v38 = vpop.permute.xlu0 %2554 }
0x197b   : > { %v2557_v20 = vadd.f32 %v2555_v38, %v2539_v7  ;;  %v3236_v38 = vld [vmem:[%s6609_s17] sm:$0xff] }
0x197d   : > { %5209 = vtanh.f32 %v2557_v20  ;;  %v3237_v20 = vld [vmem:[%s6609_s17 + $0x8] sm:$0xff] }
0x1987   : > { %v5210_v39 = vpop.eup %5209 }
0x1988   : > { %2561 = vrot.lane.b32.xlu1 %v5210_v39, %s5533_s29 }
0x198a   : > { %v2784_v40 = vpop.permute.xlu0 %2783 }
0x198b   : > { %v2786_v23 = vadd.f32 %v2784_v40, %v2768_v15 }
0x198d   : > { %5211 = vtanh.f32 %v2786_v23 }
0x1990   : > { %v2569_v27 = vpop.permute.xlu0 %2568 }
0x1994   : > { %v2798_v61 = vpop.permute.xlu0 %2797 }
0x1997   : > { %v5212_v26 = vpop.eup %5211 }
0x1998   : > { %2790 = vrot.lane.b32.xlu1 %v5212_v26, %s5533_s29  ;;  %v4970_v26 = vpack.c.bf16 %v3237_v20, %v3236_v38 }
0x19fa   : > { %v2562_v42 = vpop.permute.xlu1 %2561 }
0x19fb   : > { %v2564_v45 = vmul.f32 %v2562_v42, %v2559_v51  ;;  %v3238_v42 = vld [vmem:[%s6609_s17 + $0x10] sm:$0xff] }
0x19fd   : > { %v6353_v46 = vadd.f32 %v2565_v43, %v2564_v45  ;;  %v3239_v43 = vld [vmem:[%s6609_s17 + $0x18] sm:$0xff] }
0x19ff   : > { %v2571_v47 = vsel %vm1092_vm3, %v2569_v27, %v6353_v46  ;;  %v4973_v27 = vpack.c.bf16 %v3239_v43, %v3238_v42 }
0x1a00   : > { %4570 = vmatmul.mubr.msk.f32.vlgmr.msra.gmra.mrb[18].mxu0 %vm1630_vm4, %v2571_v47 }
0x1a01   : > { %4923 = vmatpush3.bf16.msra.mxu0 %v6289_v1  ;;  %4607 = vmatprep.mubr.msk.f32.mxu0 %vm5529_vm1, %v5530_v14 }
0x1a02   : > { %4924 = vmatprep.subr.bf16.mxu0 %v5528_v13 }
0x1a05   : > { %4926 = vmatpush3.bf16.msra.mxu0 %v6295_v31 }
0x1a06   : > { %4927 = vmatprep.subr.bf16.mxu0 %v5528_v13 }
0x1a09   : > { %4929 = vmatpush3.bf16.msra.mxu0 %v6305_v58 }
0x1a0a   : > { %v2791_v33 = vpop.permute.xlu1 %2790  ;;  %4930 = vmatprep.subr.bf16.mxu0 %v5528_v13 }
0x1a0b   : > { %v2793_v63 = vmul.f32 %v2791_v33, %v2788_v49 }
0x1a0d   : > { %v6367_v3 = vadd.f32 %v2794_v50, %v2793_v63  ;;  %4932 = vmatpush3.bf16.msra.mxu0 %v6309_v53 }
0x1a0e   : > { %4945 = vmatprep.subr.bf16.mxu0 %v5528_v13 }
0x1a0f   : > { %v2800_v52 = vsel %vm1092_vm3, %v2798_v61, %v6367_v3 }
0x1a10   : > { %4608 = vmatmul.mubr.msk.f32.vlgmr.msra.gmra.mrb[20].mxu0 %vm1630_vm4, %v2800_v52  ;;  %v4073_v52 = vld [vmem:[#allocation9] ss:$0 sm:$0xff] }
0x1a11   : > { %4947 = vmatpush3.bf16.msra.mxu0 %v6289_v1  ;;  %4645 = vmatprep.mubr.msk.f32.mxu0 %vm5529_vm1, %v5530_v14 }
0x1a12   : > { %4948 = vmatprep.subr.bf16.mxu0 %v5528_v13 }
0x1a15   : > { %4950 = vmatpush3.bf16.msra.mxu0 %v6295_v31 }
0x1a16   : > { %4951 = vmatprep.subr.bf16.mxu0 %v5528_v13 }
0x1a19   : > { %4953 = vmatpush3.bf16.msra.mxu0 %v6305_v58 }
0x1a1a   : > { %4954 = vmatprep.subr.bf16.mxu0 %v5528_v13 }
0x1a1d   : > { %4956 = vmatpush3.bf16.msra.mxu0 %v6309_v53 }
0x1a1e   : > { %4969 = vmatprep.subr.bf16.mxu0 %v5528_v13 }
0x1ad3   : > { %v6384_v55 = vpop.f32.mrb[18].mxu0 }
0x1ad4   : > { %v4571_v56 = vpop.f32.mrb[19].mxu0 }
0x1ae3   : > { %v2870_v57 = vpop.f32.mrb[20].mxu0 }
0x1ae4   : > { %v2871_v60 = vadd.f32 %v6334_v11, %v2870_v57  ;;  %v4609_v0 = vpop.f32.mrb[21].mxu0 }
0x1ae6   : > { %2881 = vrot.lane.b32.xlu1 %v2871_v60, %s5532_s1  ;;  %v4065_v5 = vmul.f32 -1.442695, %v2871_v60 }
0x1ae8   : > { %5213 = vpow2.f32 %v4065_v5 }
0x1af2   : > { %v5214_v6 = vpop.eup %5213 }
0x1af3   : > { %v2877_v2 = vadd.f32 1.0, %v5214_v6 }
0x1af5   : > { %5215 = vrcp.f32 %v2877_v2 }
0x1aff   : > { %v5216_v7 = vpop.eup %5215 }
0x1b00   : > { %v2891_v17 = vsub.f32 1.0, %v5216_v7  ;;  %v2897_v22 = vmul.f32 %v5216_v7, %v6367_v3 }
0x1b58   : > { %v2882_v8 = vpop.permute.xlu1 %2881 }
0x1b59   : > { %v2884_v9 = vmul.f32 %v5216_v7, %v2882_v8 }
0x1b5b   : > { %2886 = vrot.lane.b32.xlu0 %v2884_v9, %s5531_s8 }
0x1b5f   : > { %2900 = vrot.lane.b32.xlu0 %v6287_v48, %s5533_s29 }
0x1bcd   : > { %v2887_v10 = vpop.permute.xlu0 %2886 }
0x1bce   : > { %v2889_v12 = vadd.f32 %v2887_v10, %v2871_v60  ;;  %v4074_v60 = vld [vmem:[#allocation11] ss:$0 sm:$0xff] }
0x1bd0   : > { %5217 = vtanh.f32 %v2889_v12 }
0x1bd1   : > { %v2901_v28 = vpop.permute.xlu0 %2900 }
0x1bda   : > { %v5218_v15 = vpop.eup %5217 }
0x1bdb   : > { %2893 = vrot.lane.b32.xlu1 %v5218_v15, %s5533_s29  ;;  %v3342_v15 = vld [vmem:[#allocation14] sm:$0xff] }
0x1c4d   : > { %v2894_v21 = vpop.permute.xlu1 %2893 }
0x1c4e   : > { %v2896_v24 = vmul.f32 %v2894_v21, %v2891_v17  ;;  %v3343_v17 = vld [vmem:[#allocation14 + $0x8] sm:$0xff]  ;;  %v3344_v21 = vld [vmem:[#allocation14 + $0x10] sm:$0xff] }
0x1c50   : > { %v6393_v25 = vadd.f32 %v2897_v22, %v2896_v24  ;;  %v4976_v22 = vpack.c.bf16 %v3343_v17, %v3342_v15  ;;  %v3345_v24 = vld [vmem:[#allocation14 + $0x18] sm:$0xff] }
0x1c52   : > { %v2903_v29 = vsel %vm1092_vm3, %v2901_v28, %v6393_v25  ;;  %v4979_v28 = vpack.c.bf16 %v3345_v24, %v3344_v21 }
0x1c53   : > { %4627 = vmatmul.mubr.msk.f32.vlgmr.msra.gmra.mrb[18].mxu1 %vm1630_vm4, %v2903_v29 }
0x1c54   : > { %4959 = vmatpush3.bf16.msra.mxu1 %v6289_v1  ;;  %4664 = vmatprep.mubr.msk.f32.mxu1 %vm5529_vm1, %v5530_v14 }
0x1c55   : > { %4960 = vmatprep.subr.bf16.mxu1 %v5528_v13 }
0x1c58   : > { %4962 = vmatpush3.bf16.msra.mxu1 %v6295_v31 }
0x1c59   : > { %4963 = vmatprep.subr.bf16.mxu1 %v5528_v13 }
0x1c5c   : > { %4965 = vmatpush3.bf16.msra.mxu1 %v6305_v58 }
0x1c5d   : > { %4966 = vmatprep.subr.bf16.mxu1 %v5528_v13 }
0x1c60   : > { %4968 = vmatpush3.bf16.msra.mxu1 %v6309_v53  ;;  %v3214_v53 = vld [vmem:[%s6660_s0] sm:$0xff] }
0x1c61   : > { %4987 = vmatprep.subr.bf16.mxu1 %v5528_v13 }
0x1d26   : > { %v2973_v48 = vpop.f32.mrb[18].mxu1 }
0x1d27   : > { %v2974_v1 = vadd.f32 %v6334_v11, %v2973_v48  ;;  %v4628_v59 = vpop.f32.mrb[19].mxu1  ;;  %v3346_v48 = vld [vmem:[#allocation14 + $0x20] sm:$0xff] }
0x1d28   : > { %v2642_v59 = vadd.f32 %v6197_v18, %v6384_v55 }
0x1d29   : > { %2984 = vrot.lane.b32.xlu1 %v2974_v1, %s5532_s1  ;;  %v4067_v44 = vmul.f32 -1.442695, %v2974_v1 }
0x1d2b   : > { %5219 = vpow2.f32 %v4067_v44 }
0x1d35   : > { %v5220_v30 = vpop.eup %5219 }
0x1d36   : > { %v2980_v31 = vadd.f32 1.0, %v5220_v30  ;;  %v3348_v30 = vld [vmem:[#allocation14 + $0x30] sm:$0xff] }
0x1d38   : > { %5221 = vrcp.f32 %v2980_v31  ;;  %v3349_v31 = vld [vmem:[#allocation14 + $0x38] sm:$0xff] }
0x1d42   : > { %v5222_v32 = vpop.eup %5221 }
0x1d43   : > { %v2994_v54 = vsub.f32 1.0, %v5222_v32  ;;  %v3000_v39 = vmul.f32 %v5222_v32, %v6393_v25 }
0x1d9b   : > { %v2985_v35 = vpop.permute.xlu1 %2984 }
0x1d9c   : > { %v2987_v58 = vmul.f32 %v5222_v32, %v2985_v35  ;;  %v4985_v35 = vpack.c.bf16 %v3349_v31, %v3348_v30 }
0x1d9e   : > { %2989 = vrot.lane.b32.xlu0 %v2987_v58, %s5531_s8 }
0x1da2   : > { %3003 = vrot.lane.b32.xlu0 %v6353_v46, %s5533_s29 }
0x1da6   : > { %3218 = vperm.xlu0 %5122, %v3214_v53  }
0x1e10   : > { %v2990_v4 = vpop.permute.xlu0 %2989 }
0x1e11   : > { %v2992_v19 = vadd.f32 %v2990_v4, %v2974_v1  ;;  %v3347_v1 = vld [vmem:[#allocation14 + $0x28] sm:$0xff] }
0x1e12   : > { %v4982_v44 = vpack.c.bf16 %v3347_v1, %v3346_v48 }
0x1e13   : > { %5223 = vtanh.f32 %v2992_v19 }
0x1e14   : > { %v3004_v51 = vpop.permute.xlu0 %3003 }
0x1e1d   : > { %v5224_v16 = vpop.eup %5223 }
0x1e1e   : > { %2996 = vrot.lane.b32.xlu1 %v5224_v16, %s5533_s29 }
0x1e22   : > { %3319 = vrot.lane.b32.xlu1 %v4072_v62, %s5531_s8  ;;  %v4058_v62 = vmul.f32 -1.442695, %v2642_v59 }
0x1e25   : > { %v3219_v56 = vpop.permute.xlu0 %3218 }
0x1e26   : > { %v3227_v57 = vmul.f32 %v4073_v52, %v3219_v56 }
0x1e28   : > { %v3235_v0 = vadd.f32 %v4074_v60, %v3227_v57 }
0x1e90   : > { %v2997_v36 = vpop.permute.xlu1 %2996 }
0x1e91   : > { %v2999_v40 = vmul.f32 %v2997_v36, %v2994_v54 }
0x1e93   : > { %v6425_v23 = vadd.f32 %v3000_v39, %v2999_v40  ;;  %v4077_v39 = vld [vmem:[%s6613_s21] ss:$0 sm:$0xff] }
0x1e94   : > { %v3320_v33 = vpop.permute.xlu1 %3319 }
0x1e95   : > { %v3006_v45 = vsel %vm1092_vm3, %v3004_v51, %v6425_v23 }
0x1e96   : > { %4646 = vmatmul.mubr.msk.f32.vlgmr.msra.gmra.mrb[22].mxu0 %vm1630_vm4, %v3006_v45 }
0x1e97   : > { %4971 = vmatpush3.bf16.msra.mxu0 %v4970_v26  ;;  %4675 = vmatprep.mubr.msk.f32.mxu0 %vm5529_vm1, %v5530_v14 }
0x1e98   : > { %4972 = vmatprep.subr.bf16.mxu0 %v5528_v13 }
0x1e9b   : > { %4974 = vmatpush3.bf16.msra.mxu0 %v4973_v27 }
0x1e9c   : > { %4975 = vmatprep.subr.bf16.mxu0 %v5528_v13 }
0x1e9e   : > { %4676 = vmatmul.mubr.msk.f32.vlgmr.msra.gmra.mrb[24].mxu0 %vm1092_vm3, %v6218_v34 }
0x1e9f   : > { %4694 = vmatprep.mubr.msk.f32.mxu0 %vm5529_vm1, %v5530_v14  ;;  %4977 = vmatpush3.bf16.msra.mxu0 %v4976_v22 }
0x1ea0   : > { %4978 = vmatprep.subr.bf16.mxu0 %v5528_v13 }
0x1ea3   : > { %4980 = vmatpush3.bf16.msra.mxu0 %v4979_v28 }
0x1ea4   : > { %4981 = vmatprep.subr.bf16.mxu0 %v5528_v13 }
0x1ea7   : > { %4983 = vmatpush3.bf16.msra.mxu0 %v4982_v44  ;;  %v3462_v44 = vld [vmem:[#allocation14 + $0x48] sm:$0xff] }
0x1ea8   : > { %4984 = vmatprep.subr.bf16.mxu0 %v5528_v13 }
0x1eab   : > { %4986 = vmatpush3.bf16.msra.mxu0 %v4985_v35 }
0x1eac   : > { %4999 = vmatprep.subr.bf16.mxu0 %v5528_v13 }
0x1f69   : > { %v3076_v47 = vpop.f32.mrb[22].mxu0 }
0x1f6a   : > { %v4647_v49 = vpop.f32.mrb[23].mxu0  ;;  %v3077_v32 = vadd.f32 %v6334_v11, %v3076_v47 }
0x1f6c   : > { %v4069_v54 = vmul.f32 -1.442695, %v3077_v32 }
0x1f71   : > { %v3308_v50 = vpop.f32.mrb[24].mxu0 }
0x1f72   : > { %v3322_v63 = vadd.f32 %v3320_v33, %v3308_v50  ;;  %v4677_v61 = vpop.f32.mrb[25].mxu0  ;;  %v3312_v5 = vadd.f32 %v3308_v50, %v3235_v0 }
0x1f74   : > { %3324 = vrot.lane.b32.xlu1 %v3322_v63, %s5531_s8  ;;  %v4076_v6 = vmul.f32 -1.442695, %v3312_v5 }
0x1f76   : > { %5225 = vpow2.f32 %v4076_v6 }
0x1f80   : > { %v5226_v34 = vpop.eup %5225 }
0x1f81   : > { %v3316_v2 = vadd.f32 1.0, %v5226_v34 }
0x1f83   : > { %5227 = vrcp.f32 %v3316_v2 }
0x1f8d   : > { %v5228_v7 = vpop.eup %5227 }
0x1f8e   : > { %v3334_v18 = vsub.f32 1.0, %v5228_v7  ;;  %v3340_v58 = vmul.f32 %v5228_v7, %v6207_v41 }
0x1fe6   : > { %v3325_v8 = vpop.permute.xlu1 %3324 }
0x1fe7   : > { %v3327_v9 = vmul.f32 %v5228_v7, %v3325_v8 }
0x1fe9   : > { %3329 = vrot.lane.b32.xlu0 %v3327_v9, %s5531_s8 }
0x205b   : > { %v3330_v10 = vpop.permute.xlu0 %3329 }
0x205c   : > { %v3332_v12 = vadd.f32 %v3330_v10, %v3235_v0 }
0x205e   : > { %5229 = vtanh.f32 %v3332_v12 }
0x205f   : > { %5231 = vpow2.f32 %v4058_v62  ;;  %v3468_v62 = vld [vmem:[#allocation14 + $0x78] sm:$0xff] }
0x2060   : > { %5233 = vpow2.f32 %v4069_v54 }
0x2068   : > { %v5230_v29 = vpop.eup %5229 }
0x2069   : > { %3336 = vrot.lane.b32.xlu1 %v5230_v29, %s5533_s29  ;;  %v5232_v41 = vpop.eup %5231 }
0x206a   : > { %v2648_v36 = vadd.f32 1.0, %v5232_v41  ;;  %v5234_v38 = vpop.eup %5233 }
0x206b   : > { %v3083_v20 = vadd.f32 1.0, %v5234_v38 }
0x206c   : > { %5235 = vrcp.f32 %v2648_v36 }
0x206d   : > { %2652 = vrot.lane.b32.xlu1 %v2642_v59, %s5532_s1  ;;  %5237 = vrcp.f32 %v3083_v20 }
0x2071   : > { %3087 = vrot.lane.b32.xlu1 %v3077_v32, %s5532_s1 }
0x2076   : > { %v5236_v43 = vpop.eup %5235 }
0x2077   : > { %v5238_v47 = vpop.eup %5237  ;;  %v2662_v9 = vsub.f32 1.0, %v5236_v43  ;;  %v2668_v12 = vmul.f32 %v5236_v43, %v6353_v46 }
0x2078   : > { %v3097_v22 = vsub.f32 1.0, %v5238_v47  ;;  %v3103_v30 = vmul.f32 %v5238_v47, %v6425_v23 }
0x20db   : > { %v3337_v55 = vpop.permute.xlu1 %3336 }
0x20dc   : > { %v3339_v53 = vmul.f32 %v3337_v55, %v3334_v18  ;;  %v3463_v18 = vld [vmem:[#allocation14 + $0x50] sm:$0xff]  ;;  %v3464_v55 = vld [vmem:[#allocation14 + $0x58] sm:$0xff] }
0x20de   : > { %v3341_v4 = vadd.f32 %v3340_v58, %v3339_v53  ;;  %v3465_v53 = vld [vmem:[#allocation14 + $0x60] sm:$0xff] }
0x20df   : > { %v2653_v40 = vpop.permute.xlu1 %2652 }
0x20e0   : > { %3352 = vrot.lane.b32.xlu0 %v3341_v4, %s5533_s29  ;;  %v2655_v45 = vmul.f32 %v5236_v43, %v2653_v40  ;;  %v3466_v4 = vld [vmem:[#allocation14 + $0x68] sm:$0xff] }
0x20e3   : > { %v3088_v27 = vpop.permute.xlu1 %3087 }
0x20e4   : > { %v3090_v49 = vmul.f32 %v5238_v47, %v3088_v27 }
0x2152   : > { %v3353_v19 = vpop.permute.xlu0 %3352 }
0x2153   : > { %v3355_v16 = vsel %vm1092_vm3, %v3353_v19, %v6344_v37  ;;  %3851 = vst.msk [vmem:[#allocation15] sm:$0xff] %vm1092_vm3, %v3353_v19  ;;  %v4994_v19 = vpack.c.bf16 %v3466_v4, %v3465_v53 }
0x2154   : > { %4695 = vmatmul.mubr.msk.f32.vlgmr.msra.gmra.mrb[26].mxu0 %vm1630_vm4, %v3355_v16  ;;  %v3467_v16 = vld [vmem:[#allocation14 + $0x70] sm:$0xff] }
0x2155   : > { %4732 = vmatprep.mubr.msk.f32.mxu0 %vm5529_vm1, %v5530_v14  ;;  %v4997_v54 = vpack.c.bf16 %v3468_v62, %v3467_v16 }
0x2227   : > { %v3431_v26 = vpop.f32.mrb[26].mxu0 }
0x2228   : > { %v3432_v51 = vadd.f32 %v4077_v39, %v3431_v26  ;;  %v4696_v42 = vpop.f32.mrb[27].mxu0 }
0x222a   : > { %3442 = vrot.lane.b32.xlu0 %v3432_v51, %s5532_s1  ;;  %v4079_v33 = vmul.f32 -1.442695, %v3432_v51 }
0x222c   : > { %5239 = vpow2.f32 %v4079_v33 }
0x222e   : > { %2657 = vrot.lane.b32.xlu0 %v2655_v45, %s5531_s8 }
0x2232   : > { %3092 = vrot.lane.b32.xlu0 %v3090_v49, %s5531_s8 }
0x2236   : > { %v5240_v50 = vpop.eup %5239 }
0x2237   : > { %v3438_v63 = vadd.f32 1.0, %v5240_v50 }
0x2239   : > { %5241 = vrcp.f32 %v3438_v63 }
0x2243   : > { %v5242_v61 = vpop.eup %5241 }
0x2244   : > { %v3452_v24 = vsub.f32 1.0, %v5242_v61  ;;  %v3458_v48 = vmul.f32 %v5242_v61, %v6344_v37  ;;  %v4991_v37 = vpack.c.bf16 %v3464_v55, %v3463_v18 }
0x229c   : > { %v3443_v52 = vpop.permute.xlu0 %3442 }
0x229d   : > { %v3445_v56 = vmul.f32 %v5242_v61, %v3443_v52 }
0x229f   : > { %3447 = vrot.lane.b32.xlu1 %v3445_v56, %s5531_s8 }
0x22a0   : > { %v2658_v57 = vpop.permute.xlu0 %2657 }
0x22a1   : > { %v2660_v60 = vadd.f32 %v2658_v57, %v2642_v59  ;;  %v3461_v59 = vld [vmem:[#allocation14 + $0x40] sm:$0xff] }
0x22a3   : > { %5243 = vtanh.f32 %v2660_v60 }
0x22a4   : > { %v3093_v0 = vpop.permute.xlu0 %3092 }
0x22a5   : > { %v3095_v5 = vadd.f32 %v3093_v0, %v3077_v32  ;;  %v4988_v32 = vpack.c.bf16 %v3462_v44, %v3461_v59 }
0x22a7   : > { %5245 = vtanh.f32 %v3095_v5 }
0x22ad   : > { %v5244_v6 = vpop.eup %5243 }
0x22ae   : > { %2664 = vrot.lane.b32.xlu1 %v5244_v6, %s5533_s29  ;;  %v3581_v6 = vld [vmem:[#allocation14 + $0x80] sm:$0xff] }
0x22b1   : > { %v5246_v34 = vpop.eup %5245 }
0x22b2   : > { %3099 = vrot.lane.b32.xlu1 %v5246_v34, %s5533_s29  ;;  %v3582_v34 = vld [vmem:[#allocation14 + $0x88] sm:$0xff] }
0x2311   : > { %v3448_v2 = vpop.permute.xlu1 %3447 }
0x2312   : > { %v3450_v7 = vadd.f32 %v3448_v2, %v3432_v51  ;;  %v4081_v51 = vld [vmem:[%s6613_s21 + $0x1] ss:$0 sm:$0xff] }
0x2313   : > { %v3583_v2 = vld [vmem:[#allocation14 + $0x90] sm:$0xff] }
0x2314   : > { %5247 = vtanh.f32 %v3450_v7  ;;  %v5000_v7 = vpack.c.bf16 %v3582_v34, %v3581_v6 }
0x2316   : > { %5001 = vmatpush3.bf16.msra.mxu0 %v5000_v7 }
0x2317   : > { %5002 = vmatprep.subr.bf16.mxu0 %v5528_v13 }
0x231e   : > { %v5248_v8 = vpop.eup %5247 }
0x231f   : > { %3454 = vrot.lane.b32.xlu0 %v5248_v8, %s5533_s29  ;;  %v3584_v8 = vld [vmem:[#allocation14 + $0x98] sm:$0xff] }
0x2320   : > { %v2665_v10 = vpop.permute.xlu1 %2664 }
0x2321   : > { %v2667_v15 = vmul.f32 %v2665_v10, %v2662_v9  ;;  %v5003_v9 = vpack.c.bf16 %v3584_v8, %v3583_v2  ;;  %v3585_v10 = vld [vmem:[#allocation14 + $0xa0] sm:$0xff] }
0x2323   : > { %v6475_v17 = vadd.f32 %v2668_v12, %v2667_v15  ;;  %v3586_v12 = vld [vmem:[#allocation14 + $0xa8] sm:$0xff]  ;;  %5004 = vmatpush3.bf16.msra.mxu0 %v5003_v9 }
0x2324   : > { %v3100_v21 = vpop.permute.xlu1 %3099  ;;  %v5006_v15 = vpack.c.bf16 %v3586_v12, %v3585_v10  ;;  %5005 = vmatprep.subr.bf16.mxu0 %v5528_v13 }
0x2325   : > { %3106 = vrot.lane.b32.xlu0 %v6475_v17, %s5533_s29  ;;  %v3102_v29 = vmul.f32 %v3100_v21, %v3097_v22  ;;  %v3587_v22 = vld [vmem:[#allocation14 + $0xb0] sm:$0xff] }
0x2327   : > { %v6481_v46 = vadd.f32 %v3103_v30, %v3102_v29  ;;  %5007 = vmatpush3.bf16.msra.mxu0 %v5006_v15 }
0x2328   : > { %5008 = vmatprep.subr.bf16.mxu0 %v5528_v13 }
0x2391   : > { %v3455_v28 = vpop.permute.xlu0 %3454 }
0x2392   : > { %v3457_v1 = vmul.f32 %v3455_v28, %v3452_v24  ;;  %v3588_v24 = vld [vmem:[#allocation14 + $0xb8] sm:$0xff] }
0x2393   : > { %v5009_v28 = vpack.c.bf16 %v3588_v24, %v3587_v22 }
0x2394   : > { %v3459_v31 = vadd.f32 %v3458_v48, %v3457_v1 }
0x2395   : > { %5010 = vmatpush3.bf16.msra.mxu0 %v5009_v28 }
0x2396   : > { %3472 = vrot.lane.b32.xlu1 %v3459_v31, %s5533_s29 }
0x2397   : > { %v3107_v35 = vpop.permute.xlu0 %3106 }
0x2398   : > { %v3109_v58 = vsel %vm1092_vm3, %v3107_v35, %v6481_v46 }
0x2399   : > { %4665 = vmatmul.mubr.msk.f32.vlgmr.msra.gmra.mrb[20].mxu1 %vm1630_vm4, %v3109_v58 }
0x239a   : > { %4989 = vmatpush3.bf16.msra.mxu1 %v4988_v32  ;;  %4713 = vmatprep.mubr.msk.f32.mxu1 %vm5529_vm1, %v5530_v14 }
0x239b   : > { %4990 = vmatprep.subr.bf16.mxu1 %v5528_v13 }
0x239e   : > { %4992 = vmatpush3.bf16.msra.mxu1 %v4991_v37 }
0x239f   : > { %4993 = vmatprep.subr.bf16.mxu1 %v5528_v13 }
0x23a2   : > { %4995 = vmatpush3.bf16.msra.mxu1 %v4994_v19 }
0x23a3   : > { %4996 = vmatprep.subr.bf16.mxu1 %v5528_v13  ;;  %v4085_v13 = vld [vmem:[%s6613_s21 + $0x2] ss:$0 sm:$0xff] }
0x23a6   : > { %4998 = vmatpush3.bf16.msra.mxu1 %v4997_v54 }
0x2408   : > { %v3473_v41 = vpop.permute.xlu1 %3472 }
0x2409   : > { %v3475_v36 = vsel %vm1092_vm3, %v3473_v41, %v6475_v17  ;;  %3852 = vst.msk [vmem:[#allocation15 + $0x8] sm:$0xff] %vm1092_vm3, %v3473_v41 }
0x240a   : > { %4714 = vmatmul.mubr.msk.f32.vlgmr.msra.gmra.mrb[22].mxu1 %vm1630_vm4, %v3475_v36  ;;  %v3700_v36 = vld [vmem:[%s6661_s6] sm:$0xff] }
0x246c   : > { %v3179_v14 = vpop.f32.mrb[20].mxu1 }
0x246d   : > { %v3180_v38 = vadd.f32 %v6334_v11, %v3179_v14  ;;  %v4666_v20 = vpop.f32.mrb[21].mxu1  ;;  %v3701_v14 = vld [vmem:[%s6661_s6 + $0x8] sm:$0xff] }
0x246f   : > { %3190 = vrot.lane.b32.xlu1 %v3180_v38, %s5532_s1  ;;  %v4071_v39 = vmul.f32 -1.442695, %v3180_v38 }
0x2471   : > { %5249 = vpow2.f32 %v4071_v39 }
0x247b   : > { %v5250_v40 = vpop.eup %5249 }
0x247c   : > { %v3186_v26 = vadd.f32 1.0, %v5250_v40 }
0x247e   : > { %5251 = vrcp.f32 %v3186_v26 }
0x2488   : > { %v5252_v27 = vpop.eup %5251 }
0x2489   : > { %v3200_v31 = vsub.f32 1.0, %v5252_v27  ;;  %v3206_v35 = vmul.f32 %v5252_v27, %v6481_v46 }
0x24dd   : > { %v3551_v42 = vpop.f32.mrb[22].mxu1 }
0x24de   : > { %v3552_v43 = vadd.f32 %v4081_v51, %v3551_v42  ;;  %v4715_v45 = vpop.f32.mrb[23].mxu1 }
0x24e0   : > { %3562 = vrot.lane.b32.xlu0 %v3552_v43, %s5532_s1  ;;  %v4083_v49 = vmul.f32 -1.442695, %v3552_v43 }
0x24e1   : > { %v3191_v47 = vpop.permute.xlu1 %3190 }
0x24e2   : > { %v3193_v11 = vmul.f32 %v5252_v27, %v3191_v47  ;;  %5253 = vpow2.f32 %v4083_v49 }
0x24e4   : > { %3195 = vrot.lane.b32.xlu1 %v3193_v11, %s5531_s8 }
0x24ec   : > { %v5254_v33 = vpop.eup %5253 }
0x24ed   : > { %v3558_v50 = vadd.f32 1.0, %v5254_v33 }
0x24ef   : > { %5255 = vrcp.f32 %v3558_v50 }
0x24f9   : > { %v5256_v63 = vpop.eup %5255 }
0x24fa   : > { %v3572_v29 = vsub.f32 1.0, %v5256_v63  ;;  %v3578_v1 = vmul.f32 %v5256_v63, %v6475_v17 }
0x2552   : > { %v3563_v61 = vpop.permute.xlu0 %3562 }
0x2553   : > { %v3565_v52 = vmul.f32 %v5256_v63, %v3563_v61 }
0x2555   : > { %3567 = vrot.lane.b32.xlu0 %v3565_v52, %s5531_s8 }
0x2556   : > { %v3196_v56 = vpop.permute.xlu1 %3195 }
0x2557   : > { %v3198_v57 = vadd.f32 %v3196_v56, %v3180_v38  ;;  %v5011_v38 = vpack.c.bf16 %v3701_v14, %v3700_v36 }
0x2559   : > { %5257 = vtanh.f32 %v3198_v57  ;;  %5012 = vmatprep.subr.bf16.mxu1 %v5011_v38 }
0x255a   : > { %5014 = vmatpush3.bf16.msra.mxu1 %v5011_v38 }
0x2563   : > { %v5258_v60 = vpop.eup %5257 }
0x2564   : > { %3202 = vrot.lane.b32.xlu1 %v5258_v60, %s5533_s29 }
0x25c7   : > { %v3568_v0 = vpop.permute.xlu0 %3567 }
0x25c8   : > { %v3570_v5 = vadd.f32 %v3568_v0, %v3552_v43 }
0x25ca   : > { %5259 = vtanh.f32 %v3570_v5 }
0x25d4   : > { %v5260_v21 = vpop.eup %5259 }
0x25d5   : > { %3574 = vrot.lane.b32.xlu0 %v5260_v21, %s5533_s29 }
0x25d6   : > { %v3203_v30 = vpop.permute.xlu1 %3202 }
0x25d7   : > { %v3205_v32 = vmul.f32 %v3203_v30, %v3200_v31 }
0x25d9   : > { %v3207_v18 = vadd.f32 %v3206_v35, %v3205_v32 }
0x2647   : > { %v3575_v48 = vpop.permute.xlu0 %3574 }
0x2648   : > { %v3577_v59 = vmul.f32 %v3575_v48, %v3572_v29 }
0x264a   : > { %v3579_v44 = vadd.f32 %v3578_v1, %v3577_v59 }
0x264c   : > { %3592 = vrot.lane.b32.xlu0 %v3579_v44, %s5533_s29 }
0x26be   : > { %v3593_v55 = vpop.permute.xlu0 %3592 }
0x26bf   : > { %v3595_v58 = vsel %vm1092_vm3, %v3593_v55, %v3207_v18  ;;  %3853 = vst.msk [vmem:[#allocation15 + $0x10] sm:$0xff] %vm1092_vm3, %v3593_v55 }
0x26c0   : > { %4733 = vmatmul.mubr.msk.f32.vlgmr.msra.gmra.mrb[28].mxu0 %vm1630_vm4, %v3595_v58 }
0x2793   : > { %v3671_v17 = vpop.f32.mrb[28].mxu0 }
0x2794   : > { %v3672_v37 = vadd.f32 %v4085_v13, %v3671_v17  ;;  %v4734_v53 = vpop.f32.mrb[29].mxu0 }
0x2796   : > { %3682 = vrot.lane.b32.xlu1 %v3672_v37, %s5532_s1  ;;  %v4087_v4 = vmul.f32 -1.442695, %v3672_v37 }
0x2798   : > { %5261 = vpow2.f32 %v4087_v4 }
0x27a2   : > { %v5262_v19 = vpop.eup %5261 }
0x27a3   : > { %v3678_v16 = vadd.f32 1.0, %v5262_v19 }
0x27a5   : > { %5263 = vrcp.f32 %v3678_v16 }
0x27af   : > { %v5264_v62 = vpop.eup %5263 }
0x27b0   : > { %v3692_v42 = vsub.f32 1.0, %v5264_v62  ;;  %v3698_v45 = vmul.f32 %v5264_v62, %v3207_v18 }
0x2808   : > { %v3683_v54 = vpop.permute.xlu1 %3682 }
0x2809   : > { %v3685_v41 = vmul.f32 %v5264_v62, %v3683_v54 }
0x280b   : > { %3687 = vrot.lane.b32.xlu0 %v3685_v41, %s5531_s8 }
0x280f   : > { %3717 = vrot.lane.b32.xlu0 %v6367_v3, %s5533_s29  ;;  %v3702_v3 = vld [vmem:[%s6661_s6 + $0x10] sm:$0xff] }
0x2813   : > { %3721 = vrot.lane.b32.xlu0 %v6425_v23, %s5533_s29  ;;  %v3703_v23 = vld [vmem:[%s6661_s6 + $0x18] sm:$0xff] }
0x2814   : > { %v5015_v20 = vpack.c.bf16 %v3703_v23, %v3702_v3 }
0x2816   : > { %5016 = vmatprep.subr.bf16.mxu1 %v5015_v20 }
0x2817   : > { %3725 = vrot.lane.b32.xlu0 %v3207_v18, %s5533_s29  ;;  %5018 = vmatpush3.bf16.msra.mxu1 %v5015_v20 }
0x287d   : > { %v3688_v39 = vpop.permute.xlu0 %3687 }
0x287e   : > { %v3690_v40 = vadd.f32 %v3688_v39, %v3672_v37 }
0x2880   : > { %5265 = vtanh.f32 %v3690_v40 }
0x2881   : > { %v3718_v26 = vpop.permute.xlu0 %3717 }
0x2882   : > { %4743 = vmatprep.mubr.msk.f32.mxu1 %vm1092_vm3, %v3718_v26 }
0x2885   : > { %v3722_v47 = vpop.permute.xlu0 %3721 }
0x288a   : > { %v5266_v51 = vpop.eup %5265 }
0x288b   : > { %3694 = vrot.lane.b32.xlu1 %v5266_v51, %s5533_s29 }
0x288f   : > { %3719 = vrot.lane.b32.xlu1 %v6393_v25, %s5533_s29  ;;  %v3726_v25 = vpop.permute.xlu0 %3725 }
0x2893   : > { %3723 = vrot.lane.b32.xlu1 %v6481_v46, %s5533_s29 }
0x28fd   : > { %v3695_v43 = vpop.permute.xlu1 %3694 }
0x28fe   : > { %v3697_v27 = vmul.f32 %v3695_v43, %v3692_v42 }
0x2900   : > { %v3699_v11 = vadd.f32 %v3698_v45, %v3697_v27 }
0x2901   : > { %v3720_v49 = vpop.permute.xlu1 %3719 }
0x2902   : > { %3727 = vrot.lane.b32.xlu1 %v3699_v11, %s5533_s29  ;;  %4744 = vmatmul.mubr.msk.f32.vlgmr.msra.gmra.mrb[24].mxu1 %vm1092_vm3, %v3720_v49  ;;  %s5463_s29 = scalar_lea.vmem %s3871_s7, 512 }
0x2903   : > { %4746 = vmatprep.mubr.msk.f32.mxu1 %vm1092_vm3, %v3722_v47  ;;  %p5464_p13 = scmp.ne.s32.totalorder %s3871_s7, %s5463_s29  ;;  %p5471_p4 = scmp.lt.s32.totalorder %s5463_s29, %s5463_s29 }
0x2905   : > { %v3724_v33 = vpop.permute.xlu1 %3723  ;;  %p5465_p0 = pnand %p5464_p13, %p5087_p2  ;;  %p5472_p1 = por %p5471_p4, %p5470_p8 }
0x2906   : > { %4747 = vmatmul.mubr.msk.f32.gmra.mrb[26].mxu1 %vm1092_vm3, %v3724_v33 }
0x2907   : > { %4749 = vmatprep.mubr.msk.f32.mxu1 %vm1092_vm3, %v3726_v25  ;;  %p5466_p3 = pneg %p5465_p0 }
0x2909   : > { %p5473_p5 = pnand %p5472_p1, %p5466_p3 }
0x2974   : > { %v3728_v46 = vpop.permute.xlu1 %3727 }
0x2975   : > { %3854 = vst.msk [vmem:[#allocation15 + $0x18] sm:$0xff] %vm1092_vm3, %v3728_v46  ;;  %4750 = vmatmul.mubr.msk.f32.gmra.mrb[28].mxu1 %vm1092_vm3, %v3728_v46 }
0x2976   : > { %5476 = shalt.err (!%p5473_p5)
}
0x2977   : > { %s6662_s2 = sld [smem:[#allocation32_spill]] }
0x297d   : > { %s5477_s24 = scalar_lea.hbm %s6662_s2, 512 }
0x297e   : > { %p5478_p7 = scmp.ne.s32.totalorder %s6662_s2, %s5477_s24  ;;  %p5483_p10 = scmp.lt.u32.totalorder %s5477_s24, %s6662_s2 }
0x2980   : > { %p5479_p6 = pnand %p5478_p7, %p5087_p2 }
0x2982   : > { %p5480_p9 = pneg %p5479_p6 }
0x2984   : > { %p5485_p11 = pnand %p5483_p10, %p5480_p9 }
0x2986   : > { %5488 = shalt.err (!%p5485_p11)
}
0x2987   : > { %s5535_s9 = smov 128   ;;  %s5536_s3 = smov 8   ;;  %vm3837_vm5 = vcmask 15360  }
0x2988   : > { %5048 = dma.vmem_to_hbm [thread:$0]  (%p5087_p2), %s3871_s7, 512, %s6662_s2, [#allocation5], %s5535_s9, %s5535_s9, %s5536_s3  }
0x2989   : > { %s6663_s5 = sld [smem:[#allocation31_spill]]  ;;  %s6664_s1 = sld [smem:[#allocation22_spill]] }
0x298f   : > { %v4088_v56 = vld [vmem:[%s6663_s5] ss:$0 sm:$0xff]  ;;  %v803_v8 = vld [vmem:[%s6664_s1 + $0x8] sm:$0xff]  ;;  %v804_v9 = vld [vmem:[%s6664_s1 + $0x10] sm:$0xff] }
0x2990   : > { %v802_v34 = vld [vmem:[%s6664_s1] sm:$0xff]  ;;  %v805_v10 = vld [vmem:[%s6664_s1 + $0x18] sm:$0xff] }
0x29d5   : > { %v4745_v50 = vpop.f32.mrb[24].mxu1 }
0x29d6   : > { %v3807_v63 = vpop.f32.mrb[25].mxu1  ;;  %v3813_v57 = vadd.f32 %v4745_v50, %v4088_v56 }
0x29d7   : > { %v3808_v0 = vadd.f32 %v4088_v56, %v3807_v63 }
0x29d9   : > { %v4748_v61 = vpop.f32.mrb[26].mxu1 }
0x29da   : > { %v3817_v52 = vpop.f32.mrb[27].mxu1  ;;  %v3823_v5 = vadd.f32 %v4748_v61, %v4088_v56 }
0x29db   : > { %v3818_v6 = vadd.f32 %v4088_v56, %v3817_v52 }
0x2a48   : > { %v4751_v60 = vpop.f32.mrb[28].mxu1 }
0x2a49   : > { %v3832_v2 = vadd.f32 %v4751_v60, %v4088_v56  ;;  %v3827_v7 = vpop.f32.mrb[29].mxu1 }
0x2a4b   : > { %v3835_v12 = vadd.f32 %v3832_v2, %v3808_v0  ;;  %v3839_v15 = vadd.f32 %v3832_v2, %v3813_v57  ;;  %v3840_v21 = vadd.f32 %v3832_v2, %v3818_v6  ;;  %v3841_v22 = vadd.f32 %v3832_v2, %v3823_v5 }
0x2a4d   : > { %v3836_v24 = vadd.f32 %v3835_v12, %v805_v10  ;;  %v3842_v28 = vadd.f32 %v3835_v12, %v802_v34  ;;  %v3843_v29 = vadd.f32 %v3839_v15, %v803_v8  ;;  %v3844_v48 = vadd.f32 %v3840_v21, %v804_v9 }
0x2a4e   : > { %v3845_v1 = vadd.f32 %v3841_v22, %v805_v10 }
0x2a4f   : > { %3838 = vst.msk [vmem:[%s5879_s23] sm:$0xff] %vm3837_vm5, %v3836_v24  ;;  %3846 = vst.msk [vmem:[#allocation2] sm:$0xff] %vm3837_vm5, %v3842_v28 }
0x2a50   : > { %3847 = vst.msk [vmem:[#allocation2 + $0x8] sm:$0xff] %vm3837_vm5, %v3843_v29  ;;  %3848 = vst.msk [vmem:[#allocation2 + $0x10] sm:$0xff] %vm3837_vm5, %v3844_v48 }
0x2a51   : > { %3849 = vst.msk [vmem:[#allocation2 + $0x18] sm:$0xff] %vm3837_vm5, %v3845_v1 }
0x2a52   : > { %5510 = dma.done.wait (%p5087_p2), [#allocation5], 512  }
0x2a53   : > { %5512 = vsyncadd (%p5087_p2), [#allocation5], 4294966784 }
0x2a54 PF: > { %s6665_s4 = sld [smem:[#allocation21_spill]] }
0x2a5a   : > { %s39_s4 = sadd.s32 1, %s6665_s4  }
0x2a5b   : > { %p36_p12 = scmp.ge.s32.totalorder %s39_s4, 5  }
0x2a5d   :  { %38 = sbr.rel (!%p36_p12) target bundleno = 17 (0x11), region = 188 }
0x2a64   :  { %3894 = vsyncpa [#allocation4], 1 }
0x2a65   :  { %3896 = vsyncpa [#allocation4 + $0x1], 1 }
0x2a66   :  { %3897 = vsyncpa [#allocation7], 1 }
0x2a67   :  { %3898 = vsyncpa [#allocation10], 1 }
0x2a68   :  { %3899 = vsyncpa [#allocation13], 1 }
0x2a69   :  { %3900 = vsyncpa [#allocation5], 1 }
0x2a6a   :  { %3902 = vsyncpa [#allocation5 + $0x1], 1 }

</bundles_post_ra>
